<compile_context>
chip_gen: v5e
topology: v5e:2x2
jax: 0.10.0
libtpu: 0.0.40
codegen_flags: <defaults>
</compile_context>

<pallas_src>
import functools
import math

import jax
import jax.numpy as jnp
from jax.experimental import pallas as pl
from jax.experimental.pallas import tpu as pltpu

LN_EPS = 1e-5
LANE = 128
SUBLANE = 8


def _layernorm_onepass(x, gamma, beta):
    """LayerNorm over the last axis with single-pass moments, all in f32."""
    n = x.shape[-1]
    s1 = jnp.sum(x, axis=-1, keepdims=True)
    s2 = jnp.sum(x * x, axis=-1, keepdims=True)
    mean = s1 * (1.0 / n)
    var = jnp.maximum(s2 * (1.0 / n) - mean * mean, 0.0)
    return (x - mean) * jax.lax.rsqrt(var + LN_EPS) * gamma + beta


def actor_kernel(x_ref,
                 w1_ref, b1_ref, g1_ref, be1_ref,
                 w2_ref, b2_ref, g2_ref, be2_ref,
                 w3_ref, b3_ref,
                 out_ref):
    x = x_ref[...]                                            # (tb, d_in) f32

    # fc1: bf16 MXU operands, f32 accumulation; LN + ReLU in f32.
    h1 = jnp.dot(x.astype(jnp.bfloat16), w1_ref[...],
                 preferred_element_type=jnp.float32) + b1_ref[...]
    h1 = jnp.maximum(_layernorm_onepass(h1, g1_ref[...], be1_ref[...]), 0.0)

    # fc2 + LN + ReLU.
    h2 = jnp.dot(h1.astype(jnp.bfloat16), w2_ref[...],
                 preferred_element_type=jnp.float32) + b2_ref[...]
    h2 = jnp.maximum(_layernorm_onepass(h2, g2_ref[...], be2_ref[...]), 0.0)

    # fc3 transposed: (pad_rows, hd2) contracted with (tb, hd2) on hd2 -> (pad_rows, tb).
    # Batch lives on the lane axis, so the store is lane-dense while the
    # writeback is only 8 rows instead of a 128-lane padded slab.
    a = jax.lax.dot_general(
        w3_ref[...], h2.astype(jnp.bfloat16),
        dimension_numbers=(((1,), (1,)), ((), ())),
        preferred_element_type=jnp.float32) + b3_ref[...]
    out_ref[...] = jnp.tanh(a)


def prepare_params(params):
    """One-time conversion to kernel-ready layouts (do once, keep on device):
       - fc1/fc2 weights as (in, out) bf16 (MXU operands),
       - biases / LN params as 2-D (1, features) f32,
       - fc3 weight stored TRANSPOSED (out, in), out axis zero-padded to a
         multiple of 8 sublanes; fc3 bias as an (pad_rows, 1) f32 column."""
    hd2, action_dim = params["w3"].shape
    pad_rows = pl.cdiv(action_dim, SUBLANE) * SUBLANE
    w3_t = jnp.zeros((pad_rows, hd2), jnp.float32).at[:action_dim, :].set(
        params["w3"].T)
    b3 = jnp.zeros((pad_rows, 1), jnp.float32).at[:action_dim, 0].set(params["b3"])
    as_row = lambda v: v.reshape(1, -1).astype(jnp.float32)
    return {
        "w1": params["w1"].astype(jnp.bfloat16),
        "b1": as_row(params["b1"]),
        "g1": as_row(params["g1"]),
        "beta1": as_row(params["beta1"]),
        "w2": params["w2"].astype(jnp.bfloat16),
        "b2": as_row(params["b2"]),
        "g2": as_row(params["g2"]),
        "beta2": as_row(params["beta2"]),
        "w3": w3_t.astype(jnp.bfloat16),
        "b3": b3,
    }


def _round_up(x, m):
    return ((x + m - 1) // m) * m


@functools.partial(jax.jit, static_argnames=("action_dim", "block_b"))
def actor_forward(state, prep, *, action_dim, block_b=1024):
    """state: (B, d_in) f32.  prep: output of prepare_params().  -> (B, action_dim) f32."""
    B, d_in = state.shape
    hd1 = prep["w1"].shape[1]
    hd2 = prep["w2"].shape[1]
    pad_rows = prep["w3"].shape[0]

    # Tiny batches (incl. the original B=1 / .item() case): a pallas_call is pure
    # per-call fixed cost there, so let XLA fuse the plain forward instead.
    if B < 64:
        h1 = jnp.dot(state.astype(jnp.bfloat16), prep["w1"],
                     preferred_element_type=jnp.float32) + prep["b1"]
        h1 = jnp.maximum(_layernorm_onepass(h1, prep["g1"], prep["beta1"]), 0.0)
        h2 = jnp.dot(h1.astype(jnp.bfloat16), prep["w2"],
                     preferred_element_type=jnp.float32) + prep["b2"]
        h2 = jnp.maximum(_layernorm_onepass(h2, prep["g2"], prep["beta2"]), 0.0)
        a = jnp.dot(h2.astype(jnp.bfloat16), prep["w3"].T,
                    preferred_element_type=jnp.float32) + prep["b3"][:, 0]
        return jnp.tanh(a)[:, :action_dim]

    # Batch tile: as large as block_b, but keep >= 2 grid steps so v7x's two
    # TensorCores both get work, and keep it a multiple of 128 so the
    # (pad_rows, tb) output block stays lane-aligned.
    if B <= LANE:
        tb = B                                    # single step; block == full dim
    else:
        tb = min(_round_up(block_b, LANE), _round_up(pl.cdiv(B, 2), LANE))
    grid = (pl.cdiv(B, tb),)

    def resident(shape):
        # Same block index every grid step -> stays resident in VMEM.
        # NOTE: still double-buffered by default; only matters if hd is ever
        # scaled to ~2K+ on v7x (then use pl.Buffered(1) / raise vmem limit).
        return pl.BlockSpec(shape, lambda i: (0, 0))

    in_specs = [
        pl.BlockSpec((tb, d_in), lambda i: (i, 0)),                 # state (batch-tiled)
        resident((d_in, hd1)), resident((1, hd1)),                  # w1, b1
        resident((1, hd1)), resident((1, hd1)),                     # g1, beta1
        resident((hd1, hd2)), resident((1, hd2)),                   # w2, b2
        resident((1, hd2)), resident((1, hd2)),                     # g2, beta2
        resident((pad_rows, hd2)), resident((pad_rows, 1)),         # w3^T, b3
    ]
    # Output is transposed: (pad_rows, B), batch on the lane axis.
    out_specs = pl.BlockSpec((pad_rows, tb), lambda i: (0, i))

    out = pl.pallas_call(
        actor_kernel,
        out_shape=jax.ShapeDtypeStruct((pad_rows, B), jnp.float32),
        grid=grid,
        in_specs=in_specs,
        out_specs=out_specs,
        compiler_params=pltpu.CompilerParams(
            dimension_semantics=("parallel",),    # lets v7x split batch tiles across its 2 TCs
        ),
    )(state,
      prep["w1"], prep["b1"], prep["g1"], prep["beta1"],
      prep["w2"], prep["b2"], prep["g2"], prep["beta2"],
      prep["w3"], prep["b3"])

    # Narrow + transpose back: reads only the tiny (pad_rows, B) array,
    # not a (B, 128) padded slab.
    return out[:action_dim, :].T


def init_params(key, input_dim, hd1, hd2, action_dim):
    """Mirrors ActorNetwork.initialize_weights_bias().
    PyTorch Linear weight is (out, in) so weight.size()[0] == out_features:
      f1 = 1/sqrt(hd1), f2 = 1/sqrt(hd2), f3 = 0.003.
    Weights are stored transposed as (in, out) for `x @ W`."""
    ks = jax.random.split(key, 6)
    f1 = 1.0 / math.sqrt(hd1)
    f2 = 1.0 / math.sqrt(hd2)
    f3 = 0.003
    return {
        "w1": jax.random.uniform(ks[0], (input_dim, hd1), jnp.float32, -f1, f1),
        "b1": jax.random.uniform(ks[1], (hd1,), jnp.float32, -f1, f1),
        "g1": jnp.ones((hd1,), jnp.float32),        # nn.LayerNorm default weight
        "beta1": jnp.zeros((hd1,), jnp.float32),    # nn.LayerNorm default bias
        "w2": jax.random.uniform(ks[2], (hd1, hd2), jnp.float32, -f2, f2),
        "b2": jax.random.uniform(ks[3], (hd2,), jnp.float32, -f2, f2),
        "g2": jnp.ones((hd2,), jnp.float32),
        "beta2": jnp.zeros((hd2,), jnp.float32),
        "w3": jax.random.uniform(ks[4], (hd2, action_dim), jnp.float32, -f3, f3),
        "b3": jax.random.uniform(ks[5], (action_dim,), jnp.float32, -f3, f3),
    }


if __name__ == "__main__":
    # Lane-friendly demo shapes: hidden dims multiple of 128; batch large enough
    # to exercise >= 2 grid steps of the enlarged batch tile.
    input_dim, hd1, hd2, action_dim = 8, 128, 128, 1
    batch = 512                                   # tb = 256 -> 2 grid steps

    key = jax.random.PRNGKey(0)
    k_state, k_params = jax.random.split(key)
    state = jax.random.normal(k_state, (batch, input_dim), jnp.float32)
    params = init_params(k_params, input_dim, hd1, hd2, action_dim)
    prep = prepare_params(params)                 # stage weights once, reuse per call

    out = actor_forward(state, prep, action_dim=action_dim, block_b=1024)
    out = jax.block_until_ready(out)
    assert out.shape == (batch, action_dim)

    # Pure-JAX references (PyTorch-style two-pass LayerNorm).
    def ref_ln(x, g, b):
        mean = jnp.mean(x, axis=-1, keepdims=True)
        var = jnp.mean((x - mean) ** 2, axis=-1, keepdims=True)
        return (x - mean) * jax.lax.rsqrt(var + LN_EPS) * g + b

    def ref(x, p, dot_dtype):
        def dot(a, w):
            return jnp.dot(a.astype(dot_dtype), w.astype(dot_dtype),
                           preferred_element_type=jnp.float32)
        h = jnp.maximum(ref_ln(dot(x, p["w1"]) + p["b1"], p["g1"], p["beta1"]), 0.0)
        h = jnp.maximum(ref_ln(dot(h, p["w2"]) + p["b2"], p["g2"], p["beta2"]), 0.0)
        return jnp.tanh(dot(h, p["w3"]) + p["b3"])

    # 1) Check vs a reference with the same bf16-operand / f32-accum numerics.
    exp_bf16 = jax.block_until_ready(ref(state, params, jnp.bfloat16))
    assert jnp.allclose(out, exp_bf16, atol=1e-3), float(jnp.max(jnp.abs(out - exp_bf16)))

    # 2) Loose check vs the full-f32 PyTorch-equivalent forward.
    exp_f32 = jax.block_until_ready(ref(state, params, jnp.float32))
    assert jnp.allclose(out, exp_f32, atol=1e-2), float(jnp.max(jnp.abs(out - exp_f32)))

    assert bool(jnp.all(jnp.abs(out) <= 1.0))

    # Small-batch path (B < 64 -> plain fused jnp forward) sanity check.
    out_small = jax.block_until_ready(
        actor_forward(state[:4], prep, action_dim=action_dim))
    assert jnp.allclose(out_small, exp_f32[:4], atol=1e-2)

    # Equivalent of the original `return x.item()` for a single state:
    _single_action = float(out[0, 0])
    # TODO(synk): the nn.Module returns a host Python float via .item(); here the
    # batched device array is returned and scalar extraction is left to the caller.

    print("KERNEL_OK")
</pallas_src>

<mosaic_0001>
module attributes {stable_mosaic.version = 11 : i64} {
  func.func @actor_kernel(%arg0: i32, %arg1: memref<256x8xf32, #tpu.memory_space<vmem>>, %arg2: memref<8x128xbf16, #tpu.memory_space<vmem>>, %arg3: memref<1x128xf32, #tpu.memory_space<vmem>>, %arg4: memref<1x128xf32, #tpu.memory_space<vmem>>, %arg5: memref<1x128xf32, #tpu.memory_space<vmem>>, %arg6: memref<128x128xbf16, #tpu.memory_space<vmem>>, %arg7: memref<1x128xf32, #tpu.memory_space<vmem>>, %arg8: memref<1x128xf32, #tpu.memory_space<vmem>>, %arg9: memref<1x128xf32, #tpu.memory_space<vmem>>, %arg10: memref<8x128xbf16, #tpu.memory_space<vmem>>, %arg11: memref<8x1xf32, #tpu.memory_space<vmem>>, %arg12: memref<8x256xf32, #tpu.memory_space<vmem>>) attributes {dimension_semantics = [#tpu.dimension_semantics<parallel>], iteration_bounds = array<i64: 2>, scalar_prefetch = 0 : i64, scratch_operands = 0 : i64, tpu.core_type = #tpu.core_type<tc>, window_params = [{transform_indices = @transform_0, window_bounds = array<i64: 256, 8>}, {pipeline_mode = #tpu.pipeline_mode<synchronous>, transform_indices = @transform_1, window_bounds = array<i64: 8, 128>}, {pipeline_mode = #tpu.pipeline_mode<synchronous>, transform_indices = @transform_2, window_bounds = array<i64: 1, 128>}, {pipeline_mode = #tpu.pipeline_mode<synchronous>, transform_indices = @transform_3, window_bounds = array<i64: 1, 128>}, {pipeline_mode = #tpu.pipeline_mode<synchronous>, transform_indices = @transform_4, window_bounds = array<i64: 1, 128>}, {pipeline_mode = #tpu.pipeline_mode<synchronous>, transform_indices = @transform_5, window_bounds = array<i64: 128, 128>}, {pipeline_mode = #tpu.pipeline_mode<synchronous>, transform_indices = @transform_6, window_bounds = array<i64: 1, 128>}, {pipeline_mode = #tpu.pipeline_mode<synchronous>, transform_indices = @transform_7, window_bounds = array<i64: 1, 128>}, {pipeline_mode = #tpu.pipeline_mode<synchronous>, transform_indices = @transform_8, window_bounds = array<i64: 1, 128>}, {pipeline_mode = #tpu.pipeline_mode<synchronous>, transform_indices = @transform_9, window_bounds = array<i64: 8, 128>}, {pipeline_mode = #tpu.pipeline_mode<synchronous>, transform_indices = @transform_10, window_bounds = array<i64: 8, 1>}, {transform_indices = @transform_11, window_bounds = array<i64: 8, 256>}]} {
    %c0 = arith.constant 0 : index
    %c0_0 = arith.constant 0 : index
    %0 = vector.load %arg1[%c0, %c0_0] : memref<256x8xf32, #tpu.memory_space<vmem>>, vector<256x8xf32>
    %1 = arith.truncf %0 : vector<256x8xf32> to vector<256x8xbf16>
    %c0_1 = arith.constant 0 : index
    %c0_2 = arith.constant 0 : index
    %2 = vector.load %arg2[%c0_1, %c0_2] : memref<8x128xbf16, #tpu.memory_space<vmem>>, vector<8x128xbf16>
    %cst = arith.constant dense<0.000000e+00> : vector<256x128xf32>
    %3 = tpu.matmul %1, %2, %cst {dimension_numbers = #tpu.dot_dimension_numbers<[1], [0], [0], [1], [0, 0, 1, 1], [], []>} : vector<256x8xbf16>, vector<8x128xbf16>, vector<256x128xf32> -> vector<256x128xf32>
    %c0_3 = arith.constant 0 : index
    %c0_4 = arith.constant 0 : index
    %4 = vector.load %arg3[%c0_3, %c0_4] : memref<1x128xf32, #tpu.memory_space<vmem>>, vector<1x128xf32>
    %5 = vector.broadcast %4 : vector<1x128xf32> to vector<256x128xf32>
    %6 = arith.addf %3, %5 : vector<256x128xf32>
    %c0_5 = arith.constant 0 : index
    %c0_6 = arith.constant 0 : index
    %7 = vector.load %arg4[%c0_5, %c0_6] : memref<1x128xf32, #tpu.memory_space<vmem>>, vector<1x128xf32>
    %c0_7 = arith.constant 0 : index
    %c0_8 = arith.constant 0 : index
    %8 = vector.load %arg5[%c0_7, %c0_8] : memref<1x128xf32, #tpu.memory_space<vmem>>, vector<1x128xf32>
    %cst_9 = arith.constant dense<0.000000e+00> : vector<256xf32>
    %9 = vector.multi_reduction <add>, %6, %cst_9 [1] : vector<256x128xf32> to vector<256xf32>
    %10 = vector.shape_cast %9 : vector<256xf32> to vector<256x1xf32>
    %11 = arith.mulf %6, %6 : vector<256x128xf32>
    %cst_10 = arith.constant dense<0.000000e+00> : vector<256xf32>
    %12 = vector.multi_reduction <add>, %11, %cst_10 [1] : vector<256x128xf32> to vector<256xf32>
    %13 = vector.shape_cast %12 : vector<256xf32> to vector<256x1xf32>
    %cst_11 = arith.constant 7.812500e-03 : f32
    %14 = vector.broadcast %cst_11 : f32 to vector<256x1xf32>
    %15 = arith.mulf %10, %14 : vector<256x1xf32>
    %cst_12 = arith.constant 7.812500e-03 : f32
    %16 = vector.broadcast %cst_12 : f32 to vector<256x1xf32>
    %17 = arith.mulf %13, %16 : vector<256x1xf32>
    %18 = arith.mulf %15, %15 : vector<256x1xf32>
    %19 = arith.subf %17, %18 : vector<256x1xf32>
    %cst_13 = arith.constant 0.000000e+00 : f32
    %20 = vector.broadcast %cst_13 : f32 to vector<256x1xf32>
    %21 = arith.maximumf %19, %20 : vector<256x1xf32>
    %22 = vector.broadcast %15 : vector<256x1xf32> to vector<256x128xf32>
    %23 = arith.subf %6, %22 : vector<256x128xf32>
    %cst_14 = arith.constant 9.99999974E-6 : f32
    %24 = vector.broadcast %cst_14 : f32 to vector<256x1xf32>
    %25 = arith.addf %21, %24 : vector<256x1xf32>
    %26 = math.rsqrt %25 : vector<256x1xf32>
    %27 = vector.broadcast %26 : vector<256x1xf32> to vector<256x128xf32>
    %28 = arith.mulf %23, %27 : vector<256x128xf32>
    %29 = vector.broadcast %7 : vector<1x128xf32> to vector<256x128xf32>
    %30 = arith.mulf %28, %29 : vector<256x128xf32>
    %31 = vector.broadcast %8 : vector<1x128xf32> to vector<256x128xf32>
    %32 = arith.addf %30, %31 : vector<256x128xf32>
    %cst_15 = arith.constant 0.000000e+00 : f32
    %33 = vector.broadcast %cst_15 : f32 to vector<256x128xf32>
    %34 = arith.maximumf %32, %33 : vector<256x128xf32>
    %35 = arith.truncf %34 : vector<256x128xf32> to vector<256x128xbf16>
    %c0_16 = arith.constant 0 : index
    %c0_17 = arith.constant 0 : index
    %36 = vector.load %arg6[%c0_16, %c0_17] : memref<128x128xbf16, #tpu.memory_space<vmem>>, vector<128x128xbf16>
    %cst_18 = arith.constant dense<0.000000e+00> : vector<256x128xf32>
    %37 = tpu.matmul %35, %36, %cst_18 {dimension_numbers = #tpu.dot_dimension_numbers<[1], [0], [0], [1], [0, 0, 1, 1], [], []>} : vector<256x128xbf16>, vector<128x128xbf16>, vector<256x128xf32> -> vector<256x128xf32>
    %c0_19 = arith.constant 0 : index
    %c0_20 = arith.constant 0 : index
    %38 = vector.load %arg7[%c0_19, %c0_20] : memref<1x128xf32, #tpu.memory_space<vmem>>, vector<1x128xf32>
    %39 = vector.broadcast %38 : vector<1x128xf32> to vector<256x128xf32>
    %40 = arith.addf %37, %39 : vector<256x128xf32>
    %c0_21 = arith.constant 0 : index
    %c0_22 = arith.constant 0 : index
    %41 = vector.load %arg8[%c0_21, %c0_22] : memref<1x128xf32, #tpu.memory_space<vmem>>, vector<1x128xf32>
    %c0_23 = arith.constant 0 : index
    %c0_24 = arith.constant 0 : index
    %42 = vector.load %arg9[%c0_23, %c0_24] : memref<1x128xf32, #tpu.memory_space<vmem>>, vector<1x128xf32>
    %cst_25 = arith.constant dense<0.000000e+00> : vector<256xf32>
    %43 = vector.multi_reduction <add>, %40, %cst_25 [1] : vector<256x128xf32> to vector<256xf32>
    %44 = vector.shape_cast %43 : vector<256xf32> to vector<256x1xf32>
    %45 = arith.mulf %40, %40 : vector<256x128xf32>
    %cst_26 = arith.constant dense<0.000000e+00> : vector<256xf32>
    %46 = vector.multi_reduction <add>, %45, %cst_26 [1] : vector<256x128xf32> to vector<256xf32>
    %47 = vector.shape_cast %46 : vector<256xf32> to vector<256x1xf32>
    %cst_27 = arith.constant 7.812500e-03 : f32
    %48 = vector.broadcast %cst_27 : f32 to vector<256x1xf32>
    %49 = arith.mulf %44, %48 : vector<256x1xf32>
    %cst_28 = arith.constant 7.812500e-03 : f32
    %50 = vector.broadcast %cst_28 : f32 to vector<256x1xf32>
    %51 = arith.mulf %47, %50 : vector<256x1xf32>
    %52 = arith.mulf %49, %49 : vector<256x1xf32>
    %53 = arith.subf %51, %52 : vector<256x1xf32>
    %cst_29 = arith.constant 0.000000e+00 : f32
    %54 = vector.broadcast %cst_29 : f32 to vector<256x1xf32>
    %55 = arith.maximumf %53, %54 : vector<256x1xf32>
    %56 = vector.broadcast %49 : vector<256x1xf32> to vector<256x128xf32>
    %57 = arith.subf %40, %56 : vector<256x128xf32>
    %cst_30 = arith.constant 9.99999974E-6 : f32
    %58 = vector.broadcast %cst_30 : f32 to vector<256x1xf32>
    %59 = arith.addf %55, %58 : vector<256x1xf32>
    %60 = math.rsqrt %59 : vector<256x1xf32>
    %61 = vector.broadcast %60 : vector<256x1xf32> to vector<256x128xf32>
    %62 = arith.mulf %57, %61 : vector<256x128xf32>
    %63 = vector.broadcast %41 : vector<1x128xf32> to vector<256x128xf32>
    %64 = arith.mulf %62, %63 : vector<256x128xf32>
    %65 = vector.broadcast %42 : vector<1x128xf32> to vector<256x128xf32>
    %66 = arith.addf %64, %65 : vector<256x128xf32>
    %cst_31 = arith.constant 0.000000e+00 : f32
    %67 = vector.broadcast %cst_31 : f32 to vector<256x128xf32>
    %68 = arith.maximumf %66, %67 : vector<256x128xf32>
    %c0_32 = arith.constant 0 : index
    %c0_33 = arith.constant 0 : index
    %69 = vector.load %arg10[%c0_32, %c0_33] : memref<8x128xbf16, #tpu.memory_space<vmem>>, vector<8x128xbf16>
    %70 = arith.truncf %68 : vector<256x128xf32> to vector<256x128xbf16>
    %cst_34 = arith.constant dense<0.000000e+00> : vector<8x256xf32>
    %71 = tpu.matmul %69, %70, %cst_34 {dimension_numbers = #tpu.dot_dimension_numbers<[1], [1], [0], [0], [0, 0, 1, 0], [], []>} : vector<8x128xbf16>, vector<256x128xbf16>, vector<8x256xf32> -> vector<8x256xf32>
    %c0_35 = arith.constant 0 : index
    %c0_36 = arith.constant 0 : index
    %72 = vector.load %arg11[%c0_35, %c0_36] : memref<8x1xf32, #tpu.memory_space<vmem>>, vector<8x1xf32>
    %73 = vector.broadcast %72 : vector<8x1xf32> to vector<8x256xf32>
    %74 = arith.addf %71, %73 : vector<8x256xf32>
    %75 = math.tanh %74 : vector<8x256xf32>
    %c0_37 = arith.constant 0 : index
    %c0_38 = arith.constant 0 : index
    %76 = vector.load %arg12[%c0_37, %c0_38] : memref<8x256xf32, #tpu.memory_space<vmem>>, vector<8x256xf32>
    tpu.vector_store %arg12[%c0_37, %c0_38], %75 {strides = array<i32>} : memref<8x256xf32, #tpu.memory_space<vmem>>, vector<8x256xf32>,
    return
  }
  func.func @transform_0(%arg0: i32) -> (i32, i32) {
    %c0_i32 = arith.constant 0 : i32
    %c0_i32_0 = arith.constant 0 : i32
    return %arg0, %c0_i32 : i32, i32
  }
  func.func @transform_1(%arg0: i32) -> (i32, i32) {
    %c0_i32 = arith.constant 0 : i32
    %c0_i32_0 = arith.constant 0 : i32
    %c0_i32_1 = arith.constant 0 : i32
    return %c0_i32, %c0_i32_0 : i32, i32
  }
  func.func @transform_2(%arg0: i32) -> (i32, i32) {
    %c0_i32 = arith.constant 0 : i32
    %c0_i32_0 = arith.constant 0 : i32
    %c0_i32_1 = arith.constant 0 : i32
    return %c0_i32, %c0_i32_0 : i32, i32
  }
  func.func @transform_3(%arg0: i32) -> (i32, i32) {
    %c0_i32 = arith.constant 0 : i32
    %c0_i32_0 = arith.constant 0 : i32
    %c0_i32_1 = arith.constant 0 : i32
    return %c0_i32, %c0_i32_0 : i32, i32
  }
  func.func @transform_4(%arg0: i32) -> (i32, i32) {
    %c0_i32 = arith.constant 0 : i32
    %c0_i32_0 = arith.constant 0 : i32
    %c0_i32_1 = arith.constant 0 : i32
    return %c0_i32, %c0_i32_0 : i32, i32
  }
  func.func @transform_5(%arg0: i32) -> (i32, i32) {
    %c0_i32 = arith.constant 0 : i32
    %c0_i32_0 = arith.constant 0 : i32
    %c0_i32_1 = arith.constant 0 : i32
    return %c0_i32, %c0_i32_0 : i32, i32
  }
  func.func @transform_6(%arg0: i32) -> (i32, i32) {
    %c0_i32 = arith.constant 0 : i32
    %c0_i32_0 = arith.constant 0 : i32
    %c0_i32_1 = arith.constant 0 : i32
    return %c0_i32, %c0_i32_0 : i32, i32
  }
  func.func @transform_7(%arg0: i32) -> (i32, i32) {
    %c0_i32 = arith.constant 0 : i32
    %c0_i32_0 = arith.constant 0 : i32
    %c0_i32_1 = arith.constant 0 : i32
    return %c0_i32, %c0_i32_0 : i32, i32
  }
  func.func @transform_8(%arg0: i32) -> (i32, i32) {
    %c0_i32 = arith.constant 0 : i32
    %c0_i32_0 = arith.constant 0 : i32
    %c0_i32_1 = arith.constant 0 : i32
    return %c0_i32, %c0_i32_0 : i32, i32
  }
  func.func @transform_9(%arg0: i32) -> (i32, i32) {
    %c0_i32 = arith.constant 0 : i32
    %c0_i32_0 = arith.constant 0 : i32
    %c0_i32_1 = arith.constant 0 : i32
    return %c0_i32, %c0_i32_0 : i32, i32
  }
  func.func @transform_10(%arg0: i32) -> (i32, i32) {
    %c0_i32 = arith.constant 0 : i32
    %c0_i32_0 = arith.constant 0 : i32
    %c0_i32_1 = arith.constant 0 : i32
    return %c0_i32, %c0_i32_0 : i32, i32
  }
  func.func @transform_11(%arg0: i32) -> (i32, i32) {
    %c0_i32 = arith.constant 0 : i32
    %c0_i32_0 = arith.constant 0 : i32
    return %c0_i32, %arg0 : i32, i32
  }
}

</mosaic_0001>

<bundles_post_ra>
// kernel: actor_forward.1
= control target key start
LH: loop header
LB: loop body
LE: loop exit
PB: predicated region body
PF: predicated region fallthrough
CT: control target
= control target key end

     0   :  { %s2847_s17 = smov 0   ;;  %s4957_s0 = inlined_call_operand.vmem [shape: f32[512,8], index: 0, kind: input, shape index: {}]   ;;  %s4958_s1 = inlined_call_operand.vmem [shape: bf16[8,128], index: 1, kind: input, shape index: {}]   ;;  %s4959_s2 = inlined_call_operand.vmem [shape: f32[1,128], index: 2, kind: input, shape index: {}]   ;;  %s4960_s3 = inlined_call_operand.vmem [shape: f32[1,128], index: 3, kind: input, shape index: {}]   ;;  %s4961_s4 = inlined_call_operand.vmem [shape: f32[1,128], index: 4, kind: input, shape index: {}]   ;;  %s4962_s5 = inlined_call_operand.vmem [shape: bf16[128,128], index: 5, kind: input, shape index: {}]   ;;  %s4963_s6 = inlined_call_operand.vmem [shape: f32[1,128], index: 6, kind: input, shape index: {}]   ;;  %s4964_s7 = inlined_call_operand.vmem [shape: f32[1,128], index: 7, kind: input, shape index: {}]   ;;  %s4965_s8 = inlined_call_operand.vmem [shape: f32[1,128], index: 8, kind: input, shape index: {}]   ;;  %s4966_s9 = inlined_call_operand.vmem [shape: bf16[8,128], index: 9, kind: input, shape index: {}]   ;;  %s4967_s10 = inlined_call_operand.vmem [shape: f32[8,1], index: 10, kind: input, shape index: {}]   ;;  %s4968_s11 = inlined_call_operand.vmem [shape: f32[8,512], index: 11, kind: output, shape index: {}]  }
   0x1 LB: > { %s2548_s18 = sadd.s32 4294967295, %s2784_s17   ;;  %p2552_p0 = scmp.ge.s32.totalorder %s2784_s17, 1  ;;  %s2784_s17 = sphi %s2847_s17, %s21_s17  }
   0x2   : > { %p338_p1 = scmp.lt.s32.totalorder %s2784_s17, 3 }
   0x4   : > { %p339_p2 = pnand %p2552_p0, %p338_p1 }
   0x6   : > { %342 = sbr.rel (%p339_p2) target bundleno = 1117 (0x45d), region = 64 }
   0xb   : > { %v439_v0 = vld [vmem:[%s4958_s1] sm:$0xf]  ;;  %vm493_vm0 = vcmask 1043456   ;;  %s2553_s21 = sshll.u32 %s2548_s18, 5  ;;  %vm444_vm1 = vcmask 64512   ;;  %s2555_s15 = sshll.u32 %s2548_s18, 1 }
   0xc   : > { %v495_v1 = vsel %vm493_vm0, %v439_v0, 0  ;;  %p379_p3 = scmp.lt.s32.totalorder %s2553_s21, 63  ;;  %v2900_v34 = vld [vmem:[%s4959_s2] ss:$0 sm:$0xff]  ;;  %p385_p4 = scmp.lt.s32.totalorder %s2555_s15, 3 }
   0xd   : > { %504 = vmatpush.bf16.msra.mxu0 %v495_v1  ;;  %2615 = vmatpush.bf16.msra.mxu3 %v495_v1 }
   0xe   : > { %s5080_s21 = smov (!%p379_p3, %s2553_s21), 63  ;;  %s5082_s15 = smov (!%p385_p4, %s2555_s15), 3 }
   0xf   : > { %s2554_s22 = sshll.u32 %s5080_s21, 3  ;;  %s2556_s16 = sshll.u32 %s5082_s15, 3 }
  0x10   : > { %s2863_s25 = scalar_lea.vmem %s4957_s0, %s2554_s22  ;;  %s388_s21 = scalar_lea.vmem %s4968_s11, %s2556_s16 }
  0x11   : > { %v391_v2 = vld [vmem:[%s2863_s25] sm:$0xff]  ;;  %v392_v3 = vld [vmem:[%s2863_s25 + $0x8] sm:$0xff]  ;;  %v393_v8 = vld [vmem:[%s2863_s25 + $0x10] sm:$0xff] }
  0x12   : > { %v411_v4 = vld [vmem:[%s2863_s25 + $0xa0] sm:$0xff]  ;;  %v423_v5 = vpack.c.bf16 %v392_v3, %v391_v2  ;;  %v412_v6 = vld [vmem:[%s2863_s25 + $0xa8] sm:$0xff]  ;;  %v394_v9 = vld [vmem:[%s2863_s25 + $0x18] sm:$0xff] }
  0x13   : > { %v433_v7 = vpack.c.bf16 %v412_v6, %v411_v4  ;;  %v413_v10 = vld [vmem:[%s2863_s25 + $0xb0] sm:$0xff]  ;;  %v414_v11 = vld [vmem:[%s2863_s25 + $0xb8] sm:$0xff]  ;;  %v424_v12 = vpack.c.bf16 %v394_v9, %v393_v8  ;;  %v395_v14 = vld [vmem:[%s2863_s25 + $0x20] sm:$0xff] }
  0x14   : > { %2557 = vmatmul.msk.bf16.vlgmr.msra.gmra.mxu0 %vm444_vm1, %v423_v5  ;;  %v434_v13 = vpack.c.bf16 %v414_v11, %v413_v10  ;;  %v396_v15 = vld [vmem:[%s2863_s25 + $0x28] sm:$0xff]  ;;  %v397_v17 = vld [vmem:[%s2863_s25 + $0x30] sm:$0xff]  ;;  %v398_v18 = vld [vmem:[%s2863_s25 + $0x38] sm:$0xff] }
  0x15   : > { %2567 = vmatmul.msk.bf16.vlgmr.msra.gmra.mxu3 %vm444_vm1, %v433_v7  ;;  %v425_v16 = vpack.c.bf16 %v396_v15, %v395_v14  ;;  %v426_v19 = vpack.c.bf16 %v398_v18, %v397_v17  ;;  %v399_v20 = vld [vmem:[%s2863_s25 + $0x40] sm:$0xff]  ;;  %v400_v21 = vld [vmem:[%s2863_s25 + $0x48] sm:$0xff]  ;;  %v401_v23 = vld [vmem:[%s2863_s25 + $0x50] sm:$0xff] }
  0x16   : > { %v427_v22 = vpack.c.bf16 %v400_v21, %v399_v20  ;;  %v402_v24 = vld [vmem:[%s2863_s25 + $0x58] sm:$0xff]  ;;  %v403_v26 = vld [vmem:[%s2863_s25 + $0x60] sm:$0xff]  ;;  %v404_v27 = vld [vmem:[%s2863_s25 + $0x68] sm:$0xff] }
  0x17   : > { %v428_v25 = vpack.c.bf16 %v402_v24, %v401_v23  ;;  %v429_v28 = vpack.c.bf16 %v404_v27, %v403_v26  ;;  %v405_v29 = vld [vmem:[%s2863_s25 + $0x70] sm:$0xff]  ;;  %v406_v30 = vld [vmem:[%s2863_s25 + $0x78] sm:$0xff]  ;;  %v407_v32 = vld [vmem:[%s2863_s25 + $0x80] sm:$0xff] }
  0x18   : > { %v430_v31 = vpack.c.bf16 %v406_v30, %v405_v29  ;;  %v408_v33 = vld [vmem:[%s2863_s25 + $0x88] sm:$0xff]  ;;  %v415_v35 = vld [vmem:[%s2863_s25 + $0xc0] sm:$0xff]  ;;  %v409_v48 = vld [vmem:[%s2863_s25 + $0x90] sm:$0xff] }
  0x19   : > { %v416_v36 = vld [vmem:[%s2863_s25 + $0xc8] sm:$0xff]  ;;  %v431_v38 = vpack.c.bf16 %v408_v33, %v407_v32  ;;  %v410_v49 = vld [vmem:[%s2863_s25 + $0x98] sm:$0xff]  ;;  %v417_v55 = vld [vmem:[%s2863_s25 + $0xd0] sm:$0xff] }
  0x1a   : > { %v435_v37 = vpack.c.bf16 %v416_v36, %v415_v35  ;;  %v432_v51 = vpack.c.bf16 %v410_v49, %v409_v48  ;;  %v418_v56 = vld [vmem:[%s2863_s25 + $0xd8] sm:$0xff]  ;;  %v419_v6 = vld [vmem:[%s2863_s25 + $0xe0] sm:$0xff]  ;;  %v420_v7 = vld [vmem:[%s2863_s25 + $0xe8] sm:$0xff] }
  0x1b   : > { %v436_v57 = vpack.c.bf16 %v418_v56, %v417_v55  ;;  %v437_v8 = vpack.c.bf16 %v420_v7, %v419_v6  ;;  %v2614_v21 = vld [vmem:[%s4962_s5 + $0x38] sm:$0xff]  ;;  %v2613_v23 = vld [vmem:[%s4962_s5 + $0x30] sm:$0xff] }
  0x1c   : > { %1510 = vmatpush.bf16.msra.mxu1 %v2614_v21  ;;  %2616 = vmatpush.bf16.msra.mxu2 %v2614_v21  ;;  %v2610_v36 = vld [vmem:[%s4962_s5 + $0x18] sm:$0xff] }
  0x20   : > { %1511 = vmatpush.bf16.msra.mxu1 %v2613_v23  ;;  %2617 = vmatpush.bf16.msra.mxu2 %v2613_v23 }
  0x24   : > { %2558 = vmatmul.msk.bf16.gmra.mxu0 %vm444_vm1, %v424_v12  ;;  %v421_v12 = vld [vmem:[%s2863_s25 + $0xf0] sm:$0xff] }
  0x25   : > { %2568 = vmatmul.msk.bf16.gmra.mxu3 %vm444_vm1, %v434_v13  ;;  %v422_v13 = vld [vmem:[%s2863_s25 + $0xf8] sm:$0xff] }
  0x26   : > { %v438_v14 = vpack.c.bf16 %v422_v13, %v421_v12 }
  0x34   : > { %2559 = vmatmul.msk.bf16.gmra.mxu0 %vm444_vm1, %v425_v16 }
  0x35   : > { %2569 = vmatmul.msk.bf16.gmra.mxu3 %vm444_vm1, %v435_v37 }
  0x44   : > { %2560 = vmatmul.msk.bf16.gmra.mxu0 %vm444_vm1, %v426_v19 }
  0x45   : > { %2570 = vmatmul.msk.bf16.gmra.mxu3 %vm444_vm1, %v436_v57 }
  0x54   : > { %2561 = vmatmul.msk.bf16.gmra.mxu0 %vm444_vm1, %v427_v22 }
  0x55   : > { %2571 = vmatmul.msk.bf16.gmra.mxu3 %vm444_vm1, %v437_v8 }
  0x64   : > { %2562 = vmatmul.msk.bf16.gmra.mxu0 %vm444_vm1, %v428_v25  ;;  %v2612_v25 = vld [vmem:[%s4962_s5 + $0x28] sm:$0xff] }
  0x65   : > { %2572 = vmatmul.msk.bf16.gmra.mxu3 %vm444_vm1, %v438_v14  ;;  %1512 = vmatpush.bf16.msra.mxu1 %v2612_v25 }
  0x66   : > { %2618 = vmatpush.bf16.msra.mxu2 %v2612_v25 }
  0x74   : > { %2563 = vmatmul.msk.bf16.gmra.mxu0 %vm444_vm1, %v429_v28 }
  0x84   : > { %2564 = vmatmul.msk.bf16.gmra.mxu0 %vm444_vm1, %v430_v31  ;;  %v2611_v31 = vld [vmem:[%s4962_s5 + $0x20] sm:$0xff] }
  0x85   : > { %1513 = vmatpush.bf16.msra.mxu1 %v2611_v31  ;;  %2619 = vmatpush.bf16.msra.mxu2 %v2611_v31 }
  0x89   : > { %1514 = vmatpush.bf16.msra.mxu1 %v2610_v36  ;;  %2620 = vmatpush.bf16.msra.mxu2 %v2610_v36 }
  0x91   : > { %v506_v39 = vpop.f32.mrf.mxu0 }
  0x92   : > { %v2906_v40 = vadd.f32 %v2900_v34, %v506_v39 }
  0x94   : > { %2565 = vmatmul.msk.bf16.gmra.mxu0 %vm444_vm1, %v431_v38  ;;  %588 = vadd.xlane.f32.xlu0 %v2906_v40  ;;  %v652_v41 = vmul.f32 %v2906_v40, %v2906_v40 }
  0x96   : > { %684 = vadd.xlane.f32.xlu1 %v652_v41 }
  0x98   : > { %v556_v42 = vpop.f32.mrf.mxu3 }
  0x99   : > { %v2913_v43 = vadd.f32 %v2900_v34, %v556_v42  ;;  %v508_v44 = vpop.f32.mrf.mxu0 }
  0x9a   : > { %v2916_v45 = vadd.f32 %v2900_v34, %v508_v44 }
  0x9b   : > { %v672_v46 = vmul.f32 %v2913_v43, %v2913_v43 }
  0x9c   : > { %628 = vadd.xlane.f32.xlu0 %v2913_v43  ;;  %v653_v47 = vmul.f32 %v2916_v45, %v2916_v45 }
  0x9d   : > { %724 = vadd.xlane.f32.xlu2 %v672_v46 }
  0x9e   : > { %686 = vadd.xlane.f32.xlu1 %v653_v47  ;;  %v2609_v47 = vld [vmem:[%s4962_s5 + $0x10] sm:$0xff] }
  0x9f   : > { %1515 = vmatpush.bf16.msra.mxu1 %v2609_v47  ;;  %2621 = vmatpush.bf16.msra.mxu2 %v2609_v47 }
  0xa0   : > { %v558_v50 = vpop.f32.mrf.mxu3 }
  0xa1   : > { %v511_v52 = vpop.f32.mrf.mxu0  ;;  %v2929_v54 = vadd.f32 %v2900_v34, %v558_v50 }
  0xa2   : > { %v2926_v53 = vadd.f32 %v2900_v34, %v511_v52 }
  0xa3   : > { %v673_v59 = vmul.f32 %v2929_v54, %v2929_v54 }
  0xa4   : > { %2566 = vmatmul.msk.bf16.gmra.mxu0 %vm444_vm1, %v432_v51  ;;  %590 = vadd.xlane.f32.xlu0 %v2916_v45  ;;  %v654_v62 = vmul.f32 %v2926_v53, %v2926_v53  ;;  %v2608_v51 = vld [vmem:[%s4962_s5 + $0x8] sm:$0xff] }
  0xa5   : > { %592 = vadd.xlane.f32.xlu2 %v2926_v53  ;;  %1516 = vmatpush.bf16.msra.mxu1 %v2608_v51 }
  0xa6   : > { %630 = vadd.xlane.f32.xlu1 %v2929_v54  ;;  %2622 = vmatpush.bf16.msra.mxu2 %v2608_v51 }
  0xa8   : > { %v561_v58 = vpop.f32.mrf.mxu3 }
  0xa9   : > { %v513_v60 = vpop.f32.mrf.mxu0  ;;  %v2941_v61 = vadd.f32 %v2900_v34, %v561_v58 }
  0xaa   : > { %v2947_v63 = vadd.f32 %v2900_v34, %v513_v60 }
  0xac   : > { %726 = vadd.xlane.f32.xlu0 %v673_v59  ;;  %v655_v1 = vmul.f32 %v2947_v63, %v2947_v63 }
  0xad   : > { %632 = vadd.xlane.f32.xlu2 %v2941_v61 }
  0xae   : > { %688 = vadd.xlane.f32.xlu1 %v654_v62 }
  0xb1   : > { %v516_v0 = vpop.f32.mrf.mxu0 }
  0xb2   : > { %v2952_v2 = vadd.f32 %v2900_v34, %v516_v0 }
  0xb4   : > { %594 = vadd.xlane.f32.xlu0 %v2947_v63  ;;  %v656_v5 = vmul.f32 %v2952_v2, %v2952_v2 }
  0xb5   : > { %690 = vadd.xlane.f32.xlu2 %v655_v1 }
  0xb6   : > { %596 = vadd.xlane.f32.xlu1 %v2952_v2 }
  0xb9   : > { %v518_v3 = vpop.f32.mrf.mxu0 }
  0xba   : > { %v2957_v4 = vadd.f32 %v2900_v34, %v518_v3  ;;  %v2607_v3 = vld [vmem:[%s4962_s5] sm:$0xff] }
  0xbb   : > { %1517 = vmatpush.bf16.msra.mxu1 %v2607_v3  ;;  %2623 = vmatpush.bf16.msra.mxu2 %v2607_v3 }
  0xbc   : > { %692 = vadd.xlane.f32.xlu0 %v656_v5  ;;  %v657_v9 = vmul.f32 %v2957_v4, %v2957_v4 }
  0xbd   : > { %598 = vadd.xlane.f32.xlu2 %v2957_v4 }
  0xbe   : > { %694 = vadd.xlane.f32.xlu1 %v657_v9 }
  0xc1   : > { %v2967_v10 = vpop.f32.mrf.mxu0 }
  0xc9   : > { %v2969_v11 = vpop.f32.mrf.mxu0 }
  0xd1   : > { %v2974_v15 = vpop.f32.mrf.mxu0 }
  0xd9   : > { %v2976_v16 = vpop.f32.mrf.mxu0 }
  0xe1   : > { %v2978_v17 = vpop.f32.mrf.mxu0 }
  0xe9   : > { %v2980_v18 = vpop.f32.mrf.mxu0 }
  0xf1   : > { %v2982_v19 = vpop.f32.mrf.mxu0 }
  0xf9   : > { %v2984_v20 = vpop.f32.mrf.mxu0 }
 0x101   : > { %v2989_v22 = vpop.f32.mrf.mxu0 }
 0x107   : > { %v589_v24 = vpop.xlane.xlu0 %588 }
 0x108   : > { %v2997_v26 = vmul.f32 0.0078125, %v589_v24 }
 0x109   : > { %v2999_v27 = vpop.f32.mrf.mxu0  ;;  %v685_v28 = vpop.xlane.xlu1 %684 }
 0x10a   : > { %v812_v29 = vmul.f32 %v2997_v26, %v2997_v26  ;;  %v780_v30 = vmul.f32 0.0078125, %v685_v28 }
 0x10c   : > { %v844_v32 = vsub.f32 %v780_v30, %v812_v29 }
 0x10e   : > { %v876_v33 = vmax.f32 %v844_v32, 0.0 }
 0x10f   : > { %v629_v35 = vpop.xlane.xlu0 %628 }
 0x110   : > { %v3009_v37 = vadd.f32 1e-05, %v876_v33  ;;  %v725_v38 = vpop.xlane.xlu2 %724  ;;  %v3011_v39 = vmul.f32 0.0078125, %v629_v35 }
 0x111   : > { %v800_v41 = vmul.f32 0.0078125, %v725_v38  ;;  %v3013_v42 = vpop.f32.mrf.mxu0  ;;  %v687_v44 = vpop.xlane.xlu1 %686 }
 0x112   : > { %2641 = vrsqrt.f32 %v3009_v37  ;;  %v832_v46 = vmul.f32 %v3011_v39, %v3011_v39  ;;  %v781_v62 = vmul.f32 0.0078125, %v687_v44  ;;  %v563_v44 = vpop.f32.mrf.mxu3  ;;  %vm978_vm5 = vweird.f32 %v3009_v37 }
 0x113   : > { %v928_v3 = vsub.f32 %v2913_v43, %v3011_v39  ;;  %v908_v43 = vsub.f32 %v2906_v40, %v2997_v26  ;;  %v3106_v40 = vld [vmem:[%s4960_s3] ss:$0 sm:$0xff] }
 0x114   : > { %v864_v48 = vsub.f32 %v800_v41, %v832_v46 }
 0x116   : > { %v896_v49 = vmax.f32 %v864_v48, 0.0 }
 0x117   : > { %v591_v50 = vpop.xlane.xlu0 %590 }
 0x118   : > { %v3024_v52 = vpop.eup %2641  ;;  %v960_v55 = vadd.f32 1e-05, %v896_v49  ;;  %v593_v56 = vpop.xlane.xlu2 %592  ;;  %v3026_v57 = vmul.f32 0.0078125, %v591_v50 }
 0x119   : > { %v973_v58 = vmul.f32 %v3024_v52, %v3009_v37  ;;  %v3030_v59 = vpop.f32.mrf.mxu0  ;;  %v631_v60 = vpop.xlane.xlu1 %630  ;;  %v3042_v12 = vmul.f32 0.0078125, %v593_v56  ;;  %vm979_vm4 = vweird.f32 %v3024_v52 }
 0x11a   : > { %2643 = vrsqrt.f32 %v960_v55  ;;  %v813_v0 = vmul.f32 %v3026_v57, %v3026_v57  ;;  %v3038_v6 = vmul.f32 0.0078125, %v631_v60  ;;  %vm1178_vm2 = vweird.f32 %v960_v55  ;;  %vm3074_vm7 = vmor %vm978_vm5, %vm979_vm4 }
 0x11b   : > { %v974_v1 = vmul.f32 %v3024_v52, %v973_v58  ;;  %v814_v35 = vmul.f32 %v3042_v12, %v3042_v12  ;;  %v3065_v60 = vadd.f32 %v2900_v34, %v563_v44 }
 0x11c   : > { %v845_v5 = vsub.f32 %v781_v62, %v813_v0  ;;  %v833_v9 = vmul.f32 %v3038_v6, %v3038_v6 }
 0x11d   : > { %v975_v7 = vmul.f32 0.5, %v974_v1 }
 0x11e   : > { %v877_v8 = vmax.f32 %v845_v5, 0.0 }
 0x11f   : > { %v727_v13 = vpop.xlane.xlu0 %726  ;;  %v976_v30 = vsub.f32 1.5, %v975_v7 }
 0x120   : > { %v2644_v14 = vpop.eup %2643  ;;  %v3044_v21 = vadd.f32 1e-05, %v877_v8  ;;  %v3046_v23 = vpop.xlane.xlu2 %632  ;;  %v801_v24 = vmul.f32 0.0078125, %v727_v13 }
 0x121   : > { %v1173_v25 = vmul.f32 %v2644_v14, %v960_v55  ;;  %v551_v28 = vpop.f32.mrf.mxu0  ;;  %v689_v29 = vpop.xlane.xlu1 %688  ;;  %vm1179_vm3 = vweird.f32 %v2644_v14  ;;  %v977_v48 = vmul.f32 %v3024_v52, %v976_v30 }
 0x122   : > { %2645 = vrsqrt.f32 %v3044_v21  ;;  %v865_v31 = vsub.f32 %v801_v24, %v833_v9  ;;  %v3050_v32 = vadd.f32 %v2900_v34, %v551_v28  ;;  %v782_v36 = vmul.f32 0.0078125, %v689_v29  ;;  %vm3067_vm6 = vmor %vm1178_vm2, %vm1179_vm3 }
 0x123   : > { %v1174_v33 = vmul.f32 %v2644_v14, %v1173_v25  ;;  %v981_v28 = vsel %vm3074_vm7, %v3024_v52, %v977_v48  ;;  %v909_v48 = vsub.f32 %v2916_v45, %v3026_v57  ;;  %vm988_vm9 = vweird.f32 %v3044_v21 }
 0x124   : > { %v897_v38 = vmax.f32 %v865_v31, 0.0  ;;  %624 = vadd.xlane.f32.xlu2 %v3050_v32  ;;  %v670_v41 = vmul.f32 %v3050_v32, %v3050_v32  ;;  %v846_v47 = vsub.f32 %v782_v36, %v814_v35  ;;  %v1292_v52 = vmul.f32 %v981_v28, %v908_v43 }
 0x125   : > { %v1175_v46 = vmul.f32 0.5, %v1174_v33 }
 0x126   : > { %v3059_v49 = vadd.f32 1e-05, %v897_v38  ;;  %720 = vadd.xlane.f32.xlu0 %v670_v41  ;;  %v878_v51 = vmax.f32 %v846_v47, 0.0  ;;  %v675_v41 = vmul.f32 %v3065_v60, %v3065_v60 }
 0x127   : > { %v1176_v50 = vsub.f32 1.5, %v1175_v46  ;;  %v595_v56 = vpop.xlane.xlu0 %594 }
 0x128   : > { %v3061_v58 = vpop.eup %2645  ;;  %2647 = vrsqrt.f32 %v3059_v49  ;;  %v691_v62 = vpop.xlane.xlu2 %690  ;;  %v3072_v0 = vmul.f32 0.0078125, %v595_v56  ;;  %v3082_v7 = vadd.f32 1e-05, %v878_v51  ;;  %vm1188_vm11 = vweird.f32 %v3059_v49 }
 0x129   : > { %v1177_v37 = vmul.f32 %v2644_v14, %v1176_v50  ;;  %v983_v5 = vmul.f32 %v3061_v58, %v3044_v21  ;;  %v553_v8 = vpop.f32.mrf.mxu0  ;;  %v597_v9 = vpop.xlane.xlu1 %596  ;;  %v783_v13 = vmul.f32 0.0078125, %v691_v62  ;;  %vm989_vm8 = vweird.f32 %v3061_v58 }
 0x12a   : > { %v815_v24 = vmul.f32 %v3072_v0, %v3072_v0  ;;  %v3087_v25 = vadd.f32 %v2900_v34, %v553_v8  ;;  %2649 = vrsqrt.f32 %v3082_v7  ;;  %v3114_v38 = vmul.f32 0.0078125, %v597_v9  ;;  %vm990_vm10 = vmor %vm988_vm9, %vm989_vm8 }
 0x12b   : > { %v1181_v39 = vsel %vm3067_vm6, %v2644_v14, %v1177_v37  ;;  %v984_v29 = vmul.f32 %v3061_v58, %v983_v5  ;;  %v3112_v14 = vadd.f32 %v2900_v34, %v2967_v10  ;;  %v674_v10 = vmul.f32 %v2941_v61, %v2941_v61 }
 0x12c   : > { %v3098_v30 = vmul.f32 %v1181_v39, %v928_v3  ;;  %v847_v31 = vsub.f32 %v783_v13, %v815_v24  ;;  %626 = vadd.xlane.f32.xlu2 %v3087_v25  ;;  %v671_v33 = vmul.f32 %v3087_v25, %v3087_v25  ;;  %v1327_v5 = vmul.f32 %v3106_v40, %v1292_v52  ;;  %v3151_v13 = vld [vmem:[%s4961_s4] ss:$0 sm:$0xff] }
 0x12d   : > { %v985_v35 = vmul.f32 0.5, %v984_v29  ;;  %v816_v57 = vmul.f32 %v3114_v38, %v3114_v38  ;;  %v566_v29 = vpop.f32.mrf.mxu3  ;;  %vm998_vm15 = vweird.f32 %v3082_v7 }
 0x12e   : > { %v3108_v26 = vpop.eup %2647  ;;  %v879_v36 = vmax.f32 %v847_v31, 0.0  ;;  %634 = vadd.xlane.f32.xlu0 %v3065_v60  ;;  %722 = vadd.xlane.f32.xlu1 %v671_v33  ;;  %v3206_v33 = vadd.f32 %v2900_v34, %v566_v29 }
 0x12f   : > { %v986_v44 = vsub.f32 1.5, %v985_v35  ;;  %v1183_v46 = vmul.f32 %v3108_v26, %v3059_v49  ;;  %v693_v47 = vpop.xlane.xlu0 %692  ;;  %vm1189_vm12 = vweird.f32 %v3108_v26  ;;  %v1362_v49 = vadd.f32 %v3151_v13, %v1327_v5 }
 0x130   : > { %v3127_v50 = vadd.f32 1e-05, %v879_v36  ;;  %v599_v51 = vpop.xlane.xlu2 %598  ;;  %v784_v56 = vmul.f32 0.0078125, %v693_v47  ;;  %v3129_v55 = vpop.eup %2649  ;;  %vm3158_vm13 = vmor %vm1188_vm11, %vm1189_vm12 }
 0x131   : > { %v987_v62 = vmul.f32 %v3061_v58, %v986_v44  ;;  %v1184_v1 = vmul.f32 %v3108_v26, %v1183_v46  ;;  %v3133_v3 = vmul.f32 0.0078125, %v599_v51  ;;  %v695_v37 = vpop.xlane.xlu1 %694  ;;  %v993_v45 = vmul.f32 %v3129_v55, %v3082_v7 }
 0x132   : > { %2651 = vrsqrt.f32 %v3127_v50  ;;  %v848_v43 = vsub.f32 %v784_v56, %v816_v57  ;;  %v785_v39 = vmul.f32 0.0078125, %v695_v37  ;;  %vm999_vm14 = vweird.f32 %v3129_v55 }
 0x133   : > { %v991_v21 = vsel %vm990_vm10, %v3061_v58, %v987_v62  ;;  %v1185_v8 = vmul.f32 0.5, %v1184_v1  ;;  %v817_v9 = vmul.f32 %v3133_v3, %v3133_v3  ;;  %v994_v28 = vmul.f32 %v3129_v55, %v993_v45  ;;  %vm3189_vm0 = vmor %vm998_vm15, %vm999_vm14 }
 0x134   : > { %v1293_v24 = vmul.f32 %v991_v21, %v909_v48  ;;  %730 = vadd.xlane.f32.xlu2 %v675_v41  ;;  %v658_v58 = vmul.f32 %v3112_v14, %v3112_v14  ;;  %v880_v52 = vmax.f32 %v848_v43, 0.0  ;;  %v3166_v41 = vadd.f32 %v2900_v34, %v2969_v11 }
 0x135   : > { %v1186_v31 = vsub.f32 1.5, %v1185_v8  ;;  %v995_v35 = vmul.f32 0.5, %v994_v28  ;;  %v849_v36 = vsub.f32 %v785_v39, %v817_v9  ;;  %v1347_v45 = vmul.f32 %v3106_v40, %v3098_v30  ;;  %v568_v43 = vpop.f32.mrf.mxu3 }
 0x136   : > { %600 = vadd.xlane.f32.xlu0 %v3112_v14  ;;  %728 = vadd.xlane.f32.xlu1 %v674_v10  ;;  %v1328_v44 = vmul.f32 %v3106_v40, %v1293_v24  ;;  %v3171_v51 = vadd.f32 1e-05, %v880_v52  ;;  %v929_v10 = vsub.f32 %v2929_v54, %v3038_v6  ;;  %v1394_v7 = vmax.f32 %v1362_v49, 0.0 }
 0x137   : > { %v1187_v46 = vmul.f32 %v3108_v26, %v1186_v31  ;;  %v996_v48 = vsub.f32 1.5, %v995_v35  ;;  %v881_v56 = vmax.f32 %v849_v36, 0.0  ;;  %v659_v8 = vmul.f32 %v3166_v41, %v3166_v41 }
 0x138   : > { %v2652_v47 = vpop.eup %2651  ;;  %v1363_v62 = vadd.f32 %v3151_v13, %v1328_v44  ;;  %2653 = vrsqrt.f32 %v3171_v51  ;;  %vm1008_vm2 = vweird.f32 %v3127_v50  ;;  %v3211_v52 = vadd.f32 %v2900_v34, %v568_v43 }
 0x139   : > { %v1003_v11 = vmul.f32 %v2652_v47, %v3127_v50  ;;  %v1191_v1 = vsel %vm3158_vm13, %v3108_v26, %v1187_v46  ;;  %v997_v37 = vmul.f32 %v3129_v55, %v996_v48  ;;  %v3183_v5 = vadd.f32 1e-05, %v881_v56 }
 0x13a   : > { %v1395_v57 = vmax.f32 %v1363_v62, 0.0  ;;  %v1313_v21 = vmul.f32 %v1191_v1, %v929_v10  ;;  %v910_v26 = vsub.f32 %v2926_v53, %v3042_v12  ;;  %v1382_v53 = vadd.f32 %v3151_v13, %v1347_v45 }
 0x13b   : > { %v1004_v6 = vmul.f32 %v2652_v47, %v1003_v11  ;;  %2655 = vrsqrt.f32 %v3183_v5  ;;  %v1001_v30 = vsel %vm3189_vm0, %v3129_v55, %v997_v37  ;;  %vm1009_vm1 = vweird.f32 %v2652_v47 }
 0x13c   : > { %696 = vadd.xlane.f32.xlu2 %v658_v58  ;;  %v1426_v24 = vpack.c.bf16 %v1395_v57, %v1394_v7  ;;  %v1348_v28 = vmul.f32 %v3106_v40, %v1313_v21  ;;  %v1294_v39 = vmul.f32 %v1001_v30, %v910_v26  ;;  %v911_v44 = vsub.f32 %v2947_v63, %v3072_v0  ;;  %vm1010_vm3 = vmor %vm1008_vm2, %vm1009_vm1 }
 0x13d   : > { %v1005_v9 = vmul.f32 0.5, %v1004_v6  ;;  %v1414_v49 = vmax.f32 %v1382_v53, 0.0  ;;  %v676_v50 = vmul.f32 %v3206_v33, %v3206_v33  ;;  %v3228_v57 = vadd.f32 %v2900_v34, %v2974_v15 }
 0x13e   : > { %698 = vadd.xlane.f32.xlu0 %v659_v8  ;;  %602 = vadd.xlane.f32.xlu1 %v3166_v41  ;;  %v1383_v31 = vadd.f32 %v3151_v13, %v1348_v28  ;;  %v2654_v58 = vpop.eup %2653  ;;  %v1329_v46 = vmul.f32 %v3106_v40, %v1294_v39  ;;  %vm1018_vm6 = vweird.f32 %v3171_v51  ;;  %v3233_v8 = vadd.f32 %v2900_v34, %v2976_v16 }
 0x13f   : > { %v1006_v12 = vsub.f32 1.5, %v1005_v9  ;;  %1518 = vmatmul.bf16.vlgmr.msra.gmra.mxu1 %v1426_v24  ;;  %v1013_v35 = vmul.f32 %v2654_v58, %v3171_v51  ;;  %vm1019_vm4 = vweird.f32 %v2654_v58  ;;  %vm1028_vm8 = vweird.f32 %v3183_v5  ;;  %v571_v24 = vpop.f32.mrf.mxu3 }
 0x140   : > { %v1415_v48 = vmax.f32 %v1383_v31, 0.0  ;;  %v1364_v0 = vadd.f32 %v3151_v13, %v1329_v46  ;;  %vm3235_vm7 = vmor %vm1018_vm6, %vm1019_vm4  ;;  %v913_v15 = vsub.f32 %v2957_v4, %v3133_v3  ;;  %v677_v51 = vmul.f32 %v3211_v52, %v3211_v52 }
 0x141   : > { %v1007_v55 = vmul.f32 %v2652_v47, %v1006_v12  ;;  %v2656_v36 = vpop.eup %2655  ;;  %v1014_v29 = vmul.f32 %v2654_v58, %v1013_v35  ;;  %v912_v43 = vsub.f32 %v2952_v2, %v3114_v38  ;;  %v3252_v53 = vadd.f32 %v2900_v34, %v571_v24 }
 0x142   : > { %v1023_v62 = vmul.f32 %v2656_v36, %v3183_v5  ;;  %v3220_v11 = vpack.c.bf16 %v1415_v48, %v1414_v49  ;;  %vm1029_vm5 = vweird.f32 %v2656_v36  ;;  %v1396_v21 = vmax.f32 %v1364_v0, 0.0 }
 0x143   : > { %v1011_v56 = vsel %vm1010_vm3, %v2652_v47, %v1007_v55  ;;  %v1015_v1 = vmul.f32 0.5, %v1014_v29  ;;  %vm1030_vm9 = vmor %vm1028_vm8, %vm1029_vm5  ;;  %v661_v12 = vmul.f32 %v3233_v8, %v3233_v8  ;;  %v660_v2 = vmul.f32 %v3228_v57, %v3228_v57 }
 0x144   : > { %v1295_v10 = vmul.f32 %v1011_v56, %v911_v44  ;;  %638 = vadd.xlane.f32.xlu2 %v3211_v52  ;;  %v1024_v37 = vmul.f32 %v2656_v36, %v1023_v62  ;;  %v678_v44 = vmul.f32 %v3252_v53, %v3252_v53  ;;  %v3272_v29 = vadd.f32 %v2900_v34, %v2978_v17 }
 0x145   : > { %v1016_v47 = vsub.f32 1.5, %v1015_v1  ;;  %v3276_v62 = vadd.f32 %v2900_v34, %v2980_v18  ;;  %v3326_v30 = vadd.f32 %v2900_v34, %v2999_v27 }
 0x146   : > { %732 = vadd.xlane.f32.xlu0 %v676_v50  ;;  %636 = vadd.xlane.f32.xlu1 %v3206_v33  ;;  %v1330_v63 = vmul.f32 %v3106_v40, %v1295_v10  ;;  %v1025_v45 = vmul.f32 0.5, %v1024_v37  ;;  %v662_v10 = vmul.f32 %v3272_v29, %v3272_v29 }
 0x147   : > { %v1017_v6 = vmul.f32 %v2654_v58, %v1016_v47  ;;  %v573_v38 = vpop.f32.mrf.mxu3  ;;  %v663_v17 = vmul.f32 %v3276_v62, %v3276_v62  ;;  %v667_v24 = vmul.f32 %v3326_v30, %v3326_v30 }
 0x148   : > { %v1365_v54 = vadd.f32 %v3151_v13, %v1330_v63  ;;  %v1026_v7 = vsub.f32 1.5, %v1025_v45  ;;  %v3263_v35 = vadd.f32 %v2900_v34, %v573_v38  ;;  %v3296_v63 = vadd.f32 %v2900_v34, %v2982_v19 }
 0x149   : > { %v1021_v16 = vsel %vm3235_vm7, %v2654_v58, %v1017_v6  ;;  %v3303_v45 = vadd.f32 %v2900_v34, %v2984_v20 }
 0x14a   : > { %v1397_v26 = vmax.f32 %v1365_v54, 0.0  ;;  %v1027_v9 = vmul.f32 %v2656_v36, %v1026_v7  ;;  %v1296_v4 = vmul.f32 %v1021_v16, %v912_v43  ;;  %v679_v49 = vmul.f32 %v3263_v35, %v3263_v35 }
 0x14b   : > { %v664_v54 = vmul.f32 %v3296_v63, %v3296_v63  ;;  %v665_v19 = vmul.f32 %v3303_v45, %v3303_v45 }
 0x14c   : > { %604 = vadd.xlane.f32.xlu2 %v3228_v57  ;;  %v1427_v28 = vpack.c.bf16 %v1397_v26, %v1396_v21  ;;  %v1031_v39 = vsel %vm1030_vm9, %v2656_v36, %v1027_v9  ;;  %v1331_v31 = vmul.f32 %v3106_v40, %v1296_v4  ;;  %v3322_v26 = vadd.f32 %v2900_v34, %v2989_v22 }
 0x14d   : > { %v1297_v5 = vmul.f32 %v1031_v39, %v913_v15  ;;  %v3336_v15 = vadd.f32 %v2900_v34, %v3013_v42 }
 0x14e   : > { %606 = vadd.xlane.f32.xlu0 %v3233_v8  ;;  %734 = vadd.xlane.f32.xlu1 %v677_v51  ;;  %v1366_v55 = vadd.f32 %v3151_v13, %v1331_v31  ;;  %v666_v22 = vmul.f32 %v3322_v26, %v3322_v26  ;;  %v3343_v51 = vadd.f32 %v2900_v34, %v3030_v59 }
 0x14f   : > { %1523 = vmatmul.bf16.gmra.mxu1 %v1427_v28  ;;  %v1332_v3 = vmul.f32 %v3106_v40, %v1297_v5  ;;  %v576_v56 = vpop.f32.mrf.mxu3  ;;  %v668_v39 = vmul.f32 %v3336_v15, %v3336_v15 }
 0x150   : > { %v1398_v46 = vmax.f32 %v1366_v55, 0.0  ;;  %v3283_v50 = vadd.f32 %v2900_v34, %v576_v56  ;;  %v669_v4 = vmul.f32 %v3343_v51, %v3343_v51 }
 0x151   : > { %v1367_v58 = vadd.f32 %v3151_v13, %v1332_v3 }
 0x152   : > { %v680_v0 = vmul.f32 %v3283_v50, %v3283_v50 }
 0x153   : > { %v1399_v36 = vmax.f32 %v1367_v58, 0.0 }
 0x154   : > { %702 = vadd.xlane.f32.xlu2 %v661_v12 }
 0x155   : > { %v1428_v48 = vpack.c.bf16 %v1399_v36, %v1398_v46 }
 0x156   : > { %640 = vadd.xlane.f32.xlu0 %v3252_v53  ;;  %700 = vadd.xlane.f32.xlu1 %v660_v2 }
 0x157   : > { %v578_v1 = vpop.f32.mrf.mxu3 }
 0x158   : > { %v3286_v37 = vadd.f32 %v2900_v34, %v578_v1 }
 0x15a   : > { %v681_v18 = vmul.f32 %v3286_v37, %v3286_v37 }
 0x15c   : > { %736 = vadd.xlane.f32.xlu2 %v678_v44 }
 0x15e   : > { %738 = vadd.xlane.f32.xlu0 %v679_v49  ;;  %642 = vadd.xlane.f32.xlu1 %v3263_v35 }
 0x15f   : > { %1528 = vmatmul.bf16.gmra.mxu1 %v1428_v48  ;;  %v581_v47 = vpop.f32.mrf.mxu3  ;;  %v3361_v48 = vmul.f32 0.0078125, %v3046_v23 }
 0x160   : > { %v3311_v7 = vadd.f32 %v2900_v34, %v581_v47 }
 0x161   : > { %v834_v47 = vmul.f32 %v3361_v48, %v3361_v48 }
 0x162   : > { %v682_v20 = vmul.f32 %v3311_v7, %v3311_v7 }
 0x164   : > { %610 = vadd.xlane.f32.xlu2 %v3276_v62 }
 0x166   : > { %704 = vadd.xlane.f32.xlu0 %v662_v10  ;;  %608 = vadd.xlane.f32.xlu1 %v3272_v29 }
 0x167   : > { %v583_v6 = vpop.f32.mrf.mxu3 }
 0x168   : > { %v3314_v21 = vadd.f32 %v2900_v34, %v583_v6 }
 0x16a   : > { %v683_v9 = vmul.f32 %v3314_v21, %v3314_v21 }
 0x16c   : > { %644 = vadd.xlane.f32.xlu2 %v3283_v50 }
 0x16e   : > { %646 = vadd.xlane.f32.xlu0 %v3286_v37  ;;  %706 = vadd.xlane.f32.xlu1 %v663_v17 }
 0x174   : > { %742 = vadd.xlane.f32.xlu2 %v681_v18 }
 0x176   : > { %612 = vadd.xlane.f32.xlu0 %v3296_v63  ;;  %740 = vadd.xlane.f32.xlu1 %v680_v0 }
 0x17c   : > { %708 = vadd.xlane.f32.xlu2 %v664_v54 }
 0x17e   : > { %710 = vadd.xlane.f32.xlu0 %v665_v19  ;;  %614 = vadd.xlane.f32.xlu1 %v3303_v45 }
 0x184   : > { %650 = vadd.xlane.f32.xlu2 %v3314_v21 }
 0x186   : > { %744 = vadd.xlane.f32.xlu0 %v682_v20  ;;  %648 = vadd.xlane.f32.xlu1 %v3311_v7 }
 0x18c   : > { %616 = vadd.xlane.f32.xlu2 %v3322_v26 }
 0x18e   : > { %618 = vadd.xlane.f32.xlu0 %v3326_v30  ;;  %746 = vadd.xlane.f32.xlu1 %v683_v9 }
 0x194   : > { %714 = vadd.xlane.f32.xlu2 %v667_v24 }
 0x196   : > { %620 = vadd.xlane.f32.xlu0 %v3336_v15  ;;  %712 = vadd.xlane.f32.xlu1 %v666_v22 }
 0x197   : > { %v625_v27 = vpop.xlane.xlu2 %624 }
 0x198   : > { %v3345_v28 = vmul.f32 0.0078125, %v625_v27 }
 0x199   : > { %v721_v16 = vpop.xlane.xlu0 %720 }
 0x19a   : > { %v830_v43 = vmul.f32 %v3345_v28, %v3345_v28  ;;  %v798_v42 = vmul.f32 0.0078125, %v721_v16 }
 0x19c   : > { %v862_v5 = vsub.f32 %v798_v42, %v830_v43  ;;  %716 = vadd.xlane.f32.xlu2 %v668_v39 }
 0x19e   : > { %v894_v3 = vmax.f32 %v862_v5, 0.0  ;;  %718 = vadd.xlane.f32.xlu0 %v669_v4  ;;  %622 = vadd.xlane.f32.xlu1 %v3343_v51 }
 0x19f   : > { %v627_v34 = vpop.xlane.xlu2 %626 }
 0x1a0   : > { %v958_v59 = vadd.f32 1e-05, %v894_v3  ;;  %v3354_v12 = vmul.f32 0.0078125, %v627_v34 }
 0x1a1   : > { %v635_v31 = vpop.xlane.xlu0 %634  ;;  %v723_v2 = vpop.xlane.xlu1 %722 }
 0x1a2   : > { %2657 = vrsqrt.f32 %v958_v59  ;;  %v831_v38 = vmul.f32 %v3354_v12, %v3354_v12  ;;  %v799_v58 = vmul.f32 0.0078125, %v723_v2  ;;  %v3358_v55 = vmul.f32 0.0078125, %v635_v31 }
 0x1a3   : > { %vm1158_vm11 = vweird.f32 %v958_v59 }
 0x1a4   : > { %v863_v36 = vsub.f32 %v799_v58, %v831_v38  ;;  %v835_v56 = vmul.f32 %v3358_v55, %v3358_v55 }
 0x1a6   : > { %v895_v44 = vmax.f32 %v863_v36, 0.0 }
 0x1a7   : > { %v731_v46 = vpop.xlane.xlu2 %730 }
 0x1a8   : > { %v2658_v49 = vpop.eup %2657  ;;  %v803_v10 = vmul.f32 0.0078125, %v731_v46  ;;  %v959_v17 = vadd.f32 1e-05, %v895_v44 }
 0x1a9   : > { %v1153_v1 = vmul.f32 %v2658_v49, %v958_v59  ;;  %v601_v18 = vpop.xlane.xlu0 %600  ;;  %v729_v0 = vpop.xlane.xlu1 %728  ;;  %vm1159_vm10 = vweird.f32 %v2658_v49 }
 0x1aa   : > { %v867_v54 = vsub.f32 %v803_v10, %v835_v56  ;;  %v802_v19 = vmul.f32 0.0078125, %v729_v0  ;;  %2659 = vrsqrt.f32 %v959_v17  ;;  %v3367_v23 = vmul.f32 0.0078125, %v601_v18  ;;  %vm3379_vm12 = vmor %vm1158_vm11, %vm1159_vm10 }
 0x1ab   : > { %v1154_v6 = vmul.f32 %v2658_v49, %v1153_v1  ;;  %vm1168_vm14 = vweird.f32 %v959_v17 }
 0x1ac   : > { %v899_v20 = vmax.f32 %v867_v54, 0.0  ;;  %v866_v9 = vsub.f32 %v802_v19, %v834_v47  ;;  %v818_v4 = vmul.f32 %v3367_v23, %v3367_v23  ;;  %v926_v47 = vsub.f32 %v3050_v32, %v3345_v28 }
 0x1ad   : > { %v1155_v24 = vmul.f32 0.5, %v1154_v6 }
 0x1ae   : > { %v3369_v22 = vadd.f32 1e-05, %v899_v20  ;;  %v898_v27 = vmax.f32 %v866_v9, 0.0 }
 0x1af   : > { %v1156_v16 = vsub.f32 1.5, %v1155_v24  ;;  %v697_v43 = vpop.xlane.xlu2 %696 }
 0x1b0   : > { %2661 = vrsqrt.f32 %v3369_v22  ;;  %v3372_v42 = vadd.f32 1e-05, %v898_v27  ;;  %v786_v39 = vmul.f32 0.0078125, %v697_v43  ;;  %v2660_v5 = vpop.eup %2659  ;;  %vm1208_vm4 = vweird.f32 %v3369_v22 }
 0x1b1   : > { %v699_v3 = vpop.xlane.xlu0 %698  ;;  %v603_v34 = vpop.xlane.xlu1 %602  ;;  %v1157_v31 = vmul.f32 %v2658_v49, %v1156_v16  ;;  %v1163_v2 = vmul.f32 %v2660_v5, %v959_v17  ;;  %vm1169_vm13 = vweird.f32 %v2660_v5 }
 0x1b2   : > { %2663 = vrsqrt.f32 %v3372_v42  ;;  %v850_v38 = vsub.f32 %v786_v39, %v818_v4  ;;  %v3377_v58 = vmul.f32 0.0078125, %v603_v34  ;;  %v787_v56 = vmul.f32 0.0078125, %v699_v3  ;;  %vm1170_vm15 = vmor %vm1168_vm14, %vm1169_vm13 }
 0x1b3   : > { %v1164_v36 = vmul.f32 %v2660_v5, %v1163_v2  ;;  %v1161_v0 = vsel %vm3379_vm12, %v2658_v49, %v1157_v31  ;;  %v927_v39 = vsub.f32 %v3087_v25, %v3354_v12  ;;  %vm1198_vm1 = vweird.f32 %v3372_v42 }
 0x1b4   : > { %v882_v46 = vmax.f32 %v850_v38, 0.0  ;;  %v819_v10 = vmul.f32 %v3377_v58, %v3377_v58  ;;  %v1310_v28 = vmul.f32 %v1161_v0, %v926_v47 }
 0x1b5   : > { %v1165_v18 = vmul.f32 0.5, %v1164_v36 }
 0x1b6   : > { %v3385_v1 = vpop.eup %2661  ;;  %v3393_v54 = vadd.f32 1e-05, %v882_v46  ;;  %v851_v19 = vsub.f32 %v787_v56, %v819_v10  ;;  %v1345_v44 = vmul.f32 %v3106_v40, %v1310_v28 }
 0x1b7   : > { %v1203_v59 = vmul.f32 %v3385_v1, %v3369_v22  ;;  %v639_v6 = vpop.xlane.xlu2 %638  ;;  %v1166_v9 = vsub.f32 1.5, %v1165_v18  ;;  %vm1209_vm0 = vweird.f32 %v3385_v1 }
 0x1b8   : > { %v3395_v20 = vpop.eup %2663  ;;  %2665 = vrsqrt.f32 %v3393_v54  ;;  %v883_v43 = vmax.f32 %v851_v19, 0.0  ;;  %vm1038_vm6 = vweird.f32 %v3393_v54  ;;  %vm3472_vm8 = vmor %vm1208_vm4, %vm1209_vm0 }
 0x1b9   : > { %v1204_v24 = vmul.f32 %v3385_v1, %v1203_v59  ;;  %v1193_v27 = vmul.f32 %v3395_v20, %v3372_v42  ;;  %v733_v49 = vpop.xlane.xlu0 %732  ;;  %v637_v32 = vpop.xlane.xlu1 %636  ;;  %v1167_v16 = vmul.f32 %v2660_v5, %v1166_v9  ;;  %v1380_v9 = vadd.f32 %v3151_v13, %v1345_v44 }
 0x1ba   : > { %v3404_v3 = vadd.f32 1e-05, %v883_v43  ;;  %v3406_v34 = vmul.f32 0.0078125, %v637_v32  ;;  %v804_v17 = vmul.f32 0.0078125, %v733_v49  ;;  %vm1199_vm2 = vweird.f32 %v3395_v20 }
 0x1bb   : > { %v1194_v4 = vmul.f32 %v3395_v20, %v1193_v27  ;;  %v1171_v2 = vsel %vm1170_vm15, %v2660_v5, %v1167_v16  ;;  %v1205_v38 = vmul.f32 0.5, %v1204_v24  ;;  %v3419_v5 = vmul.f32 0.0078125, %v639_v6  ;;  %vm3454_vm5 = vmor %vm1198_vm1, %vm1199_vm2 }
 0x1bc   : > { %v3408_v31 = vpop.f32.mrf.mxu1  ;;  %v1311_v36 = vmul.f32 %v1171_v2, %v927_v39  ;;  %2667 = vrsqrt.f32 %v3404_v3  ;;  %v836_v25 = vmul.f32 %v3406_v34, %v3406_v34  ;;  %v930_v27 = vsub.f32 %v2941_v61, %v3361_v48 }
 0x1bd   : > { %v1195_v46 = vmul.f32 0.5, %v1194_v4  ;;  %v1206_v47 = vsub.f32 1.5, %v1205_v38  ;;  %v837_v4 = vmul.f32 %v3419_v5, %v3419_v5  ;;  %v1412_v44 = vmax.f32 %v1380_v9, 0.0 }
 0x1be   : > { %v3414_v12 = vpop.eup %2665  ;;  %v1346_v10 = vmul.f32 %v3106_v40, %v1311_v36  ;;  %v868_v0 = vsub.f32 %v804_v17, %v836_v25  ;;  %vm1048_vm10 = vweird.f32 %v3404_v3 }
 0x1bf   : > { %v605_v56 = vpop.xlane.xlu2 %604  ;;  %v1033_v18 = vmul.f32 %v3414_v12, %v3393_v54  ;;  %v1196_v49 = vsub.f32 1.5, %v1195_v46  ;;  %v1207_v48 = vmul.f32 %v3385_v1, %v1206_v47  ;;  %vm1039_vm3 = vweird.f32 %v3414_v12 }
 0x1c0   : > { %v1381_v24 = vadd.f32 %v3151_v13, %v1346_v10  ;;  %v900_v28 = vmax.f32 %v868_v0, 0.0  ;;  %vm3461_vm7 = vmor %vm1038_vm6, %vm1039_vm3 }
 0x1c1   : > { %v607_v59 = vpop.xlane.xlu0 %606  ;;  %v735_v19 = vpop.xlane.xlu1 %734  ;;  %v1034_v32 = vmul.f32 %v3414_v12, %v1033_v18  ;;  %v1197_v46 = vmul.f32 %v3395_v20, %v1196_v49  ;;  %v3442_v18 = vmul.f32 0.0078125, %v605_v56  ;;  %v931_v49 = vsub.f32 %v3065_v60, %v3358_v55 }
 0x1c2   : > { %v805_v6 = vmul.f32 0.0078125, %v735_v19  ;;  %v1413_v16 = vmax.f32 %v1381_v24, 0.0  ;;  %v2668_v43 = vpop.eup %2667  ;;  %v3430_v2 = vadd.f32 1e-05, %v900_v28  ;;  %v3432_v38 = vmul.f32 0.0078125, %v607_v59 }
 0x1c3   : > { %v1035_v39 = vmul.f32 0.5, %v1034_v32  ;;  %v1043_v36 = vmul.f32 %v2668_v43, %v3404_v3  ;;  %vm1049_vm9 = vweird.f32 %v2668_v43 }
 0x1c4   : > { %v3434_v61 = vpop.f32.mrf.mxu1  ;;  %v869_v25 = vsub.f32 %v805_v6, %v837_v4  ;;  %2669 = vrsqrt.f32 %v3430_v2  ;;  %v1435_v0 = vpack.c.bf16 %v1413_v16, %v1412_v44  ;;  %v821_v19 = vmul.f32 %v3432_v38, %v3432_v38  ;;  %vm1050_vm11 = vmor %vm1048_vm10, %vm1049_vm9 }
 0x1c5   : > { %v1036_v17 = vsub.f32 1.5, %v1035_v39  ;;  %v1044_v10 = vmul.f32 %v2668_v43, %v1043_v36  ;;  %v1201_v16 = vsel %vm3454_vm5, %v3395_v20, %v1197_v46  ;;  %v914_v39 = vsub.f32 %v3112_v14, %v3367_v23 }
 0x1c6   : > { %v901_v24 = vmax.f32 %v869_v25, 0.0  ;;  %1563 = vmatmul.bf16.vlgmr.msra.gmra.mxu2 %v1435_v0  ;;  %v820_v44 = vmul.f32 %v3442_v18, %v3442_v18  ;;  %vm1218_vm13 = vweird.f32 %v3430_v2 }
 0x1c7   : > { %v703_v59 = vpop.xlane.xlu2 %702  ;;  %v1037_v47 = vmul.f32 %v3414_v12, %v1036_v17  ;;  %v1045_v32 = vmul.f32 0.5, %v1044_v10  ;;  %v1211_v17 = vsel %vm3472_vm8, %v3385_v1, %v1207_v48  ;;  %v915_v10 = vsub.f32 %v3166_v41, %v3377_v58 }
 0x1c8   : > { %v789_v9 = vmul.f32 0.0078125, %v703_v59  ;;  %v3465_v55 = vadd.f32 1e-05, %v901_v24 }
 0x1c9   : > { %v641_v28 = vpop.xlane.xlu0 %640  ;;  %v701_v6 = vpop.xlane.xlu1 %700  ;;  %v1046_v4 = vsub.f32 1.5, %v1045_v32  ;;  %v1041_v36 = vsel %vm3461_vm7, %v3414_v12, %v1037_v47  ;;  %v1314_v12 = vmul.f32 %v1201_v16, %v930_v27 }
 0x1ca   : > { %v853_v22 = vsub.f32 %v789_v9, %v821_v19  ;;  %v788_v42 = vmul.f32 0.0078125, %v701_v6  ;;  %2671 = vrsqrt.f32 %v3465_v55  ;;  %v3489_v25 = vpop.eup %2669  ;;  %v3492_v23 = vmul.f32 0.0078125, %v641_v28 }
 0x1cb   : > { %v1047_v14 = vmul.f32 %v2668_v43, %v1046_v4  ;;  %v1298_v47 = vmul.f32 %v1041_v36, %v914_v39  ;;  %v1315_v9 = vmul.f32 %v1211_v17, %v931_v49  ;;  %v1213_v48 = vmul.f32 %v3489_v25, %v3430_v2 }
 0x1cc   : > { %v885_v20 = vmax.f32 %v853_v22, 0.0  ;;  %v3484_v46 = vpop.f32.mrf.mxu1  ;;  %v852_v59 = vsub.f32 %v788_v42, %v820_v44  ;;  %v838_v27 = vmul.f32 %v3492_v23, %v3492_v23  ;;  %v1349_v32 = vmul.f32 %v3106_v40, %v1314_v12 }
 0x1cd   : > { %v1051_v19 = vsel %vm1050_vm11, %v2668_v43, %v1047_v14  ;;  %v1333_v6 = vmul.f32 %v3106_v40, %v1298_v47  ;;  %v1350_v16 = vmul.f32 %v3106_v40, %v1315_v9  ;;  %v1214_v54 = vmul.f32 %v3489_v25, %v1213_v48 }
 0x1ce   : > { %v3496_v0 = vadd.f32 1e-05, %v885_v20  ;;  %v1299_v1 = vmul.f32 %v1051_v19, %v915_v10  ;;  %v884_v3 = vmax.f32 %v852_v59, 0.0  ;;  %v933_v44 = vsub.f32 %v3211_v52, %v3419_v5 }
 0x1cf   : > { %v737_v24 = vpop.xlane.xlu2 %736  ;;  %v1384_v14 = vadd.f32 %v3151_v13, %v1349_v32  ;;  %v1368_v59 = vadd.f32 %v3151_v13, %v1333_v6  ;;  %vm1228_vm12 = vweird.f32 %v3465_v55  ;;  %vm1219_vm14 = vweird.f32 %v3489_v25 }
 0x1d0   : > { %2673 = vrsqrt.f32 %v3496_v0  ;;  %v806_v56 = vmul.f32 0.0078125, %v737_v24  ;;  %v3504_v28 = vpop.eup %2671  ;;  %v3506_v43 = vadd.f32 1e-05, %v884_v3  ;;  %v1334_v60 = vmul.f32 %v3106_v40, %v1299_v1  ;;  %vm3604_vm5 = vmor %vm1218_vm13, %vm1219_vm14 }
 0x1d1   : > { %v739_v41 = vpop.xlane.xlu0 %738  ;;  %v643_v58 = vpop.xlane.xlu1 %642  ;;  %v1223_v22 = vmul.f32 %v3504_v28, %v3465_v55  ;;  %v1215_v3 = vmul.f32 0.5, %v1214_v54  ;;  %vm1229_vm15 = vweird.f32 %v3504_v28  ;;  %vm1068_vm0 = vweird.f32 %v3496_v0 }
 0x1d2   : > { %v3508_v49 = vmul.f32 0.0078125, %v643_v58  ;;  %v870_v42 = vsub.f32 %v806_v56, %v838_v27  ;;  %2675 = vrsqrt.f32 %v3506_v43  ;;  %v807_v39 = vmul.f32 0.0078125, %v739_v41  ;;  %vm3585_vm3 = vmor %vm1228_vm12, %vm1229_vm15 }
 0x1d3   : > { %v1224_v20 = vmul.f32 %v3504_v28, %v1223_v22  ;;  %v1369_v47 = vadd.f32 %v3151_v13, %v1334_v60  ;;  %v1385_v41 = vadd.f32 %v3151_v13, %v1350_v16  ;;  %v1416_v22 = vmax.f32 %v1384_v14, 0.0  ;;  %v3557_v14 = vld [vmem:[%s4963_s6] ss:$0 sm:$0xff] }
 0x1d4   : > { %v839_v4 = vmul.f32 %v3508_v49, %v3508_v49  ;;  %v3519_v36 = vpop.f32.mrf.mxu1  ;;  %v902_v17 = vmax.f32 %v870_v42, 0.0  ;;  %v1400_v16 = vmax.f32 %v1368_v59, 0.0  ;;  %vm1058_vm2 = vweird.f32 %v3506_v43 }
 0x1d5   : > { %v1225_v9 = vmul.f32 0.5, %v1224_v20  ;;  %v1401_v32 = vmax.f32 %v1369_v47, 0.0  ;;  %v1417_v59 = vmax.f32 %v1385_v41, 0.0  ;;  %v5009_v52 = vsub.f32 %v3233_v8, %v3432_v38 }
 0x1d6   : > { %v3525_v12 = vpop.eup %2673  ;;  %v871_v10 = vsub.f32 %v807_v39, %v839_v4  ;;  %v3537_v27 = vadd.f32 1e-05, %v902_v17  ;;  %1568 = vmatmul.bf16.gmra.mxu2 %v3220_v11  ;;  %v1216_v17 = vsub.f32 1.5, %v1215_v3 }
 0x1d7   : > { %v1063_v1 = vmul.f32 %v3525_v12, %v3496_v0  ;;  %v611_v48 = vpop.xlane.xlu2 %610  ;;  %v1226_v54 = vsub.f32 1.5, %v1225_v9  ;;  %v1437_v40 = vpack.c.bf16 %v1417_v59, %v1416_v22  ;;  %vm1069_vm1 = vweird.f32 %v3525_v12 }
 0x1d8   : > { %v903_v56 = vmax.f32 %v871_v10, 0.0  ;;  %v3543_v42 = vpop.eup %2675  ;;  %2677 = vrsqrt.f32 %v3537_v27  ;;  %v1429_v10 = vpack.c.bf16 %v1401_v32, %v1400_v16  ;;  %vm1070_vm7 = vmor %vm1068_vm0, %vm1069_vm1  ;;  %v5008_v0 = vsub.f32 %v3206_v33, %v3406_v34 }
 0x1d9   : > { %v1064_v58 = vmul.f32 %v3525_v12, %v1063_v1  ;;  %v705_v6 = vpop.xlane.xlu0 %704  ;;  %v609_v60 = vpop.xlane.xlu1 %608  ;;  %v1053_v20 = vmul.f32 %v3543_v42, %v3506_v43  ;;  %v1227_v3 = vmul.f32 %v3504_v28, %v1226_v54  ;;  %vm1059_vm4 = vweird.f32 %v3543_v42 }
 0x1da   : > { %v3547_v39 = vadd.f32 1e-05, %v903_v56  ;;  %v3563_v1 = vmul.f32 0.0078125, %v609_v60  ;;  %1533 = vmatmul.bf16.gmra.mxu1 %v1429_v10  ;;  %v790_v16 = vmul.f32 0.0078125, %v705_v6  ;;  %v1217_v60 = vmul.f32 %v3489_v25, %v1216_v17  ;;  %vm1060_vm6 = vmor %vm1058_vm2, %vm1059_vm4 }
 0x1db   : > { %v1065_v4 = vmul.f32 0.5, %v1064_v58  ;;  %v1054_v9 = vmul.f32 %v3543_v42, %v1053_v20  ;;  %v3566_v58 = vmul.f32 0.0078125, %v611_v48  ;;  %v935_v48 = vsub.f32 %v3263_v35, %v3508_v49 }
 0x1dc   : > { %2679 = vrsqrt.f32 %v3547_v39  ;;  %v1529_v47 = vpop.f32.mrf.mxu1  ;;  %v822_v41 = vmul.f32 %v3563_v1, %v3563_v1  ;;  %vm1238_vm9 = vweird.f32 %v3537_v27  ;;  %vm1248_vm10 = vweird.f32 %v3547_v39 }
 0x1dd   : > { %v1066_v56 = vsub.f32 1.5, %v1065_v4  ;;  %v3569_v11 = vadd.f32 %v3557_v14, %v1529_v47  ;;  %v1055_v32 = vmul.f32 0.5, %v1054_v9  ;;  %v823_v55 = vmul.f32 %v3566_v58, %v3566_v58 }
 0x1de   : > { %v3573_v19 = vpop.eup %2677  ;;  %v854_v4 = vsub.f32 %v790_v16, %v822_v41  ;;  %v1231_v9 = vsel %vm3585_vm3, %v3504_v28, %v1227_v3  ;;  %v1221_v28 = vsel %vm3604_vm5, %v3489_v25, %v1217_v60  ;;  %v5014_v35 = vsub.f32 %v3252_v53, %v3492_v23 }
 0x1df   : > { %v645_v24 = vpop.xlane.xlu2 %644  ;;  %1609 = vadd.xlane.f32.xlu2 %v3569_v11  ;;  %v1056_v22 = vsub.f32 1.5, %v1055_v32  ;;  %v1233_v54 = vmul.f32 %v3573_v19, %v3537_v27  ;;  %v1067_v47 = vmul.f32 %v3525_v12, %v1066_v56  ;;  %v1317_v25 = vmul.f32 %v1231_v9, %v933_v44 }
 0x1e0   : > { %v886_v2 = vmax.f32 %v854_v4, 0.0  ;;  %vm1239_vm11 = vweird.f32 %v3573_v19 }
 0x1e1   : > { %v647_v20 = vpop.xlane.xlu0 %646  ;;  %v707_v17 = vpop.xlane.xlu1 %706  ;;  %v1057_v16 = vmul.f32 %v3543_v42, %v1056_v22  ;;  %v1234_v56 = vmul.f32 %v3573_v19, %v1233_v54  ;;  %v1071_v4 = vsel %vm1070_vm7, %v3525_v12, %v1067_v47  ;;  %v3655_v47 = vld [vmem:[%s4960_s3] ss:$0 sm:$0xff]  ;;  %vm3696_vm13 = vmor %vm1238_vm9, %vm1239_vm11 }
 0x1e2   : > { %v3592_v10 = vpop.eup %2679  ;;  %v791_v59 = vmul.f32 0.0078125, %v707_v17  ;;  %v3612_v17 = vmul.f32 0.0078125, %v645_v24  ;;  %v3621_v3 = vmul.f32 0.0078125, %v647_v20  ;;  %v3632_v43 = vadd.f32 1e-05, %v886_v2 }
 0x1e3   : > { %v1243_v41 = vmul.f32 %v3592_v10, %v3547_v39  ;;  %v1235_v24 = vmul.f32 0.5, %v1234_v56  ;;  %v1061_v54 = vsel %vm1060_vm6, %v3543_v42, %v1057_v16  ;;  %v5007_v20 = vsub.f32 %v3228_v57, %v3442_v18 }
 0x1e4   : > { %v855_v6 = vsub.f32 %v791_v59, %v823_v55  ;;  %v1316_v59 = vmul.f32 %v1221_v28, %v5008_v0  ;;  %v840_v42 = vmul.f32 %v3612_v17, %v3612_v17  ;;  %v1301_v5 = vmul.f32 %v1071_v4, %v5009_v52 }
 0x1e5   : > { %v1244_v22 = vmul.f32 %v3592_v10, %v1243_v41  ;;  %v1300_v55 = vmul.f32 %v1061_v54, %v5007_v20  ;;  %2681 = vrsqrt.f32 %v3632_v43  ;;  %v841_v44 = vmul.f32 %v3621_v3, %v3621_v3 }
 0x1e6   : > { %v887_v60 = vmax.f32 %v855_v6, 0.0  ;;  %vm1249_vm8 = vweird.f32 %v3592_v10  ;;  %1573 = vmatmul.bf16.gmra.mxu2 %v1437_v40  ;;  %v1336_v38 = vmul.f32 %v3655_v47, %v1301_v5  ;;  %v1236_v9 = vsub.f32 1.5, %v1235_v24 }
 0x1e7   : > { %v1245_v32 = vmul.f32 0.5, %v1244_v22  ;;  %v743_v16 = vpop.xlane.xlu2 %742  ;;  %v1335_v8 = vmul.f32 %v3655_v47, %v1300_v55  ;;  %v1352_v41 = vmul.f32 %v3655_v47, %v1317_v25  ;;  %v1351_v20 = vmul.f32 %v3655_v47, %v1316_v59  ;;  %vm3675_vm12 = vmor %vm1248_vm10, %vm1249_vm8 }
 0x1e8   : > { %v3649_v57 = vadd.f32 1e-05, %v887_v60  ;;  %v809_v18 = vmul.f32 0.0078125, %v743_v16  ;;  %v1371_v6 = vadd.f32 %v3151_v13, %v1336_v38  ;;  %v1237_v55 = vmul.f32 %v3573_v19, %v1236_v9 }
 0x1e9   : > { %v1246_v12 = vsub.f32 1.5, %v1245_v32  ;;  %v613_v33 = vpop.xlane.xlu0 %612  ;;  %v741_v34 = vpop.xlane.xlu1 %740  ;;  %v1370_v2 = vadd.f32 %v3151_v13, %v1335_v8  ;;  %v1387_v32 = vadd.f32 %v3151_v13, %v1352_v41  ;;  %vm1078_vm15 = vweird.f32 %v3632_v43 }
 0x1ea   : > { %2683 = vrsqrt.f32 %v3649_v57  ;;  %v873_v56 = vsub.f32 %v809_v18, %v841_v44  ;;  %v808_v40 = vmul.f32 0.0078125, %v741_v34  ;;  %v3666_v54 = vmul.f32 0.0078125, %v613_v33 }
 0x1eb   : > { %v1247_v28 = vmul.f32 %v3592_v10, %v1246_v12  ;;  %v1402_v60 = vmax.f32 %v1370_v2, 0.0  ;;  %v1403_v4 = vmax.f32 %v1371_v6, 0.0  ;;  %v3669_v25 = vpop.eup %2681  ;;  %v919_v18 = vsub.f32 %v3276_v62, %v3566_v58 }
 0x1ec   : > { %v905_v22 = vmax.f32 %v873_v56, 0.0  ;;  %v872_v24 = vsub.f32 %v808_v40, %v840_v42  ;;  %v1073_v42 = vmul.f32 %v3669_v25, %v3632_v43  ;;  %v824_v13 = vmul.f32 %v3666_v54, %v3666_v54  ;;  %v3708_v56 = vld [vmem:[%s4961_s4] ss:$0 sm:$0xff] }
 0x1ed   : > { %v1251_v59 = vsel %vm3675_vm12, %v3592_v10, %v1247_v28  ;;  %v1430_v52 = vpack.c.bf16 %v1403_v4, %v1402_v60  ;;  %v1386_v27 = vadd.f32 %v3708_v56, %v1351_v20  ;;  %v1241_v2 = vsel %vm3696_vm13, %v3573_v19, %v1237_v55 }
 0x1ee   : > { %v3679_v39 = vadd.f32 1e-05, %v905_v22  ;;  %v904_v16 = vmax.f32 %v872_v24, 0.0  ;;  %v1074_v33 = vmul.f32 %v3669_v25, %v1073_v42  ;;  %v1319_v41 = vmul.f32 %v1251_v59, %v935_v48 }
 0x1ef   : > { %v709_v5 = vpop.xlane.xlu2 %708  ;;  %1538 = vmatmul.bf16.gmra.mxu1 %v1430_v52  ;;  %v1419_v24 = vmax.f32 %v1387_v32, 0.0  ;;  %v1318_v49 = vmul.f32 %v1241_v2, %v5014_v35  ;;  %vm1079_vm14 = vweird.f32 %v3669_v25  ;;  %v1418_v19 = vmax.f32 %v1386_v27, 0.0 }
 0x1f0   : > { %v3687_v44 = vpop.eup %2683  ;;  %2685 = vrsqrt.f32 %v3679_v39  ;;  %v792_v12 = vmul.f32 0.0078125, %v709_v5  ;;  %v3703_v8 = vadd.f32 1e-05, %v904_v16  ;;  %v1075_v6 = vmul.f32 0.5, %v1074_v33  ;;  %vm1080_vm0 = vmor %vm1078_vm15, %vm1079_vm14 }
 0x1f1   : > { %v1083_v34 = vmul.f32 %v3687_v44, %v3649_v57  ;;  %v711_v38 = vpop.xlane.xlu0 %710  ;;  %v615_v9 = vpop.xlane.xlu1 %614  ;;  %v918_v59 = vsub.f32 %v3272_v29, %v3563_v1  ;;  %v1438_v23 = vpack.c.bf16 %v1419_v24, %v1418_v19  ;;  %vm1089_vm1 = vweird.f32 %v3687_v44 }
 0x1f2   : > { %v856_v28 = vsub.f32 %v792_v12, %v824_v13  ;;  %v3714_v40 = vmul.f32 0.0078125, %v615_v9  ;;  %2687 = vrsqrt.f32 %v3703_v8  ;;  %v793_v4 = vmul.f32 0.0078125, %v711_v38 }
 0x1f3   : > { %v1084_v22 = vmul.f32 %v3687_v44, %v1083_v34  ;;  %v1076_v48 = vsub.f32 1.5, %v1075_v6  ;;  %v1353_v29 = vmul.f32 %v3655_v47, %v1318_v49  ;;  %v1354_v38 = vmul.f32 %v3655_v47, %v1319_v41 }
 0x1f4   : > { %v888_v60 = vmax.f32 %v856_v28, 0.0  ;;  %v825_v20 = vmul.f32 %v3714_v40, %v3714_v40  ;;  %v936_v27 = vsub.f32 %v3283_v50, %v3612_v17  ;;  %vm1088_vm2 = vweird.f32 %v3649_v57 }
 0x1f5   : > { %v1085_v0 = vmul.f32 0.5, %v1084_v22  ;;  %v1077_v16 = vmul.f32 %v3669_v25, %v1076_v48  ;;  %vm1090_vm3 = vmor %vm1088_vm2, %vm1089_vm1  ;;  %v1389_v57 = vadd.f32 %v3708_v56, %v1354_v38  ;;  %vm1268_vm4 = vweird.f32 %v3679_v39 }
 0x1f6   : > { %v3727_v55 = vpop.eup %2685  ;;  %v3732_v32 = vadd.f32 1e-05, %v888_v60  ;;  %v857_v42 = vsub.f32 %v793_v4, %v825_v20  ;;  %1578 = vmatmul.bf16.gmra.mxu2 %v1438_v23  ;;  %v1388_v60 = vadd.f32 %v3708_v56, %v1353_v29  ;;  %vm1258_vm6 = vweird.f32 %v3703_v8 }
 0x1f7   : > { %v1086_v52 = vsub.f32 1.5, %v1085_v0  ;;  %v1263_v53 = vmul.f32 %v3727_v55, %v3679_v39  ;;  %v651_v5 = vpop.xlane.xlu2 %650  ;;  %v1081_v43 = vsel %vm1080_vm0, %v3669_v25, %v1077_v16  ;;  %v937_v25 = vsub.f32 %v3286_v37, %v3621_v3 }
 0x1f8   : > { %2689 = vrsqrt.f32 %v3732_v32  ;;  %v889_v13 = vmax.f32 %v857_v42, 0.0  ;;  %v3740_v1 = vpop.eup %2687  ;;  %v1302_v9 = vmul.f32 %v1081_v43, %v918_v59  ;;  %v3755_v22 = vmul.f32 0.0078125, %v651_v5 }
 0x1f9   : > { %v1087_v12 = vmul.f32 %v3687_v44, %v1086_v52  ;;  %v1264_v10 = vmul.f32 %v3727_v55, %v1263_v53  ;;  %v745_v33 = vpop.xlane.xlu0 %744  ;;  %v649_v34 = vpop.xlane.xlu1 %648  ;;  %v1253_v28 = vmul.f32 %v3740_v1, %v3703_v8  ;;  %vm1269_vm5 = vweird.f32 %v3727_v55 }
 0x1fa   : > { %v3750_v2 = vadd.f32 1e-05, %v889_v13  ;;  %v3761_v24 = vmul.f32 0.0078125, %v649_v34  ;;  %v810_v4 = vmul.f32 0.0078125, %v745_v33  ;;  %v1337_v35 = vmul.f32 %v3655_v47, %v1302_v9  ;;  %vm3801_vm10 = vmor %vm1268_vm4, %vm1269_vm5 }
 0x1fb   : > { %v1265_v6 = vmul.f32 0.5, %v1264_v10  ;;  %v1254_v41 = vmul.f32 %v3740_v1, %v1253_v28  ;;  %v1091_v20 = vsel %vm1090_vm3, %v3687_v44, %v1087_v12  ;;  %vm1259_vm7 = vweird.f32 %v3740_v1 }
 0x1fc   : > { %2691 = vrsqrt.f32 %v3750_v2  ;;  %v842_v19 = vmul.f32 %v3761_v24, %v3761_v24  ;;  %v1303_v59 = vmul.f32 %v1091_v20, %v919_v18  ;;  %vm1098_vm8 = vweird.f32 %v3732_v32  ;;  %vm1260_vm11 = vmor %vm1258_vm6, %vm1259_vm7 }
 0x1fd   : > { %v1266_v48 = vsub.f32 1.5, %v1265_v6  ;;  %v1255_v0 = vmul.f32 0.5, %v1254_v41  ;;  %v843_v58 = vmul.f32 %v3755_v22, %v3755_v22  ;;  %v1372_v5 = vadd.f32 %v3708_v56, %v1337_v35 }
 0x1fe   : > { %v3767_v49 = vpop.eup %2689  ;;  %v874_v52 = vsub.f32 %v810_v4, %v842_v19  ;;  %v1338_v53 = vmul.f32 %v3655_v47, %v1303_v59  ;;  %v1421_v13 = vmax.f32 %v1389_v57, 0.0  ;;  %v1420_v10 = vmax.f32 %v1388_v60, 0.0 }
 0x1ff   : > { %v1093_v44 = vmul.f32 %v3767_v49, %v3732_v32  ;;  %v617_v42 = vpop.xlane.xlu2 %616  ;;  %v1256_v16 = vsub.f32 1.5, %v1255_v0  ;;  %v1267_v43 = vmul.f32 %v3727_v55, %v1266_v48  ;;  %vm1099_vm9 = vweird.f32 %v3767_v49 }
 0x200   : > { %v906_v12 = vmax.f32 %v874_v52, 0.0  ;;  %v3794_v6 = vmul.f32 0.0078125, %v617_v42  ;;  %v1373_v4 = vadd.f32 %v3708_v56, %v1338_v53  ;;  %v1404_v57 = vmax.f32 %v1372_v5, 0.0  ;;  %vm3826_vm12 = vmor %vm1098_vm8, %vm1099_vm9 }
 0x201   : > { %v1094_v62 = vmul.f32 %v3767_v49, %v1093_v44  ;;  %v619_v18 = vpop.xlane.xlu0 %618  ;;  %v747_v23 = vpop.xlane.xlu1 %746  ;;  %v1257_v33 = vmul.f32 %v3740_v1, %v1256_v16  ;;  %v1439_v48 = vpack.c.bf16 %v1421_v13, %v1420_v10  ;;  %v1271_v52 = vsel %vm3801_vm10, %v3727_v55, %v1267_v43 }
 0x202   : > { %v2692_v29 = vpop.eup %2691  ;;  %v3790_v9 = vmul.f32 0.0078125, %v619_v18  ;;  %v3792_v28 = vadd.f32 1e-05, %v906_v12  ;;  %v811_v41 = vmul.f32 0.0078125, %v747_v23  ;;  %v1405_v39 = vmax.f32 %v1373_v4, 0.0 }
 0x203   : > { %v1095_v34 = vmul.f32 0.5, %v1094_v62  ;;  %v1103_v38 = vmul.f32 %v2692_v29, %v3750_v2  ;;  %v1261_v16 = vsel %vm1260_vm11, %v3740_v1, %v1257_v33  ;;  %vm1109_vm13 = vweird.f32 %v2692_v29 }
 0x204   : > { %2693 = vrsqrt.f32 %v3792_v28  ;;  %v827_v0 = vmul.f32 %v3790_v9, %v3790_v9  ;;  %v875_v19 = vsub.f32 %v811_v41, %v843_v58  ;;  %v1431_v8 = vpack.c.bf16 %v1405_v39, %v1404_v57 }
 0x205   : > { %v1096_v20 = vsub.f32 1.5, %v1095_v34  ;;  %v1104_v35 = vmul.f32 %v2692_v29, %v1103_v38  ;;  %v1320_v18 = vmul.f32 %v1261_v16, %v936_v27  ;;  %v920_v58 = vsub.f32 %v3296_v63, %v3666_v54 }
 0x206   : > { %v907_v53 = vmax.f32 %v875_v19, 0.0  ;;  %1583 = vmatmul.bf16.gmra.mxu2 %v1439_v48  ;;  %v1321_v50 = vmul.f32 %v1271_v52, %v937_v25  ;;  %1543 = vmatmul.bf16.gmra.mxu1 %v1431_v8  ;;  %v921_v27 = vsub.f32 %v3303_v45, %v3714_v40  ;;  %vm1108_vm14 = vweird.f32 %v3750_v2 }
 0x207   : > { %v1097_v59 = vmul.f32 %v3767_v49, %v1096_v20  ;;  %v1105_v44 = vmul.f32 0.5, %v1104_v35  ;;  %v715_v42 = vpop.xlane.xlu2 %714  ;;  %v1355_v43 = vmul.f32 %v3655_v47, %v1320_v18  ;;  %vm1110_vm15 = vmor %vm1108_vm14, %vm1109_vm13  ;;  %v826_v37 = vmul.f32 %v3794_v6, %v3794_v6 }
 0x208   : > { %v795_v62 = vmul.f32 0.0078125, %v715_v42  ;;  %v3833_v17 = vadd.f32 1e-05, %v907_v53  ;;  %v1356_v45 = vmul.f32 %v3655_v47, %v1321_v50  ;;  %v938_v35 = vsub.f32 %v3311_v7, %v3761_v24 }
 0x209   : > { %v1106_v23 = vsub.f32 1.5, %v1105_v44  ;;  %v621_v55 = vpop.xlane.xlu0 %620  ;;  %v713_v5 = vpop.xlane.xlu1 %712  ;;  %v1101_v32 = vsel %vm3826_vm12, %v3767_v49, %v1097_v59  ;;  %v1390_v4 = vadd.f32 %v3708_v56, %v1355_v43  ;;  %vm1278_vm1 = vweird.f32 %v3792_v28 }
 0x20a   : > { %v859_v63 = vsub.f32 %v795_v62, %v827_v0  ;;  %v794_v54 = vmul.f32 0.0078125, %v713_v5  ;;  %v2694_v12 = vpop.eup %2693  ;;  %2695 = vrsqrt.f32 %v3833_v17  ;;  %v3846_v25 = vmul.f32 0.0078125, %v621_v55 }
 0x20b   : > { %v1107_v13 = vmul.f32 %v2692_v29, %v1106_v23  ;;  %v1273_v10 = vmul.f32 %v2694_v12, %v3792_v28  ;;  %v1304_v40 = vmul.f32 %v1101_v32, %v920_v58  ;;  %v1391_v19 = vadd.f32 %v3708_v56, %v1356_v45 }
 0x20c   : > { %v891_v3 = vmax.f32 %v859_v63, 0.0  ;;  %v858_v34 = vsub.f32 %v794_v54, %v826_v37  ;;  %v828_v60 = vmul.f32 %v3846_v25, %v3846_v25  ;;  %vm1279_vm0 = vweird.f32 %v2694_v12 }
 0x20d   : > { %v1111_v49 = vsel %vm1110_vm15, %v2692_v29, %v1107_v13  ;;  %v1274_v38 = vmul.f32 %v2694_v12, %v1273_v10  ;;  %v1339_v39 = vmul.f32 %v3655_v47, %v1304_v40  ;;  %v1422_v7 = vmax.f32 %v1390_v4, 0.0  ;;  %vm1280_vm2 = vmor %vm1278_vm1, %vm1279_vm0 }
 0x20e   : > { %v1305_v2 = vmul.f32 %v1111_v49, %v921_v27  ;;  %v3850_v33 = vadd.f32 1e-05, %v891_v3  ;;  %v890_v20 = vmax.f32 %v858_v34, 0.0  ;;  %v1423_v23 = vmax.f32 %v1391_v19, 0.0 }
 0x20f   : > { %v717_v41 = vpop.xlane.xlu2 %716  ;;  %v1275_v57 = vmul.f32 0.5, %v1274_v38  ;;  %v1374_v63 = vadd.f32 %v3708_v56, %v1339_v39  ;;  %vm1288_vm4 = vweird.f32 %v3833_v17 }
 0x210   : > { %2697 = vrsqrt.f32 %v3850_v33  ;;  %v796_v29 = vmul.f32 0.0078125, %v717_v41  ;;  %v2696_v59 = vpop.eup %2695  ;;  %v3860_v44 = vadd.f32 1e-05, %v890_v20  ;;  %v1340_v52 = vmul.f32 %v3655_v47, %v1305_v2 }
 0x211   : > { %v719_v48 = vpop.xlane.xlu0 %718  ;;  %v623_v0 = vpop.xlane.xlu1 %622  ;;  %v1276_v53 = vsub.f32 1.5, %v1275_v57  ;;  %v1283_v8 = vmul.f32 %v2696_v59, %v3833_v17  ;;  %v1440_v43 = vpack.c.bf16 %v1423_v23, %v1422_v7  ;;  %vm1289_vm3 = vweird.f32 %v2696_v59 }
 0x212   : > { %v860_v42 = vsub.f32 %v796_v29, %v828_v60  ;;  %v3862_v16 = vmul.f32 0.0078125, %v623_v0  ;;  %2699 = vrsqrt.f32 %v3860_v44  ;;  %v797_v62 = vmul.f32 0.0078125, %v719_v48  ;;  %vm1290_vm5 = vmor %vm1288_vm4, %vm1289_vm3 }
 0x213   : > { %v1277_v58 = vmul.f32 %v2694_v12, %v1276_v53  ;;  %v1284_v1 = vmul.f32 %v2696_v59, %v1283_v8  ;;  %v1375_v54 = vadd.f32 %v3708_v56, %v1340_v52  ;;  %v1406_v2 = vmax.f32 %v1374_v63, 0.0 }
 0x214   : > { %v892_v24 = vmax.f32 %v860_v42, 0.0  ;;  %v829_v18 = vmul.f32 %v3862_v16, %v3862_v16  ;;  %v939_v41 = vsub.f32 %v3314_v21, %v3755_v22  ;;  %vm1128_vm7 = vweird.f32 %v3850_v33 }
 0x215   : > { %v1281_v32 = vsel %vm1280_vm2, %v2694_v12, %v1277_v58  ;;  %v1285_v27 = vmul.f32 0.5, %v1284_v1  ;;  %v1407_v10 = vmax.f32 %v1375_v54, 0.0  ;;  %v923_v21 = vsub.f32 %v3326_v30, %v3790_v9 }
 0x216   : > { %v2698_v55 = vpop.eup %2697  ;;  %v3870_v5 = vadd.f32 1e-05, %v892_v24  ;;  %v861_v50 = vsub.f32 %v797_v62, %v829_v18  ;;  %v1322_v37 = vmul.f32 %v1281_v32, %v938_v35  ;;  %1588 = vmatmul.bf16.gmra.mxu2 %v1440_v43  ;;  %vm1118_vm10 = vweird.f32 %v3860_v44 }
 0x217   : > { %v1123_v13 = vmul.f32 %v2698_v55, %v3850_v33  ;;  %v1286_v3 = vsub.f32 1.5, %v1285_v27  ;;  %v1432_v4 = vpack.c.bf16 %v1407_v10, %v1406_v2  ;;  %vm1129_vm6 = vweird.f32 %v2698_v55 }
 0x218   : > { %2701 = vrsqrt.f32 %v3870_v5  ;;  %v893_v28 = vmax.f32 %v861_v50, 0.0  ;;  %v2700_v45 = vpop.eup %2699  ;;  %v1357_v60 = vmul.f32 %v3655_v47, %v1322_v37  ;;  %vm1130_vm8 = vmor %vm1128_vm7, %vm1129_vm6  ;;  %v922_v30 = vsub.f32 %v3322_v26, %v3794_v6 }
 0x219   : > { %v1124_v49 = vmul.f32 %v2698_v55, %v1123_v13  ;;  %v1287_v34 = vmul.f32 %v2696_v59, %v1286_v3  ;;  %v1113_v38 = vmul.f32 %v2700_v45, %v3860_v44  ;;  %1548 = vmatmul.bf16.gmra.mxu1 %v1432_v4  ;;  %vm1119_vm9 = vweird.f32 %v2700_v45  ;;  %v3904_v4 = vpop.f32.mrf.mxu1 }
 0x21a   : > { %v957_v40 = vadd.f32 1e-05, %v893_v28  ;;  %v1392_v39 = vadd.f32 %v3708_v56, %v1357_v60  ;;  %vm1120_vm11 = vmor %vm1118_vm10, %vm1119_vm9  ;;  %vm1138_vm14 = vweird.f32 %v3870_v5  ;;  %v925_v43 = vsub.f32 %v3343_v51, %v3862_v16 }
 0x21b   : > { %v1125_v12 = vmul.f32 0.5, %v1124_v49  ;;  %v1114_v29 = vmul.f32 %v2700_v45, %v1113_v38  ;;  %v1291_v35 = vsel %vm1290_vm5, %v2696_v59, %v1287_v34  ;;  %v924_v10 = vsub.f32 %v3336_v15, %v3846_v25 }
 0x21c   : > { %2703 = vrsqrt.f32 %v957_v40  ;;  %v1323_v48 = vmul.f32 %v1291_v35, %v939_v41  ;;  %v1424_v9 = vmax.f32 %v1392_v39, 0.0  ;;  %vm1148_vm0 = vweird.f32 %v957_v40 }
 0x21d   : > { %v1126_v20 = vsub.f32 1.5, %v1125_v12  ;;  %v1115_v17 = vmul.f32 0.5, %v1114_v29 }
 0x21e   : > { %v2702_v57 = vpop.eup %2701  ;;  %v1358_v22 = vmul.f32 %v3655_v47, %v1323_v48 }
 0x21f   : > { %v1127_v0 = vmul.f32 %v2698_v55, %v1126_v20  ;;  %v1133_v19 = vmul.f32 %v2702_v57, %v3870_v5  ;;  %v1116_v42 = vsub.f32 1.5, %v1115_v17  ;;  %vm1139_vm12 = vweird.f32 %v2702_v57 }
 0x220   : > { %v1393_v8 = vadd.f32 %v3708_v56, %v1358_v22  ;;  %vm1140_vm15 = vmor %vm1138_vm14, %vm1139_vm12 }
 0x221   : > { %v1134_v59 = vmul.f32 %v2702_v57, %v1133_v19  ;;  %v1131_v52 = vsel %vm1130_vm8, %v2698_v55, %v1127_v0  ;;  %v1117_v33 = vmul.f32 %v2700_v45, %v1116_v42 }
 0x222   : > { %v2704_v53 = vpop.eup %2703  ;;  %v1307_v7 = vmul.f32 %v1131_v52, %v923_v21  ;;  %v1425_v18 = vmax.f32 %v1393_v8, 0.0 }
 0x223   : > { %v1135_v24 = vmul.f32 0.5, %v1134_v59  ;;  %v1143_v62 = vmul.f32 %v2704_v53, %v957_v40  ;;  %v1121_v55 = vsel %vm1120_vm11, %v2700_v45, %v1117_v33  ;;  %vm1149_vm13 = vweird.f32 %v2704_v53 }
 0x224   : > { %v1342_v58 = vmul.f32 %v3655_v47, %v1307_v7  ;;  %v1441_v50 = vpack.c.bf16 %v1425_v18, %v1424_v9  ;;  %v1306_v63 = vmul.f32 %v1121_v55, %v922_v30  ;;  %vm1150_vm1 = vmor %vm1148_vm0, %vm1149_vm13 }
 0x225   : > { %v1136_v1 = vsub.f32 1.5, %v1135_v24  ;;  %v1144_v23 = vmul.f32 %v2704_v53, %v1143_v62 }
 0x226   : > { %v1341_v32 = vmul.f32 %v3655_v47, %v1306_v63  ;;  %v1377_v44 = vadd.f32 %v3708_v56, %v1342_v58  ;;  %1593 = vmatmul.bf16.gmra.mxu2 %v1441_v50 }
 0x227   : > { %v1145_v54 = vmul.f32 0.5, %v1144_v23  ;;  %v1137_v27 = vmul.f32 %v2702_v57, %v1136_v1 }
 0x228   : > { %v1376_v26 = vadd.f32 %v3708_v56, %v1341_v32  ;;  %v1409_v28 = vmax.f32 %v1377_v44, 0.0 }
 0x229   : > { %v1146_v13 = vsub.f32 1.5, %v1145_v54  ;;  %v1141_v49 = vsel %vm1140_vm15, %v2702_v57, %v1137_v27 }
 0x22a   : > { %v1408_v37 = vmax.f32 %v1376_v26, 0.0  ;;  %v1308_v5 = vmul.f32 %v1141_v49, %v924_v10 }
 0x22b   : > { %v1147_v6 = vmul.f32 %v2704_v53, %v1146_v13 }
 0x22c   : > { %v1433_v2 = vpack.c.bf16 %v1409_v28, %v1408_v37  ;;  %v1343_v12 = vmul.f32 %v3655_v47, %v1308_v5 }
 0x22d   : > { %v1151_v3 = vsel %vm1150_vm1, %v2704_v53, %v1147_v6 }
 0x22e   : > { %v1309_v45 = vmul.f32 %v1151_v3, %v925_v43  ;;  %1553 = vmatmul.bf16.gmra.mxu1 %v1433_v2  ;;  %v1378_v51 = vadd.f32 %v3708_v56, %v1343_v12 }
 0x230   : > { %v1344_v34 = vmul.f32 %v3655_v47, %v1309_v45  ;;  %v1410_v38 = vmax.f32 %v1378_v51, 0.0 }
 0x232   : > { %v1379_v40 = vadd.f32 %v3708_v56, %v1344_v34 }
 0x234   : > { %v1411_v16 = vmax.f32 %v1379_v40, 0.0 }
 0x236   : > { %v1434_v41 = vpack.c.bf16 %v1411_v16, %v1410_v38 }
 0x23e   : > { %1558 = vmatmul.bf16.gmra.mxu1 %v1434_v41 }
 0x249   : > { %v3912_v47 = vpop.f32.mrf.mxu2 }
 0x251   : > { %v3920_v35 = vpop.f32.mrf.mxu2 }
 0x252   : > { %v4009_v38 = vpop.xlane.xlu2 %1609 }
 0x257   : > { %v1534_v60 = vpop.f32.mrf.mxu1 }
 0x258   : > { %v3907_v15 = vadd.f32 %v3557_v14, %v1534_v60 }
 0x259   : > { %v3928_v17 = vpop.f32.mrf.mxu2 }
 0x25a   : > { %1613 = vadd.xlane.f32.xlu0 %v3907_v15  ;;  %v1671_v25 = vmul.f32 %v3907_v15, %v3907_v15 }
 0x25c   : > { %1709 = vadd.xlane.f32.xlu1 %v1671_v25 }
 0x25f   : > { %v1536_v20 = vpop.f32.mrf.mxu1 }
 0x260   : > { %v3915_v56 = vadd.f32 %v3557_v14, %v1536_v20 }
 0x261   : > { %v3936_v39 = vpop.f32.mrf.mxu2 }
 0x262   : > { %v1672_v29 = vmul.f32 %v3915_v56, %v3915_v56 }
 0x264   : > { %1711 = vadd.xlane.f32.xlu2 %v1672_v29  ;;  %1615 = vadd.xlane.f32.xlu1 %v3915_v56 }
 0x269   : > { %v1574_v42 = vpop.f32.mrf.mxu2 }
 0x26a   : > { %v3983_v28 = vadd.f32 %v3557_v14, %v1574_v42 }
 0x26c   : > { %v1539_v57 = vpop.f32.mrf.mxu1  ;;  %v1687_v49 = vmul.f32 %v3983_v28, %v3983_v28 }
 0x26d   : > { %v3923_v48 = vadd.f32 %v3557_v14, %v1539_v57 }
 0x26f   : > { %1617 = vadd.xlane.f32.xlu1 %v3923_v48  ;;  %v1673_v0 = vmul.f32 %v3923_v48, %v3923_v48 }
 0x271   : > { %1713 = vadd.xlane.f32.xlu2 %v1673_v0  ;;  %v1576_v33 = vpop.f32.mrf.mxu2 }
 0x272   : > { %v3969_v44 = vadd.f32 %v3557_v14, %v1576_v33 }
 0x274   : > { %v1541_v19 = vpop.f32.mrf.mxu1  ;;  %v1688_v26 = vmul.f32 %v3969_v44, %v3969_v44 }
 0x275   : > { %v3931_v21 = vadd.f32 %v3557_v14, %v1541_v19 }
 0x277   : > { %v1674_v22 = vmul.f32 %v3931_v21, %v3931_v21 }
 0x279   : > { %1715 = vadd.xlane.f32.xlu0 %v1674_v22  ;;  %1619 = vadd.xlane.f32.xlu2 %v3931_v21  ;;  %v1579_v62 = vpop.f32.mrf.mxu2 }
 0x27a   : > { %v3979_v37 = vadd.f32 %v3557_v14, %v1579_v62 }
 0x27c   : > { %v1689_v3 = vmul.f32 %v3979_v37, %v3979_v37 }
 0x281   : > { %v1581_v23 = vpop.f32.mrf.mxu2 }
 0x282   : > { %v3991_v45 = vadd.f32 %v3557_v14, %v1581_v23 }
 0x283   : > { %v1544_v59 = vpop.f32.mrf.mxu1 }
 0x284   : > { %v3939_v52 = vadd.f32 %v3557_v14, %v1544_v59  ;;  %v1690_v2 = vmul.f32 %v3991_v45, %v3991_v45 }
 0x286   : > { %1621 = vadd.xlane.f32.xlu2 %v3939_v52  ;;  %v1675_v53 = vmul.f32 %v3939_v52, %v3939_v52 }
 0x288   : > { %1717 = vadd.xlane.f32.xlu0 %v1675_v53 }
 0x289   : > { %v1584_v54 = vpop.f32.mrf.mxu2 }
 0x28a   : > { %v3998_v5 = vadd.f32 %v3557_v14, %v1584_v54 }
 0x28b   : > { %v1546_v8 = vpop.f32.mrf.mxu1 }
 0x28c   : > { %v3945_v7 = vadd.f32 %v3557_v14, %v1546_v8  ;;  %v1691_v12 = vmul.f32 %v3998_v5, %v3998_v5 }
 0x28e   : > { %v1676_v24 = vmul.f32 %v3945_v7, %v3945_v7 }
 0x290   : > { %1719 = vadd.xlane.f32.xlu1 %v1676_v24  ;;  %1623 = vadd.xlane.f32.xlu0 %v3945_v7 }
 0x291   : > { %v1586_v43 = vpop.f32.mrf.mxu2 }
 0x292   : > { %v4012_v60 = vadd.f32 %v3557_v14, %v1586_v43 }
 0x294   : > { %v1692_v22 = vmul.f32 %v4012_v60, %v4012_v60 }
 0x296   : > { %v1549_v30 = vpop.f32.mrf.mxu1 }
 0x297   : > { %v3951_v9 = vadd.f32 %v3557_v14, %v1549_v30 }
 0x299   : > { %1625 = vadd.xlane.f32.xlu0 %v3951_v9  ;;  %v1677_v18 = vmul.f32 %v3951_v9, %v3951_v9  ;;  %v1589_v10 = vpop.f32.mrf.mxu2 }
 0x29a   : > { %v4025_v33 = vadd.f32 %v3557_v14, %v1589_v10 }
 0x29b   : > { %1721 = vadd.xlane.f32.xlu1 %v1677_v18 }
 0x29c   : > { %v1693_v23 = vmul.f32 %v4025_v33, %v4025_v33 }
 0x29e   : > { %v1551_v58 = vpop.f32.mrf.mxu1 }
 0x29f   : > { %v3957_v1 = vadd.f32 %v3557_v14, %v1551_v58 }
 0x2a1   : > { %v1678_v55 = vmul.f32 %v3957_v1, %v3957_v1  ;;  %v1591_v34 = vpop.f32.mrf.mxu2 }
 0x2a2   : > { %v4004_v51 = vadd.f32 %v3557_v14, %v1591_v34 }
 0x2a3   : > { %1723 = vadd.xlane.f32.xlu2 %v1678_v55  ;;  %1627 = vadd.xlane.f32.xlu1 %v3957_v1 }
 0x2a4   : > { %v1694_v57 = vmul.f32 %v4004_v51, %v4004_v51 }
 0x2a9   : > { %v1594_v0 = vpop.f32.mrf.mxu2 }
 0x2aa   : > { %v4021_v42 = vadd.f32 %v3557_v14, %v1594_v0 }
 0x2ab   : > { %v1554_v50 = vpop.f32.mrf.mxu1 }
 0x2ac   : > { %v3963_v63 = vadd.f32 %v3557_v14, %v1554_v50  ;;  %5019 = vst [vmem:[#allocation2_spill] sm:$0xff] %v4021_v42  ;;  %v1695_v18 = vmul.f32 %v4021_v42, %v4021_v42 }
 0x2ae   : > { %1629 = vadd.xlane.f32.xlu1 %v3963_v63  ;;  %v1679_v32 = vmul.f32 %v3963_v63, %v3963_v63 }
 0x2b0   : > { %1725 = vadd.xlane.f32.xlu2 %v1679_v32 }
 0x2b1   : > { %v1596_v55 = vpop.f32.mrf.mxu2 }
 0x2b3   : > { %v1556_v27 = vpop.f32.mrf.mxu1 }
 0x2b4   : > { %v3972_v13 = vadd.f32 %v3557_v14, %v1556_v27  ;;  %v4037_v27 = vadd.f32 %v3557_v14, %v1596_v55 }
 0x2b6   : > { %1743 = vadd.xlane.f32.xlu1 %v1688_v26  ;;  %v1680_v6 = vmul.f32 %v3972_v13, %v3972_v13 }
 0x2b8   : > { %1727 = vadd.xlane.f32.xlu0 %v1680_v6  ;;  %1631 = vadd.xlane.f32.xlu2 %v3972_v13 }
 0x2be   : > { %1745 = vadd.xlane.f32.xlu1 %v1689_v3 }
 0x2c0   : > { %1741 = vadd.xlane.f32.xlu0 %v1687_v49  ;;  %1645 = vadd.xlane.f32.xlu2 %v3983_v28 }
 0x2c6   : > { %1651 = vadd.xlane.f32.xlu1 %v3991_v45 }
 0x2c8   : > { %1647 = vadd.xlane.f32.xlu0 %v3969_v44  ;;  %1747 = vadd.xlane.f32.xlu2 %v1690_v2 }
 0x2cd   : > { %v1614_v40 = vpop.xlane.xlu0 %1613 }
 0x2ce   : > { %1653 = vadd.xlane.f32.xlu1 %v3998_v5  ;;  %v4006_v16 = vmul.f32 0.0078125, %v1614_v40 }
 0x2cf   : > { %v1710_v41 = vpop.xlane.xlu1 %1709 }
 0x2d0   : > { %1649 = vadd.xlane.f32.xlu0 %v3979_v37  ;;  %1749 = vadd.xlane.f32.xlu2 %v1691_v12  ;;  %v1831_v25 = vmul.f32 %v4006_v16, %v4006_v16  ;;  %v1799_v20 = vmul.f32 0.0078125, %v1710_v41  ;;  %v1696_v12 = vmul.f32 %v4037_v27, %v4037_v27 }
 0x2d2   : > { %v1863_v29 = vsub.f32 %v1799_v20, %v1831_v25 }
 0x2d4   : > { %v1895_v19 = vmax.f32 %v1863_v29, 0.0  ;;  %v1927_v29 = vsub.f32 %v3907_v15, %v4006_v16 }
 0x2d6   : > { %1755 = vadd.xlane.f32.xlu1 %v1694_v57  ;;  %v1959_v59 = vadd.f32 1e-05, %v1895_v19 }
 0x2d7   : > { %v1712_v53 = vpop.xlane.xlu2 %1711  ;;  %v1616_v8 = vpop.xlane.xlu1 %1615 }
 0x2d8   : > { %1751 = vadd.xlane.f32.xlu0 %v1692_v22  ;;  %1655 = vadd.xlane.f32.xlu2 %v4012_v60  ;;  %2705 = vrsqrt.f32 %v1959_v59  ;;  %v4027_v24 = vmul.f32 0.0078125, %v1616_v8  ;;  %v1800_v62 = vmul.f32 0.0078125, %v1712_v53  ;;  %vm2051_vm3 = vweird.f32 %v1959_v59  ;;  %v4052_v22 = vld [vmem:[%s4963_s6] ss:$0 sm:$0xff] }
 0x2d9   : > { %v4056_v53 = vadd.f32 %v4052_v22, %v3928_v17  ;;  %v4065_v16 = vadd.f32 %v4052_v22, %v3904_v4 }
 0x2da   : > { %v1832_v30 = vmul.f32 %v4027_v24, %v4027_v24 }
 0x2db   : > { %5021 = vst [vmem:[#allocation4_spill] sm:$0xff] %v4065_v16 }
 0x2dc   : > { %v1864_v58 = vsub.f32 %v1800_v62, %v1832_v30  ;;  %v4060_v62 = vadd.f32 %v4052_v22, %v3936_v39  ;;  %v4072_v30 = vld [vmem:[%s4964_s7] ss:$0 sm:$0xff] }
 0x2de   : > { %1757 = vadd.xlane.f32.xlu1 %v1695_v18  ;;  %v2706_v50 = vpop.eup %2705  ;;  %v1896_v54 = vmax.f32 %v1864_v58, 0.0  ;;  %5020 = vst [vmem:[#allocation3_spill] sm:$0xff] %v4060_v62  ;;  %v1928_v58 = vsub.f32 %v3915_v56, %v4027_v24  ;;  %v1685_v56 = vmul.f32 %v4056_v53, %v4056_v53 }
 0x2df   : > { %v2046_v32 = vmul.f32 %v2706_v50, %v1959_v59  ;;  %vm2052_vm2 = vweird.f32 %v2706_v50 }
 0x2e0   : > { %1753 = vadd.xlane.f32.xlu0 %v1693_v23  ;;  %1657 = vadd.xlane.f32.xlu2 %v4025_v33  ;;  %v1960_v26 = vadd.f32 1e-05, %v1896_v54  ;;  %vm2053_vm4 = vmor %vm2051_vm3, %vm2052_vm2  ;;  %v1670_v23 = vmul.f32 %v4065_v16, %v4065_v16  ;;  %v4081_v54 = vld [vmem:[%s4965_s8] ss:$0 sm:$0xff] }
 0x2e1   : > { %v2047_v43 = vmul.f32 %v2706_v50, %v2046_v32 }
 0x2e2   : > { %v1618_v6 = vpop.xlane.xlu1 %1617  ;;  %2707 = vrsqrt.f32 %v1960_v26  ;;  %vm2061_vm6 = vweird.f32 %v1960_v26 }
 0x2e3   : > { %v4039_v3 = vmul.f32 0.0078125, %v1618_v6  ;;  %v2048_v10 = vmul.f32 0.5, %v2047_v43 }
 0x2e4   : > { %v1714_v49 = vpop.xlane.xlu2 %1713 }
 0x2e5   : > { %v1833_v2 = vmul.f32 %v4039_v3, %v4039_v3  ;;  %v1801_v34 = vmul.f32 0.0078125, %v1714_v49  ;;  %v2049_v40 = vsub.f32 1.5, %v2048_v10 }
 0x2e6   : > { %1663 = vadd.xlane.f32.xlu1 %v4037_v27 }
 0x2e7   : > { %v1865_v14 = vsub.f32 %v1801_v34, %v1833_v2  ;;  %v2050_v41 = vmul.f32 %v2706_v50, %v2049_v40  ;;  %v4092_v34 = vadd.f32 %v4052_v22, %v3484_v46  ;;  %v1669_v46 = vmul.f32 %v3569_v11, %v3569_v11 }
 0x2e8   : > { %1659 = vadd.xlane.f32.xlu0 %v4004_v51  ;;  %1759 = vadd.xlane.f32.xlu2 %v1696_v12  ;;  %v2708_v20 = vpop.eup %2707 }
 0x2e9   : > { %v1897_v25 = vmax.f32 %v1865_v14, 0.0  ;;  %v2056_v57 = vmul.f32 %v2708_v20, %v1960_v26  ;;  %v2054_v19 = vsel %vm2053_vm4, %v2706_v50, %v2050_v41  ;;  %vm2062_vm5 = vweird.f32 %v2708_v20  ;;  %5022 = vst [vmem:[#allocation5_spill] sm:$0xff] %v4092_v34 }
 0x2ea   : > { %v2311_v8 = vmul.f32 %v2054_v19, %v1927_v29  ;;  %vm2063_vm7 = vmor %vm2061_vm6, %vm2062_vm5  ;;  %v1929_v14 = vsub.f32 %v3923_v48, %v4039_v3  ;;  %v4110_v48 = vadd.f32 %v4052_v22, %v3920_v35 }
 0x2eb   : > { %v1961_v0 = vadd.f32 1e-05, %v1897_v25  ;;  %v2057_v59 = vmul.f32 %v2708_v20, %v2056_v57 }
 0x2ec   : > { %v1716_v50 = vpop.xlane.xlu0 %1715  ;;  %v2346_v32 = vmul.f32 %v4072_v30, %v2311_v8  ;;  %v1620_v29 = vpop.xlane.xlu2 %1619  ;;  %5024 = vst [vmem:[#allocation7_spill] sm:$0xff] %v4110_v48  ;;  %v1686_v8 = vmul.f32 %v4060_v62, %v4060_v62 }
 0x2ed   : > { %2709 = vrsqrt.f32 %v1961_v0  ;;  %v2058_v15 = vmul.f32 0.5, %v2057_v59  ;;  %vm2071_vm9 = vweird.f32 %v1961_v0  ;;  %v1667_v59 = vmul.f32 %v4092_v34, %v4092_v34 }
 0x2ee   : > { %1641 = vadd.xlane.f32.xlu1 %v4056_v53  ;;  %v2381_v49 = vadd.f32 %v4081_v54, %v2346_v32 }
 0x2ef   : > { %v2059_v17 = vsub.f32 1.5, %v2058_v15  ;;  %v4119_v15 = vadd.f32 %v4052_v22, %v3912_v47  ;;  %v1684_v47 = vmul.f32 %v4110_v48, %v4110_v48 }
 0x2f0   : > { %1661 = vadd.xlane.f32.xlu0 %v4021_v42  ;;  %1643 = vadd.xlane.f32.xlu2 %v4060_v62  ;;  %v2413_v25 = vmax.f32 %v2381_v49, 0.0  ;;  %v1802_v49 = vmul.f32 0.0078125, %v1716_v50 }
 0x2f1   : > { %v2060_v18 = vmul.f32 %v2708_v20, %v2059_v17  ;;  %5025 = vst [vmem:[#allocation8_spill] sm:$0xff] %v4119_v15 }
 0x2f3   : > { %v2710_v39 = vpop.eup %2709  ;;  %v2064_v55 = vsel %vm2063_vm7, %v2708_v20, %v2060_v18  ;;  %v4098_v20 = vadd.f32 %v4052_v22, %v3519_v36  ;;  %v4125_v18 = vmul.f32 0.0078125, %v1620_v29 }
 0x2f4   : > { %v2066_v4 = vmul.f32 %v2710_v39, %v1961_v0  ;;  %v2312_v6 = vmul.f32 %v2064_v55, %v1928_v58  ;;  %vm2072_vm8 = vweird.f32 %v2710_v39  ;;  %v1683_v58 = vmul.f32 %v4119_v15, %v4119_v15 }
 0x2f5   : > { %vm2073_vm10 = vmor %vm2071_vm9, %vm2072_vm8  ;;  %5023 = vst [vmem:[#allocation6_spill] sm:$0xff] %v4098_v20  ;;  %v1668_v50 = vmul.f32 %v4098_v20, %v4098_v20 }
 0x2f6   : > { %v2067_v43 = vmul.f32 %v2710_v39, %v2066_v4  ;;  %1707 = vadd.xlane.f32.xlu1 %v1670_v23  ;;  %v2347_v26 = vmul.f32 %v4072_v30, %v2312_v6  ;;  %v1834_v6 = vmul.f32 %v4125_v18, %v4125_v18 }
 0x2f8   : > { %v2068_v24 = vmul.f32 0.5, %v2067_v43  ;;  %1611 = vadd.xlane.f32.xlu0 %v4065_v16  ;;  %1737 = vadd.xlane.f32.xlu2 %v1685_v56  ;;  %v2382_v2 = vadd.f32 %v4081_v54, %v2347_v26 }
 0x2f9   : > { %v1622_v3 = vpop.xlane.xlu2 %1621 }
 0x2fa   : > { %v2069_v10 = vsub.f32 1.5, %v2068_v24  ;;  %v2414_v40 = vmax.f32 %v2382_v2, 0.0  ;;  %v4121_v17 = vmul.f32 0.0078125, %v1622_v3 }
 0x2fb   : > { %v1718_v41 = vpop.xlane.xlu0 %1717 }
 0x2fc   : > { %v2070_v12 = vmul.f32 %v2710_v39, %v2069_v10  ;;  %v4105_v0 = vpack.c.bf16 %v2414_v40, %v2413_v25  ;;  %v1835_v4 = vmul.f32 %v4121_v17, %v4121_v17  ;;  %v1803_v23 = vmul.f32 0.0078125, %v1718_v41  ;;  %v1559_v10 = vpop.f32.mrf.mxu1 }
 0x2fd   : > { %v1866_v41 = vsub.f32 %v1802_v49, %v1834_v6  ;;  %v4147_v29 = vadd.f32 %v4052_v22, %v1559_v10 }
 0x2fe   : > { %1605 = vadd.xlane.f32.xlu1 %v4092_v34  ;;  %v2074_v57 = vsel %vm2073_vm10, %v2710_v39, %v2070_v12  ;;  %v1867_v56 = vsub.f32 %v1803_v23, %v1835_v4 }
 0x2ff   : > { %v4103_v19 = vmul.f32 %v2074_v57, %v1929_v14  ;;  %v4144_v14 = vadd.f32 %v4052_v22, %v3434_v61  ;;  %5027 = vst [vmem:[#allocation10_spill] sm:$0xff] %v4147_v29  ;;  %v1898_v3 = vmax.f32 %v1866_v41, 0.0 }
 0x300   : > { %1705 = vadd.xlane.f32.xlu0 %v1669_v46  ;;  %1607 = vadd.xlane.f32.xlu2 %v4098_v20  ;;  %v1899_v25 = vmax.f32 %v1867_v56, 0.0 }
 0x301   : > { %5026 = vst [vmem:[#allocation9_spill] sm:$0xff] %v4144_v14  ;;  %v4163_v23 = vadd.f32 1e-05, %v1898_v3  ;;  %v1666_v56 = vmul.f32 %v4144_v14, %v4144_v14 }
 0x302   : > { %v4157_v61 = vadd.f32 1e-05, %v1899_v25 }
 0x303   : > { %v1624_v36 = vpop.xlane.xlu0 %1623  ;;  %v1720_v35 = vpop.xlane.xlu1 %1719  ;;  %vm2081_vm6 = vweird.f32 %v4163_v23 }
 0x304   : > { %v4123_v39 = vmul.f32 0.0078125, %v1624_v36  ;;  %v1804_v24 = vmul.f32 0.0078125, %v1720_v35  ;;  %v4154_v36 = vadd.f32 %v4052_v22, %v3408_v31  ;;  %2711 = vrsqrt.f32 %v4157_v61 }
 0x305   : > { %vm2091_vm12 = vweird.f32 %v4157_v61 }
 0x306   : > { %1639 = vadd.xlane.f32.xlu1 %v4110_v48  ;;  %v1836_v55 = vmul.f32 %v4123_v39, %v4123_v39  ;;  %5028 = vst [vmem:[#allocation11_spill] sm:$0xff] %v4154_v36 }
 0x308   : > { %1739 = vadd.xlane.f32.xlu0 %v1686_v8  ;;  %1701 = vadd.xlane.f32.xlu2 %v1667_v59  ;;  %v1868_v2 = vsub.f32 %v1804_v24, %v1836_v55  ;;  %v1665_v55 = vmul.f32 %v4154_v36, %v4154_v36 }
 0x30a   : > { %v1900_v46 = vmax.f32 %v1868_v2, 0.0 }
 0x30c   : > { %v1626_v32 = vpop.xlane.xlu0 %1625 }
 0x30d   : > { %v4137_v43 = vmul.f32 0.0078125, %v1626_v32  ;;  %v1561_v32 = vpop.f32.mrf.mxu1 }
 0x30e   : > { %1733 = vadd.xlane.f32.xlu1 %v1683_v58  ;;  %v1722_v26 = vpop.xlane.xlu1 %1721  ;;  %v4161_v58 = vadd.f32 1e-05, %v1900_v46 }
 0x30f   : > { %v1837_v12 = vmul.f32 %v4137_v43, %v4137_v43  ;;  %v1805_v40 = vmul.f32 0.0078125, %v1722_v26  ;;  %v4176_v26 = vadd.f32 %v4052_v22, %v1561_v32 }
 0x310   : > { %1637 = vadd.xlane.f32.xlu0 %v4119_v15  ;;  %1735 = vadd.xlane.f32.xlu2 %v1684_v47  ;;  %2713 = vrsqrt.f32 %v4161_v58  ;;  %vm2101_vm15 = vweird.f32 %v4161_v58 }
 0x311   : > { %v1869_v57 = vsub.f32 %v1805_v40, %v1837_v12  ;;  %5029 = vst [vmem:[#allocation12_spill] sm:$0xff] %v4176_v26  ;;  %2715 = vrsqrt.f32 %v4163_v23  ;;  %v4184_v40 = vpop.eup %2711  ;;  %v1682_v25 = vmul.f32 %v4176_v26, %v4176_v26 }
 0x312   : > { %v2086_v3 = vmul.f32 %v4184_v40, %v4157_v61  ;;  %vm2092_vm11 = vweird.f32 %v4184_v40 }
 0x313   : > { %v1901_v4 = vmax.f32 %v1869_v57, 0.0  ;;  %vm4251_vm14 = vmor %vm2091_vm12, %vm2092_vm11 }
 0x314   : > { %v2087_v32 = vmul.f32 %v4184_v40, %v2086_v3 }
 0x315   : > { %v4173_v24 = vadd.f32 1e-05, %v1901_v4 }
 0x316   : > { %1603 = vadd.xlane.f32.xlu1 %v4144_v14  ;;  %v1724_v8 = vpop.xlane.xlu2 %1723  ;;  %v1628_v59 = vpop.xlane.xlu1 %1627 }
 0x317   : > { %v4159_v35 = vmul.f32 0.0078125, %v1628_v59  ;;  %v1806_v47 = vmul.f32 0.0078125, %v1724_v8  ;;  %2717 = vrsqrt.f32 %v4173_v24  ;;  %vm2111_vm1 = vweird.f32 %v4173_v24 }
 0x318   : > { %1703 = vadd.xlane.f32.xlu0 %v1668_v50  ;;  %1633 = vadd.xlane.f32.xlu2 %v4147_v29  ;;  %v4191_v50 = vpop.eup %2713 }
 0x319   : > { %v1838_v31 = vmul.f32 %v4159_v35, %v4159_v35  ;;  %v4193_v57 = vpop.eup %2715  ;;  %v2096_v59 = vmul.f32 %v4191_v50, %v4161_v58  ;;  %vm2102_vm13 = vweird.f32 %v4191_v50 }
 0x31a   : > { %vm4266_vm0 = vmor %vm2101_vm15, %vm2102_vm13  ;;  %vm2082_vm3 = vweird.f32 %v4193_v57 }
 0x31b   : > { %v1870_v6 = vsub.f32 %v1806_v47, %v1838_v31  ;;  %v2076_v47 = vmul.f32 %v4193_v57, %v4163_v23 }
 0x31d   : > { %v1902_v49 = vmax.f32 %v1870_v6, 0.0  ;;  %v4201_v4 = vpop.eup %2717 }
 0x31e   : > { %1697 = vadd.xlane.f32.xlu1 %v1665_v55  ;;  %vm2112_vm2 = vweird.f32 %v4201_v4 }
 0x31f   : > { %v4180_v2 = vadd.f32 1e-05, %v1902_v49  ;;  %vm4297_vm7 = vmor %vm2111_vm1, %vm2112_vm2 }
 0x320   : > { %1601 = vadd.xlane.f32.xlu0 %v4154_v36  ;;  %1699 = vadd.xlane.f32.xlu2 %v1666_v56 }
 0x321   : > { %v1630_v10 = vpop.xlane.xlu1 %1629  ;;  %2719 = vrsqrt.f32 %v4180_v2  ;;  %vm2121_vm9 = vweird.f32 %v4180_v2 }
 0x322   : > { %v4182_v12 = vmul.f32 0.0078125, %v1630_v10 }
 0x323   : > { %v1726_v41 = vpop.xlane.xlu2 %1725 }
 0x324   : > { %v1839_v22 = vmul.f32 %v4182_v12, %v4182_v12  ;;  %v1807_v46 = vmul.f32 0.0078125, %v1726_v41  ;;  %v2097_v41 = vmul.f32 %v4191_v50, %v2096_v59 }
 0x326   : > { %1731 = vadd.xlane.f32.xlu1 %v1682_v25  ;;  %v1871_v8 = vsub.f32 %v1807_v46, %v1839_v22  ;;  %v2106_v22 = vmul.f32 %v4201_v4, %v4173_v24  ;;  %v2077_v46 = vmul.f32 %v4193_v57, %v2076_v47  ;;  %v2098_v36 = vmul.f32 0.5, %v2097_v41 }
 0x327   : > { %v4210_v10 = vpop.eup %2719 }
 0x328   : > { %1635 = vadd.xlane.f32.xlu0 %v4176_v26  ;;  %v1903_v31 = vmax.f32 %v1871_v8, 0.0  ;;  %v2088_v8 = vmul.f32 0.5, %v2087_v32  ;;  %v2116_v59 = vmul.f32 %v4210_v10, %v4180_v2  ;;  %v2107_v14 = vmul.f32 %v4201_v4, %v2106_v22 }
 0x329   : > { %v4205_v55 = vpop.xlane.xlu1 %1743  ;;  %v2078_v15 = vmul.f32 0.5, %v2077_v46  ;;  %vm2122_vm4 = vweird.f32 %v4210_v10 }
 0x32a   : > { %v4208_v6 = vadd.f32 1e-05, %v1903_v31  ;;  %v1681_v31 = vmul.f32 %v4147_v29, %v4147_v29  ;;  %v2089_v48 = vsub.f32 1.5, %v2088_v8  ;;  %v2117_v20 = vmul.f32 %v4210_v10, %v2116_v59  ;;  %vm4313_vm11 = vmor %vm2121_vm9, %vm2122_vm4 }
 0x32b   : > { %v1728_v56 = vpop.xlane.xlu0 %1727  ;;  %v1632_v49 = vpop.xlane.xlu2 %1631  ;;  %v2099_v29 = vsub.f32 1.5, %v2098_v36  ;;  %v2108_v62 = vmul.f32 0.5, %v2107_v14 }
 0x32c   : > { %v4215_v25 = vmul.f32 0.0078125, %v1632_v49  ;;  %2721 = vrsqrt.f32 %v4208_v6  ;;  %v1808_v26 = vmul.f32 0.0078125, %v1728_v56  ;;  %v4238_v46 = vmul.f32 %v4184_v40, %v2089_v48 }
 0x32d   : > { %v2118_v14 = vmul.f32 0.5, %v2117_v20  ;;  %v1932_v20 = vsub.f32 %v3945_v7, %v4123_v39  ;;  %vm2131_vm8 = vweird.f32 %v4208_v6 }
 0x32e   : > { %v1840_v3 = vmul.f32 %v4215_v25, %v4215_v25  ;;  %v5043_v23 = vsel %vm4251_vm14, %v4184_v40, %v4238_v46 }
 0x32f   : > { %v2119_v7 = vsub.f32 1.5, %v2118_v14 }
 0x330   : > { %v1872_v49 = vsub.f32 %v1808_v26, %v1840_v3  ;;  %1729 = vadd.xlane.f32.xlu0 %v1681_v31  ;;  %v2079_v26 = vsub.f32 1.5, %v2078_v15  ;;  %v2100_v15 = vmul.f32 %v4191_v50, %v2099_v29 }
 0x331   : > { %v4226_v47 = vpop.xlane.xlu1 %1745 }
 0x332   : > { %v1904_v32 = vmax.f32 %v1872_v49, 0.0  ;;  %v4228_v56 = vpop.eup %2721  ;;  %v4249_v31 = vmul.f32 %v4193_v57, %v2079_v26 }
 0x333   : > { %v1742_v34 = vpop.xlane.xlu0 %1741  ;;  %v1646_v16 = vpop.xlane.xlu2 %1645  ;;  %v2126_v41 = vmul.f32 %v4228_v56, %v4208_v6  ;;  %vm2132_vm5 = vweird.f32 %v4228_v56 }
 0x334   : > { %v4233_v42 = vadd.f32 1e-05, %v1904_v32  ;;  %v4235_v22 = vmul.f32 0.0078125, %v1646_v16  ;;  %v1815_v36 = vmul.f32 0.0078125, %v1742_v34  ;;  %v2109_v16 = vsub.f32 1.5, %v2108_v62  ;;  %vm4307_vm10 = vmor %vm2131_vm8, %vm2132_vm5 }
 0x335   : > { %v2127_v8 = vmul.f32 %v4228_v56, %v2126_v41  ;;  %v1816_v32 = vmul.f32 0.0078125, %v4205_v55 }
 0x336   : > { %2723 = vrsqrt.f32 %v4233_v42  ;;  %v1847_v3 = vmul.f32 %v4235_v22, %v4235_v22  ;;  %vm2141_vm13 = vweird.f32 %v4233_v42 }
 0x337   : > { %v2128_v48 = vmul.f32 0.5, %v2127_v8 }
 0x338   : > { %v1879_v34 = vsub.f32 %v1815_v36, %v1847_v3  ;;  %v2110_v36 = vmul.f32 %v4201_v4, %v2109_v16 }
 0x339   : > { %v1652_v61 = vpop.xlane.xlu1 %1651  ;;  %v2129_v49 = vsub.f32 1.5, %v2128_v48 }
 0x33a   : > { %v4260_v62 = vmul.f32 0.0078125, %v1652_v61  ;;  %v1911_v39 = vmax.f32 %v1879_v34, 0.0  ;;  %v2104_v61 = vsel %vm4266_vm0, %v4191_v50, %v2100_v15  ;;  %v2120_v50 = vmul.f32 %v4210_v10, %v2119_v7  ;;  %vm4356_vm0 = vmor %vm2081_vm6, %vm2082_vm3 }
 0x33b   : > { %v1648_v58 = vpop.xlane.xlu0 %1647  ;;  %v1748_v26 = vpop.xlane.xlu2 %1747  ;;  %v2130_v16 = vmul.f32 %v4228_v56, %v2129_v49  ;;  %v1934_v49 = vsub.f32 %v3957_v1, %v4159_v35  ;;  %v2114_v2 = vsel %vm4297_vm7, %v4201_v4, %v2110_v36 }
 0x33c   : > { %v2724_v8 = vpop.eup %2723  ;;  %v1850_v3 = vmul.f32 %v4260_v62, %v4260_v62  ;;  %v4275_v48 = vmul.f32 0.0078125, %v1648_v58  ;;  %v4282_v14 = vadd.f32 1e-05, %v1911_v39  ;;  %v1818_v34 = vmul.f32 0.0078125, %v1748_v26 }
 0x33d   : > { %v2136_v29 = vmul.f32 %v2724_v8, %v4233_v42  ;;  %v1935_v39 = vsub.f32 %v3963_v63, %v4182_v12  ;;  %v2134_v63 = vsel %vm4307_vm10, %v4228_v56, %v2130_v16  ;;  %v2124_v12 = vsel %vm4313_vm11, %v4210_v10, %v2120_v50 }
 0x33e   : > { %v1848_v58 = vmul.f32 %v4275_v48, %v4275_v48  ;;  %2725 = vrsqrt.f32 %v4282_v14  ;;  %v1882_v55 = vsub.f32 %v1818_v34, %v1850_v3  ;;  %vm2142_vm12 = vweird.f32 %v2724_v8 }
 0x33f   : > { %v2137_v15 = vmul.f32 %v2724_v8, %v2136_v29  ;;  %v2316_v29 = vmul.f32 %v2104_v61, %v1932_v20  ;;  %v2319_v50 = vmul.f32 %v2134_v63, %v1935_v39  ;;  %vm2143_vm15 = vmor %vm2141_vm13, %vm2142_vm12  ;;  %v5040_v42 = vsub.f32 %v3951_v9, %v4137_v43 }
 0x340   : > { %v1880_v7 = vsub.f32 %v1816_v32, %v1848_v58  ;;  %v1914_v3 = vmax.f32 %v1882_v55, 0.0  ;;  %v1936_v55 = vsub.f32 %v3972_v13, %v4215_v25  ;;  %v1931_v39 = vsub.f32 %v3939_v52, %v4121_v17 }
 0x341   : > { %v2138_v24 = vmul.f32 0.5, %v2137_v15  ;;  %v1654_v34 = vpop.xlane.xlu1 %1653  ;;  %v2318_v13 = vmul.f32 %v2124_v12, %v1934_v49  ;;  %v2354_v52 = vmul.f32 %v4072_v30, %v2319_v50  ;;  %v2084_v17 = vsel %vm4356_vm0, %v4193_v57, %v4249_v31 }
 0x342   : > { %v1912_v35 = vmax.f32 %v1880_v7, 0.0  ;;  %v4317_v6 = vmul.f32 0.0078125, %v1654_v34  ;;  %v4328_v32 = vadd.f32 1e-05, %v1914_v3  ;;  %v2317_v7 = vmul.f32 %v2114_v2, %v5040_v42 }
 0x343   : > { %v2139_v20 = vsub.f32 1.5, %v2138_v24  ;;  %v1650_v61 = vpop.xlane.xlu0 %1649  ;;  %v1750_v58 = vpop.xlane.xlu2 %1749  ;;  %v1817_v24 = vmul.f32 0.0078125, %v4226_v47  ;;  %v4372_v63 = vmul.f32 %v5043_v23, %v1931_v39  ;;  %v4375_v2 = vmul.f32 %v4072_v30, %v2316_v29 }
 0x344   : > { %v4331_v15 = vadd.f32 1e-05, %v1912_v35  ;;  %v1851_v56 = vmul.f32 %v4317_v6, %v4317_v6  ;;  %v4335_v16 = vmul.f32 0.0078125, %v1650_v61  ;;  %v2726_v4 = vpop.eup %2725  ;;  %2727 = vrsqrt.f32 %v4328_v32 }
 0x345   : > { %v2140_v36 = vmul.f32 %v2724_v8, %v2139_v20  ;;  %v1819_v10 = vmul.f32 0.0078125, %v1750_v58  ;;  %v2206_v41 = vmul.f32 %v2726_v4, %v4282_v14  ;;  %v1930_v35 = vsub.f32 %v3931_v21, %v4125_v18 }
 0x346   : > { %2729 = vrsqrt.f32 %v4331_v15  ;;  %v1849_v3 = vmul.f32 %v4335_v16, %v4335_v16  ;;  %vm2212_vm1 = vweird.f32 %v2726_v4  ;;  %v2353_v46 = vmul.f32 %v4072_v30, %v2318_v13 }
 0x347   : > { %v2144_v26 = vsel %vm2143_vm15, %v2724_v8, %v2140_v36  ;;  %v1883_v34 = vsub.f32 %v1819_v10, %v1851_v56  ;;  %v2207_v1 = vmul.f32 %v2726_v4, %v2206_v41  ;;  %v2352_v10 = vmul.f32 %v4072_v30, %v2317_v7 }
 0x348   : > { %v2320_v25 = vmul.f32 %v2144_v26, %v1936_v55  ;;  %v1881_v43 = vsub.f32 %v1817_v24, %v1849_v3  ;;  %v2389_v41 = vadd.f32 %v4081_v54, %v2354_v52  ;;  %vm2211_vm14 = vweird.f32 %v4282_v14 }
 0x349   : > { %v1915_v47 = vmax.f32 %v1883_v34, 0.0  ;;  %v4360_v8 = vpop.xlane.xlu1 %1755  ;;  %v2208_v49 = vmul.f32 0.5, %v2207_v1  ;;  %v1943_v24 = vsub.f32 %v3983_v28, %v4235_v22  ;;  %vm2213_vm2 = vmor %vm2211_vm14, %vm2212_vm1  ;;  %v2388_v23 = vadd.f32 %v4081_v54, %v2353_v46 }
 0x34a   : > { %v4377_v12 = vpop.eup %2727  ;;  %v1913_v20 = vmax.f32 %v1881_v43, 0.0  ;;  %v2355_v36 = vmul.f32 %v4072_v30, %v2320_v25  ;;  %v2421_v52 = vmax.f32 %v2389_v41, 0.0  ;;  %vm2241_vm5 = vweird.f32 %v4328_v32 }
 0x34b   : > { %v4379_v61 = vadd.f32 1e-05, %v1915_v47  ;;  %v1752_v58 = vpop.xlane.xlu0 %1751  ;;  %v1656_v56 = vpop.xlane.xlu2 %1655  ;;  %v2209_v50 = vsub.f32 1.5, %v2208_v49  ;;  %v2236_v40 = vmul.f32 %v4377_v12, %v4328_v32  ;;  %vm2242_vm3 = vweird.f32 %v4377_v12 }
 0x34c   : > { %v2730_v59 = vpop.eup %2729  ;;  %v4387_v55 = vadd.f32 1e-05, %v1913_v20  ;;  %v4393_v26 = vmul.f32 0.0078125, %v1656_v56  ;;  %v2390_v34 = vadd.f32 %v4081_v54, %v2355_v36  ;;  %v1820_v25 = vmul.f32 0.0078125, %v1752_v58  ;;  %vm4421_vm7 = vmor %vm2241_vm5, %vm2242_vm3 }
 0x34d   : > { %v2216_v29 = vmul.f32 %v2730_v59, %v4331_v15  ;;  %2731 = vrsqrt.f32 %v4379_v61  ;;  %v2210_v42 = vmul.f32 %v2726_v4, %v2209_v50  ;;  %v2237_v7 = vmul.f32 %v4377_v12, %v2236_v40 }
 0x34e   : > { %2733 = vrsqrt.f32 %v4387_v55  ;;  %v1852_v1 = vmul.f32 %v4393_v26, %v4393_v26  ;;  %v2422_v49 = vmax.f32 %v2390_v34, 0.0  ;;  %vm2222_vm4 = vweird.f32 %v2730_v59 }
 0x34f   : > { %v2217_v3 = vmul.f32 %v2730_v59, %v2216_v29  ;;  %v2214_v39 = vsel %vm2213_vm2, %v2726_v4, %v2210_v42  ;;  %v2238_v13 = vmul.f32 0.5, %v2237_v7  ;;  %v2387_v50 = vadd.f32 %v4081_v54, %v2352_v10 }
 0x350   : > { %v4401_v14 = vmul.f32 %v2214_v39, %v1943_v24  ;;  %v1884_v22 = vsub.f32 %v1820_v25, %v1852_v1  ;;  %v2447_v58 = vpack.c.bf16 %v2422_v49, %v2421_v52  ;;  %v1946_v40 = vsub.f32 %v3991_v45, %v4260_v62 }
 0x351   : > { %v2218_v43 = vmul.f32 0.5, %v2217_v3  ;;  %v4403_v47 = vpop.xlane.xlu1 %1757  ;;  %v2239_v28 = vsub.f32 1.5, %v2238_v13  ;;  %v1944_v46 = vsub.f32 %v3969_v44, %v4275_v48  ;;  %vm2221_vm6 = vweird.f32 %v4331_v15 }
 0x352   : > { %v1916_v41 = vmax.f32 %v1884_v22, 0.0  ;;  %2462 = vmatpush.bf16.xpose.msrb.mxu2 %v2447_v58  ;;  %vm2223_vm8 = vmor %vm2221_vm6, %vm2222_vm4  ;;  %v2420_v32 = vmax.f32 %v2388_v23, 0.0  ;;  %v2314_v39 = vmul.f32 %v2084_v17, %v1930_v35  ;;  %v4454_v21 = vmul.f32 0.0078125, %v4009_v38 }
 0x353   : > { %v4407_v20 = vpop.eup %2731  ;;  %v2219_v4 = vsub.f32 1.5, %v2218_v43  ;;  %v1754_v56 = vpop.xlane.xlu0 %1753  ;;  %v2240_v29 = vmul.f32 %v4377_v12, %v2239_v28  ;;  %v2419_v43 = vmax.f32 %v2387_v50, 0.0  ;;  %v2386_v57 = vadd.f32 %v4081_v54, %v4375_v2 }
 0x354   : > { %v1658_v36 = vpop.xlane.xlu2 %1657  ;;  %v4414_v42 = vpop.eup %2733  ;;  %v2246_v44 = vmul.f32 %v4407_v20, %v4379_v61  ;;  %v4432_v48 = vadd.f32 1e-05, %v1916_v41  ;;  %v1821_v24 = vmul.f32 0.0078125, %v1754_v56  ;;  %v2349_v23 = vmul.f32 %v4072_v30, %v2314_v39 }
 0x355   : > { %v2220_v7 = vmul.f32 %v2730_v59, %v2219_v4  ;;  %v4425_v45 = vmul.f32 0.0078125, %v1658_v36  ;;  %v2226_v62 = vmul.f32 %v4414_v42, %v4387_v55  ;;  %v2244_v34 = vsel %vm4421_vm7, %v4377_v12, %v2240_v29 }
 0x356   : > { %2735 = vrsqrt.f32 %v4432_v48  ;;  %v2350_v12 = vmul.f32 %v4072_v30, %v4372_v63  ;;  %v4451_v52 = vmul.f32 %v2244_v34, %v1946_v40  ;;  %v2247_v31 = vmul.f32 %v4407_v20, %v2246_v44 }
 0x357   : > { %v2224_v15 = vsel %vm2223_vm8, %v2730_v59, %v2220_v7  ;;  %v1853_v3 = vmul.f32 %v4425_v45, %v4425_v45  ;;  %v2227_v59 = vmul.f32 %v4414_v42, %v2226_v62  ;;  %v2446_v17 = vpack.c.bf16 %v2420_v32, %v2419_v43 }
 0x358   : > { %v2328_v13 = vmul.f32 %v2224_v15, %v1944_v46  ;;  %v2348_v63 = vmul.f32 %v4072_v30, %v4103_v19  ;;  %vm2232_vm9 = vweird.f32 %v4414_v42  ;;  %v2385_v56 = vadd.f32 %v4081_v54, %v2350_v12 }
 0x359   : > { %v1885_v25 = vsub.f32 %v1821_v24, %v1853_v3  ;;  %v1664_v1 = vpop.xlane.xlu1 %1663  ;;  %v2228_v18 = vmul.f32 0.5, %v2227_v59  ;;  %v1945_v19 = vsub.f32 %v3979_v37, %v4335_v16  ;;  %vm2231_vm10 = vweird.f32 %v4387_v55 }
 0x35a   : > { %v4456_v9 = vmul.f32 0.0078125, %v1664_v1  ;;  %2463 = vmatpush.bf16.xpose.msrb.mxu2 %v2446_v17  ;;  %v2418_v40 = vmax.f32 %v2386_v57, 0.0  ;;  %vm2233_vm11 = vmor %vm2231_vm10, %vm2232_vm9  ;;  %v2248_v29 = vmul.f32 0.5, %v2247_v31  ;;  %v1822_v41 = vmul.f32 0.0078125, %v4360_v8 }
 0x35b   : > { %v1917_v35 = vmax.f32 %v1885_v25, 0.0  ;;  %v1660_v49 = vpop.xlane.xlu0 %1659  ;;  %v2229_v22 = vsub.f32 1.5, %v2228_v18  ;;  %v2363_v7 = vmul.f32 %v4072_v30, %v2328_v13  ;;  %v2417_v55 = vmax.f32 %v2385_v56, 0.0 }
 0x35c   : > { %v1760_v28 = vpop.xlane.xlu2 %1759  ;;  %v1856_v38 = vmul.f32 %v4456_v9, %v4456_v9  ;;  %v4469_v2 = vmul.f32 0.0078125, %v1660_v49  ;;  %v4472_v36 = vpop.eup %2735  ;;  %v2384_v44 = vadd.f32 %v4081_v54, %v2349_v23  ;;  %v2362_v8 = vmul.f32 %v4072_v30, %v4401_v14 }
 0x35d   : > { %v4467_v4 = vadd.f32 1e-05, %v1917_v35  ;;  %v1824_v58 = vmul.f32 0.0078125, %v1760_v28  ;;  %v2230_v50 = vmul.f32 %v4414_v42, %v2229_v22  ;;  %v2256_v46 = vmul.f32 %v4472_v36, %v4432_v48 }
 0x35e   : > { %v1854_v37 = vmul.f32 %v4469_v2, %v4469_v2  ;;  %v2445_v34 = vpack.c.bf16 %v2418_v40, %v2417_v55  ;;  %v2398_v59 = vadd.f32 %v4081_v54, %v2363_v7  ;;  %v2249_v25 = vsub.f32 1.5, %v2248_v29 }
 0x35f   : > { %v2234_v10 = vsel %vm2233_vm11, %v4414_v42, %v2230_v50  ;;  %2737 = vrsqrt.f32 %v4467_v4  ;;  %v1888_v16 = vsub.f32 %v1824_v58, %v1856_v38  ;;  %v2257_v15 = vmul.f32 %v4472_v36, %v2256_v46 }
 0x360   : > { %v2329_v32 = vmul.f32 %v2234_v10, %v1945_v19  ;;  %v1886_v24 = vsub.f32 %v1822_v41, %v1854_v37  ;;  %v4492_v42 = vmul.f32 %v4454_v21, %v4454_v21  ;;  %v2383_v14 = vadd.f32 %v4081_v54, %v2348_v63 }
 0x361   : > { %v1642_v62 = vpop.xlane.xlu1 %1641  ;;  %v1920_v3 = vmax.f32 %v1888_v16, 0.0  ;;  %v1925_v12 = vsub.f32 %v3569_v11, %v4454_v21  ;;  %v2416_v57 = vmax.f32 %v2384_v44, 0.0  ;;  %v2397_v31 = vadd.f32 %v4081_v54, %v2362_v8 }
 0x362   : > { %v1918_v1 = vmax.f32 %v1886_v24, 0.0  ;;  %2464 = vmatpush.bf16.xpose.msrb.mxu2 %v2445_v34  ;;  %v2258_v17 = vmul.f32 0.5, %v2257_v15  ;;  %v2364_v28 = vmul.f32 %v4072_v30, %v2329_v32  ;;  %v1823_v63 = vmul.f32 0.0078125, %v4403_v47 }
 0x363   : > { %v1662_v39 = vpop.xlane.xlu0 %1661  ;;  %v4497_v43 = vadd.f32 1e-05, %v1920_v3  ;;  %v2365_v38 = vmul.f32 %v4072_v30, %v4451_v52  ;;  %v2430_v23 = vmax.f32 %v2398_v59, 0.0  ;;  %v2250_v58 = vmul.f32 %v4407_v20, %v2249_v25 }
 0x364   : > { %v4494_v13 = vpop.xlane.xlu2 %1643  ;;  %v4502_v18 = vmul.f32 0.0078125, %v1662_v39  ;;  %v4507_v49 = vadd.f32 1e-05, %v1918_v1  ;;  %vm2252_vm12 = vweird.f32 %v4407_v20  ;;  %v2415_v56 = vmax.f32 %v2383_v14, 0.0 }
 0x365   : > { %v4505_v35 = vpop.eup %2737  ;;  %2739 = vrsqrt.f32 %v4497_v43  ;;  %v4521_v50 = vmul.f32 0.0078125, %v1642_v62  ;;  %v2429_v29 = vmax.f32 %v2397_v31, 0.0  ;;  %vm2251_vm13 = vweird.f32 %v4379_v61 }
 0x366   : > { %v1855_v22 = vmul.f32 %v4502_v18, %v4502_v18  ;;  %2741 = vrsqrt.f32 %v4507_v49  ;;  %v2266_v19 = vmul.f32 %v4505_v35, %v4467_v4  ;;  %v2259_v41 = vsub.f32 1.5, %v2258_v17  ;;  %vm4527_vm15 = vmor %vm2251_vm13, %vm2252_vm12 }
 0x367   : > { %v2444_v52 = vpack.c.bf16 %v2416_v57, %v2415_v56  ;;  %v2399_v46 = vadd.f32 %v4081_v54, %v2364_v28  ;;  %v1947_v7 = vsub.f32 %v3998_v5, %v4317_v6  ;;  %v2400_v55 = vadd.f32 %v4081_v54, %v2365_v38 }
 0x368   : > { %v1887_v47 = vsub.f32 %v1823_v63, %v1855_v22  ;;  %v4532_v44 = vpack.c.bf16 %v2430_v23, %v2429_v29  ;;  %vm2262_vm0 = vweird.f32 %v4472_v36  ;;  %v2254_v5 = vsel %vm4527_vm15, %v4407_v20, %v2250_v58 }
 0x369   : > { %v1708_v40 = vpop.xlane.xlu1 %1707  ;;  %v2267_v6 = vmul.f32 %v4505_v35, %v2266_v19  ;;  %v1845_v24 = vmul.f32 %v4521_v50, %v4521_v50  ;;  %v2260_v39 = vmul.f32 %v4472_v36, %v2259_v41  ;;  %v2431_v20 = vmax.f32 %v2399_v46, 0.0 }
 0x36a   : > { %v1919_v37 = vmax.f32 %v1887_v47, 0.0  ;;  %2465 = vmatpush.bf16.xpose.msrb.mxu2 %v2444_v52  ;;  %v1798_v59 = vmul.f32 0.0078125, %v1708_v40  ;;  %v1948_v31 = vsub.f32 %v4012_v60, %v4393_v26  ;;  %v2331_v28 = vmul.f32 %v2254_v5, %v1947_v7 }
 0x36b   : > { %v1612_v16 = vpop.xlane.xlu0 %1611  ;;  %v4534_v8 = vpop.eup %2739  ;;  %v2432_v63 = vmax.f32 %v2400_v55, 0.0  ;;  %vm2261_vm1 = vweird.f32 %v4432_v48  ;;  %v2268_v22 = vmul.f32 0.5, %v2267_v6  ;;  %v1949_v19 = vsub.f32 %v4025_v33, %v4425_v45 }
 0x36c   : > { %v1738_v62 = vpop.xlane.xlu2 %1737  ;;  %v4537_v61 = vmul.f32 0.0078125, %v1612_v16  ;;  %v2296_v15 = vmul.f32 %v4534_v8, %v4497_v43  ;;  %v4547_v3 = vadd.f32 1e-05, %v1919_v37  ;;  %v4549_v34 = vpop.eup %2741  ;;  %vm4564_vm14 = vmor %vm2261_vm1, %vm2262_vm0  ;;  %v1952_v60 = vsub.f32 %v4037_v27, %v4456_v9 }
 0x36d   : > { %v1813_v32 = vmul.f32 0.0078125, %v1738_v62  ;;  %v2276_v1 = vmul.f32 %v4549_v34, %v4507_v49  ;;  %v4572_v47 = vpack.c.bf16 %v2432_v63, %v2431_v20  ;;  %v2264_v48 = vsel %vm4564_vm14, %v4472_v36, %v2260_v39  ;;  %v5052_v39 = vld [vmem:[#allocation2_spill] sm:$0xff] }
 0x36e   : > { %v1830_v25 = vmul.f32 %v4537_v61, %v4537_v61  ;;  %v2297_v14 = vmul.f32 %v4534_v8, %v2296_v15  ;;  %2743 = vrsqrt.f32 %v4547_v3  ;;  %vm2271_vm2 = vweird.f32 %v4467_v4 }
 0x36f   : > { %v1877_v57 = vsub.f32 %v1813_v32, %v1845_v24  ;;  %v2277_v38 = vmul.f32 %v4549_v34, %v2276_v1  ;;  %v1950_v7 = vsub.f32 %v4004_v51, %v4469_v2  ;;  %v1941_v27 = vsub.f32 %v4056_v53, %v4521_v50 }
 0x370   : > { %v1862_v17 = vsub.f32 %v1798_v59, %v1830_v25  ;;  %v2298_v23 = vmul.f32 0.5, %v2297_v14  ;;  %v2366_v10 = vmul.f32 %v4072_v30, %v2331_v28  ;;  %v2269_v36 = vsub.f32 1.5, %v2268_v22 }
 0x371   : > { %v1606_v58 = vpop.xlane.xlu1 %1605  ;;  %v2278_v40 = vmul.f32 0.5, %v2277_v38  ;;  %v1909_v41 = vmax.f32 %v1877_v57, 0.0  ;;  %vm2302_vm3 = vweird.f32 %v4534_v8  ;;  %v2332_v55 = vmul.f32 %v2264_v48, %v1948_v31 }
 0x372   : > { %v1894_v26 = vmax.f32 %v1862_v17, 0.0  ;;  %v2299_v29 = vsub.f32 1.5, %v2298_v23  ;;  %2466 = vmatpush.bf16.xpose.msrb.mxu2 %v4105_v0  ;;  %v4592_v5 = vmul.f32 0.0078125, %v4494_v13  ;;  %vm2301_vm4 = vweird.f32 %v4497_v43 }
 0x373   : > { %v1706_v52 = vpop.xlane.xlu0 %1705  ;;  %v2279_v6 = vsub.f32 1.5, %v2278_v40  ;;  %v4596_v15 = vadd.f32 1e-05, %v1909_v41  ;;  %vm2272_vm5 = vweird.f32 %v4505_v35  ;;  %vm4600_vm6 = vmor %vm2301_vm4, %vm2302_vm3  ;;  %v1951_v59 = vsub.f32 %v5052_v39, %v4502_v18  ;;  %v5057_v40 = vld [vmem:[#allocation3_spill] sm:$0xff] }
 0x374   : > { %v4578_v46 = vpop.xlane.xlu2 %1607  ;;  %v4584_v9 = vadd.f32 1e-05, %v1894_v26  ;;  %v2744_v37 = vpop.eup %2743  ;;  %v2300_v16 = vmul.f32 %v4534_v8, %v2299_v29  ;;  %v1797_v62 = vmul.f32 0.0078125, %v1706_v52  ;;  %v4607_v25 = vadd.f32 %v4081_v54, %v2366_v10  ;;  %vm4630_vm9 = vmor %vm2271_vm2, %vm2272_vm5 }
 0x375   : > { %v2286_v32 = vmul.f32 %v2744_v37, %v4547_v3  ;;  %v2270_v20 = vmul.f32 %v4505_v35, %v2269_v36  ;;  %vm2281_vm7 = vweird.f32 %v4507_v49  ;;  %v1846_v57 = vmul.f32 %v4592_v5, %v4592_v5 }
 0x376   : > { %2745 = vrsqrt.f32 %v4584_v9  ;;  %v1861_v24 = vsub.f32 %v1797_v62, %v4492_v42  ;;  %v2304_v42 = vsel %vm4600_vm6, %v4534_v8, %v2300_v16  ;;  %v4616_v31 = vmul.f32 0.0078125, %v1606_v58  ;;  %v4661_v16 = vld [vmem:[%s4964_s7] ss:$0 sm:$0xff] }
 0x377   : > { %v2287_v13 = vmul.f32 %v2744_v37, %v2286_v32  ;;  %v2367_v18 = vmul.f32 %v4072_v30, %v2332_v55  ;;  %v2280_v54 = vmul.f32 %v4549_v34, %v2279_v6  ;;  %vm2282_vm8 = vweird.f32 %v4549_v34  ;;  %v5058_v6 = vld [vmem:[#allocation4_spill] sm:$0xff] }
 0x378   : > { %v1893_v43 = vmax.f32 %v1861_v24, 0.0  ;;  %2747 = vrsqrt.f32 %v4596_v15  ;;  %vm2292_vm10 = vweird.f32 %v2744_v37  ;;  %v2336_v23 = vmul.f32 %v2304_v42, %v1952_v60  ;;  %vm4645_vm12 = vmor %vm2281_vm7, %vm2282_vm8 }
 0x379   : > { %v1640_v1 = vpop.xlane.xlu1 %1639  ;;  %v2288_v14 = vmul.f32 0.5, %v2287_v13  ;;  %v2274_v58 = vsel %vm4630_vm9, %v4505_v35, %v2270_v20  ;;  %vm2291_vm11 = vweird.f32 %v4547_v3  ;;  %v1827_v26 = vmul.f32 %v4616_v31, %v4616_v31 }
 0x37a   : > { %v4622_v17 = vadd.f32 1e-05, %v1893_v43  ;;  %v2284_v3 = vsel %vm4645_vm12, %v4549_v34, %v2280_v54  ;;  %vm2293_vm13 = vmor %vm2291_vm11, %vm2292_vm10  ;;  %v1942_v29 = vsub.f32 %v5057_v40, %v4592_v5  ;;  %v2433_v41 = vmax.f32 %v4607_v25, 0.0  ;;  %v4678_v43 = vld [vmem:[%s4965_s8] ss:$0 sm:$0xff] }
 0x37b   : > { %v1740_v28 = vpop.xlane.xlu0 %1739  ;;  %v2289_v30 = vsub.f32 1.5, %v2288_v14  ;;  %v2371_v62 = vmul.f32 %v4661_v16, %v2336_v23  ;;  %v2333_v34 = vmul.f32 %v2274_v58, %v1949_v19  ;;  %v1926_v24 = vsub.f32 %v5058_v6, %v4537_v61 }
 0x37c   : > { %v1702_v63 = vpop.xlane.xlu2 %1701  ;;  %v4624_v22 = vpop.eup %2745  ;;  %v1814_v38 = vmul.f32 0.0078125, %v1740_v28  ;;  %2749 = vrsqrt.f32 %v4622_v17  ;;  %v4671_v39 = vmul.f32 0.0078125, %v1640_v1  ;;  %v4681_v42 = vadd.f32 %v4678_v43, %v2367_v18 }
 0x37d   : > { %v2036_v56 = vmul.f32 %v4624_v22, %v4584_v9  ;;  %v2290_v60 = vmul.f32 %v2744_v37, %v2289_v30  ;;  %v1795_v48 = vmul.f32 0.0078125, %v1702_v63  ;;  %v2334_v45 = vmul.f32 %v2284_v3, %v1950_v7 }
 0x37e   : > { %v1878_v35 = vsub.f32 %v1814_v38, %v1846_v57  ;;  %v4664_v55 = vpop.eup %2747  ;;  %vm2041_vm15 = vweird.f32 %v4584_v9  ;;  %vm2042_vm0 = vweird.f32 %v4624_v22  ;;  %v2406_v57 = vadd.f32 %v4678_v43, %v2371_v62 }
 0x37f   : > { %v2037_v49 = vmul.f32 %v4624_v22, %v2036_v56  ;;  %v2294_v52 = vsel %vm2293_vm13, %v2744_v37, %v2290_v60  ;;  %v1859_v36 = vsub.f32 %v1795_v48, %v1827_v26  ;;  %v2186_v54 = vmul.f32 %v4664_v55, %v4596_v15  ;;  %vm4714_vm1 = vmor %vm2041_vm15, %vm2042_vm0 }
 0x380   : > { %v1910_v10 = vmax.f32 %v1878_v35, 0.0  ;;  %v2335_v32 = vmul.f32 %v2294_v52, %v1951_v59  ;;  %v1844_v63 = vmul.f32 %v4671_v39, %v4671_v39  ;;  %v2369_v23 = vmul.f32 %v4661_v16, %v2334_v45 }
 0x381   : > { %v2038_v37 = vmul.f32 0.5, %v2037_v49  ;;  %v1734_v0 = vpop.xlane.xlu1 %1733  ;;  %v1891_v20 = vmax.f32 %v1859_v36, 0.0  ;;  %v4719_v4 = vmul.f32 0.0078125, %v4578_v46  ;;  %v2368_v26 = vmul.f32 %v4661_v16, %v2333_v34 }
 0x382   : > { %v4673_v13 = vadd.f32 1e-05, %v1910_v10  ;;  %v4683_v33 = vpop.eup %2749  ;;  %v2370_v1 = vmul.f32 %v4661_v16, %v2335_v32  ;;  %v1811_v30 = vmul.f32 0.0078125, %v1734_v0  ;;  %v2438_v52 = vmax.f32 %v2406_v57, 0.0 }
 0x383   : > { %v2039_v61 = vsub.f32 1.5, %v2038_v37  ;;  %v1638_v19 = vpop.xlane.xlu0 %1637  ;;  %v2026_v14 = vmul.f32 %v4683_v33, %v4622_v17  ;;  %v4696_v51 = vadd.f32 1e-05, %v1891_v20  ;;  %v2187_v10 = vmul.f32 %v4664_v55, %v2186_v54 }
 0x384   : > { %v1736_v59 = vpop.xlane.xlu2 %1735  ;;  %2751 = vrsqrt.f32 %v4673_v13  ;;  %v4698_v2 = vmul.f32 0.0078125, %v1638_v19  ;;  %v2405_v8 = vadd.f32 %v4678_v43, %v2370_v1  ;;  %v2434_v46 = vmax.f32 %v4681_v42, 0.0 }
 0x385   : > { %v2040_v18 = vmul.f32 %v4624_v22, %v2039_v61  ;;  %v1812_v7 = vmul.f32 0.0078125, %v1736_v59  ;;  %v2027_v28 = vmul.f32 %v4683_v33, %v2026_v14  ;;  %2753 = vrsqrt.f32 %v4696_v51 }
 0x386   : > { %v1843_v38 = vmul.f32 %v4698_v2, %v4698_v2  ;;  %v2437_v49 = vmax.f32 %v2405_v8, 0.0  ;;  %vm2032_vm14 = vweird.f32 %v4683_v33  ;;  %v1828_v42 = vmul.f32 %v4719_v4, %v4719_v4 }
 0x387   : > { %v2028_v56 = vmul.f32 0.5, %v2027_v28  ;;  %v1876_v60 = vsub.f32 %v1812_v7, %v1844_v63  ;;  %v2044_v35 = vsel %vm4714_vm1, %v4624_v22, %v2040_v18  ;;  %v2404_v22 = vadd.f32 %v4678_v43, %v2369_v23  ;;  %v5061_v28 = vld [vmem:[#allocation5_spill] sm:$0xff] }
 0x388   : > { %v1875_v48 = vsub.f32 %v1811_v30, %v1843_v38  ;;  %v2455_v6 = vpack.c.bf16 %v2438_v52, %v2437_v49  ;;  %v2310_v20 = vmul.f32 %v2044_v35, %v1926_v24  ;;  %v2403_v14 = vadd.f32 %v4678_v43, %v2368_v26 }
 0x389   : > { %v1604_v3 = vpop.xlane.xlu1 %1603  ;;  %v2029_v36 = vsub.f32 1.5, %v2028_v56  ;;  %v1908_v62 = vmax.f32 %v1876_v60, 0.0  ;;  %vm2031_vm2 = vweird.f32 %v4622_v17  ;;  %v2188_v18 = vmul.f32 0.5, %v2187_v10  ;;  %v5062_v60 = vld [vmem:[#allocation6_spill] sm:$0xff] }
 0x38a   : > { %v4725_v9 = vpop.eup %2751  ;;  %v1907_v34 = vmax.f32 %v1875_v48, 0.0  ;;  %2475 = vmatpush.bf16.xpose.msrb.mxu3 %v2455_v6  ;;  %vm2033_vm3 = vmor %vm2031_vm2, %vm2032_vm14  ;;  %v2436_v54 = vmax.f32 %v2404_v22, 0.0  ;;  %v1923_v63 = vsub.f32 %v5061_v28, %v4616_v31  ;;  %v2345_v30 = vmul.f32 %v4661_v16, %v2310_v20 }
 0x38b   : > { %v2196_v32 = vmul.f32 %v4725_v9, %v4673_v13  ;;  %v1704_v37 = vpop.xlane.xlu0 %1703  ;;  %v2030_v45 = vmul.f32 %v4683_v33, %v2029_v36  ;;  %v4736_v61 = vadd.f32 1e-05, %v1908_v62  ;;  %v4738_v19 = vpop.eup %2753  ;;  %v4756_v38 = vmul.f32 0.0078125, %v1604_v3 }
 0x38c   : > { %v4731_v0 = vpop.xlane.xlu2 %1633  ;;  %v4742_v59 = vadd.f32 1e-05, %v1907_v34  ;;  %v1796_v1 = vmul.f32 0.0078125, %v1704_v37  ;;  %v2006_v57 = vmul.f32 %v4738_v19, %v4696_v51  ;;  %v2435_v58 = vmax.f32 %v2403_v14, 0.0 }
 0x38d   : > { %v2197_v24 = vmul.f32 %v4725_v9, %v2196_v32  ;;  %2755 = vrsqrt.f32 %v4736_v61  ;;  %v2034_v17 = vsel %vm2033_vm3, %v4683_v33, %v2030_v45  ;;  %vm2191_vm4 = vweird.f32 %v4596_v15 }
 0x38e   : > { %2757 = vrsqrt.f32 %v4742_v59  ;;  %v1860_v7 = vsub.f32 %v1796_v1, %v1828_v42  ;;  %v2007_v8 = vmul.f32 %v4738_v19, %v2006_v57  ;;  %v2309_v56 = vmul.f32 %v2034_v17, %v1925_v12  ;;  %v5063_v1 = vld [vmem:[#allocation7_spill] sm:$0xff] }
 0x38f   : > { %v1924_v26 = vsub.f32 %v5062_v60, %v4719_v4  ;;  %v2198_v35 = vmul.f32 0.5, %v2197_v24  ;;  %v2453_v33 = vpack.c.bf16 %v2434_v46, %v2433_v41  ;;  %v2189_v52 = vsub.f32 1.5, %v2188_v18 }
 0x390   : > { %v1892_v23 = vmax.f32 %v1860_v7, 0.0  ;;  %v2008_v48 = vmul.f32 0.5, %v2007_v8  ;;  %v2454_v10 = vpack.c.bf16 %v2436_v54, %v2435_v58  ;;  %v2344_v11 = vmul.f32 %v4661_v16, %v2309_v56 }
 0x391   : > { %v1698_v49 = vpop.xlane.xlu1 %1697  ;;  %vm2192_vm5 = vweird.f32 %v4664_v55  ;;  %v2380_v34 = vadd.f32 %v4678_v43, %v2345_v30  ;;  %v1826_v46 = vmul.f32 %v4756_v38, %v4756_v38  ;;  %v2199_v37 = vsub.f32 1.5, %v2198_v35 }
 0x392   : > { %v4766_v3 = vadd.f32 1e-05, %v1892_v23  ;;  %v2009_v25 = vsub.f32 1.5, %v2008_v48  ;;  %2476 = vmatpush.bf16.xpose.msrb.mxu3 %v2454_v10  ;;  %v1793_v20 = vmul.f32 0.0078125, %v1698_v49  ;;  %v2190_v42 = vmul.f32 %v4664_v55, %v2189_v52  ;;  %vm4802_vm8 = vmor %vm2191_vm4, %vm2192_vm5 }
 0x393   : > { %v1602_v36 = vpop.xlane.xlu0 %1601  ;;  %v4769_v21 = vpop.eup %2755  ;;  %v1940_v14 = vsub.f32 %v5063_v1, %v4671_v39  ;;  %v2379_v57 = vadd.f32 %v4678_v43, %v2344_v11  ;;  %vm2012_vm6 = vweird.f32 %v4738_v19  ;;  %v2412_v54 = vmax.f32 %v2380_v34, 0.0 }
 0x394   : > { %v1700_v62 = vpop.xlane.xlu2 %1699  ;;  %v4772_v12 = vmul.f32 0.0078125, %v1602_v36  ;;  %v4775_v6 = vpop.eup %2757  ;;  %v2176_v41 = vmul.f32 %v4769_v21, %v4736_v61  ;;  %2759 = vrsqrt.f32 %v4766_v3  ;;  %v2010_v8 = vmul.f32 %v4738_v19, %v2009_v25 }
 0x395   : > { %v1794_v32 = vmul.f32 0.0078125, %v1700_v62  ;;  %v2166_v22 = vmul.f32 %v4775_v6, %v4742_v59  ;;  %v2411_v23 = vmax.f32 %v2379_v57, 0.0  ;;  %v2200_v58 = vmul.f32 %v4725_v9, %v2199_v37 }
 0x396   : > { %v1825_v45 = vmul.f32 %v4772_v12, %v4772_v12  ;;  %v2177_v17 = vmul.f32 %v4769_v21, %v2176_v41  ;;  %vm2202_vm7 = vweird.f32 %v4725_v9  ;;  %vm2201_vm9 = vweird.f32 %v4673_v13 }
 0x397   : > { %v1858_v24 = vsub.f32 %v1794_v32, %v1826_v46  ;;  %v2167_v18 = vmul.f32 %v4775_v6, %v2166_v22  ;;  %vm2011_vm10 = vweird.f32 %v4696_v51  ;;  %v2442_v10 = vpack.c.bf16 %v2412_v54, %v2411_v23  ;;  %vm4828_vm12 = vmor %vm2201_vm9, %vm2202_vm7  ;;  %v5070_v22 = vld [vmem:[#allocation8_spill] sm:$0xff] }
 0x398   : > { %v1857_v7 = vsub.f32 %v1793_v20, %v1825_v45  ;;  %vm4812_vm11 = vmor %vm2011_vm10, %vm2012_vm6  ;;  %v4819_v11 = vmul.f32 0.0078125, %v4731_v0  ;;  %v2194_v51 = vsel %vm4802_vm8, %v4664_v55, %v2190_v42  ;;  %v2178_v25 = vmul.f32 0.5, %v2177_v17  ;;  %v5071_v42 = vld [vmem:[#allocation9_spill] sm:$0xff] }
 0x399   : > { %v1890_v30 = vmax.f32 %v1858_v24, 0.0  ;;  %v2168_v56 = vmul.f32 0.5, %v2167_v18  ;;  %v1732_v13 = vpop.xlane.xlu1 %1731  ;;  %2467 = vmatpush.bf16.xpose.msrb.mxu2 %v2442_v10  ;;  %v2014_v41 = vsel %vm4812_vm11, %v4738_v19, %v2010_v8  ;;  %v2204_v37 = vsel %vm4828_vm12, %v4725_v9, %v2200_v58 }
 0x39a   : > { %v1889_v35 = vmax.f32 %v1857_v7, 0.0  ;;  %v4796_v48 = vpop.eup %2759  ;;  %2477 = vmatpush.bf16.xpose.msrb.mxu3 %v2453_v33  ;;  %v1939_v20 = vsub.f32 %v5070_v22, %v4698_v2  ;;  %v1810_v45 = vmul.f32 0.0078125, %v1732_v13  ;;  %v2325_v19 = vmul.f32 %v2194_v51, %v1941_v27 }
 0x39b   : > { %v4808_v52 = vadd.f32 1e-05, %v1890_v30  ;;  %v1636_v36 = vpop.xlane.xlu0 %1635  ;;  %v2016_v15 = vmul.f32 %v4796_v48, %v4766_v3  ;;  %v2169_v46 = vsub.f32 1.5, %v2168_v56  ;;  %vm2171_vm13 = vweird.f32 %v4742_v59 }
 0x39c   : > { %v4821_v32 = vadd.f32 1e-05, %v1889_v35  ;;  %v4833_v0 = vmul.f32 0.0078125, %v1636_v36  ;;  %v1922_v24 = vsub.f32 %v5071_v42, %v4756_v38  ;;  %v2307_v9 = vmul.f32 %v2014_v41, %v1923_v63  ;;  %v5076_v41 = vld [vmem:[#allocation11_spill] sm:$0xff] }
 0x39d   : > { %2761 = vrsqrt.f32 %v4808_v52  ;;  %v2017_v55 = vmul.f32 %v4796_v48, %v2016_v15  ;;  %vm2172_vm15 = vweird.f32 %v4775_v6  ;;  %v2179_v2 = vsub.f32 1.5, %v2178_v25 }
 0x39e   : > { %2763 = vrsqrt.f32 %v4821_v32  ;;  %v1842_v33 = vmul.f32 %v4833_v0, %v4833_v0  ;;  %v2326_v7 = vmul.f32 %v2204_v37, %v1942_v29  ;;  %v2170_v53 = vmul.f32 %v4775_v6, %v2169_v46  ;;  %vm4871_vm2 = vmor %vm2171_vm13, %vm2172_vm15 }
 0x39f   : > { %v2018_v57 = vmul.f32 0.5, %v2017_v55  ;;  %vm2022_vm0 = vweird.f32 %v4796_v48  ;;  %v1841_v27 = vmul.f32 %v4819_v11, %v4819_v11  ;;  %vm2182_vm1 = vweird.f32 %v4769_v21 }
 0x3a0   : > { %v1874_v18 = vsub.f32 %v1810_v45, %v1842_v33  ;;  %vm2021_vm14 = vweird.f32 %v4766_v3  ;;  %v2360_v63 = vmul.f32 %v4661_v16, %v2325_v19  ;;  %v2342_v3 = vmul.f32 %v4661_v16, %v2307_v9 }
 0x3a1   : > { %v2019_v50 = vsub.f32 1.5, %v2018_v57  ;;  %v2180_v30 = vmul.f32 %v4769_v21, %v2179_v2  ;;  %vm2023_vm3 = vmor %vm2021_vm14, %vm2022_vm0  ;;  %v2361_v59 = vmul.f32 %v4661_v16, %v2326_v7  ;;  %v2174_v56 = vsel %vm4871_vm2, %v4775_v6, %v2170_v53 }
 0x3a2   : > { %v1906_v31 = vmax.f32 %v1874_v18, 0.0  ;;  %2478 = vmatpush.bf16.xpose.msrb.mxu3 %v4572_v47  ;;  %vm2181_vm4 = vweird.f32 %v4736_v61  ;;  %v2377_v13 = vadd.f32 %v4678_v43, %v2342_v3  ;;  %v2323_v61 = vmul.f32 %v2174_v56, %v1939_v20 }
 0x3a3   : > { %v2762_v54 = vpop.eup %2761  ;;  %v1730_v28 = vpop.xlane.xlu0 %1729  ;;  %v2020_v40 = vmul.f32 %v4796_v48, %v2019_v50  ;;  %vm4897_vm5 = vmor %vm2181_vm4, %vm2182_vm1  ;;  %v2396_v25 = vadd.f32 %v4678_v43, %v2361_v59  ;;  %v1921_v46 = vsub.f32 %v5076_v41, %v4772_v12  ;;  %vm1991_vm8 = vweird.f32 %v4821_v32 }
 0x3a4   : > { %v2764_v8 = vpop.eup %2763  ;;  %v1996_v29 = vmul.f32 %v2762_v54, %v4808_v52  ;;  %v1809_v17 = vmul.f32 0.0078125, %v1730_v28  ;;  %v4882_v58 = vadd.f32 1e-05, %v1906_v31  ;;  %v2184_v4 = vsel %vm4897_vm5, %v4769_v21, %v2180_v30  ;;  %v5077_v30 = vld [vmem:[#allocation12_spill] sm:$0xff] }
 0x3a5   : > { %v1986_v23 = vmul.f32 %v2764_v8, %v4821_v32  ;;  %v2024_v10 = vsel %vm2023_vm3, %v4796_v48, %v2020_v40  ;;  %v2395_v48 = vadd.f32 %v4678_v43, %v2360_v63  ;;  %vm2002_vm6 = vweird.f32 %v2762_v54 }
 0x3a6   : > { %v1997_v35 = vmul.f32 %v2762_v54, %v1996_v29  ;;  %v1873_v49 = vsub.f32 %v1809_v17, %v1841_v27  ;;  %2765 = vrsqrt.f32 %v4882_v58  ;;  %v2308_v62 = vmul.f32 %v2024_v10, %v1924_v26 }
 0x3a7   : > { %v1987_v36 = vmul.f32 %v2764_v8, %v1986_v23  ;;  %vm1992_vm7 = vweird.f32 %v2764_v8  ;;  %vm2001_vm9 = vweird.f32 %v4808_v52  ;;  %v2409_v45 = vmax.f32 %v2377_v13, 0.0 }
 0x3a8   : > { %v1998_v6 = vmul.f32 0.5, %v1997_v35  ;;  %v1905_v15 = vmax.f32 %v1873_v49, 0.0  ;;  %v2343_v34 = vmul.f32 %v4661_v16, %v2308_v62  ;;  %vm2003_vm10 = vmor %vm2001_vm9, %vm2002_vm6  ;;  %v2324_v12 = vmul.f32 %v2184_v4, %v1940_v14 }
 0x3a9   : > { %v1988_v51 = vmul.f32 0.5, %v1987_v36  ;;  %vm1993_vm11 = vmor %vm1991_vm8, %vm1992_vm7  ;;  %v2428_v32 = vmax.f32 %v2396_v25, 0.0  ;;  %v2358_v52 = vmul.f32 %v4661_v16, %v2323_v61  ;;  %v2786_v1 = vmov 0   ;;  %v2439_v61 = vld [vmem:[%s4966_s9] sm:$0xf] }
 0x3aa   : > { %v1999_v60 = vsub.f32 1.5, %v1998_v6  ;;  %v4907_v26 = vadd.f32 1e-05, %v1905_v15  ;;  %v2378_v37 = vadd.f32 %v4678_v43, %v2343_v34  ;;  %2479 = vmatpush.bf16.xpose.msrb.mxu3 %v4532_v44  ;;  %v2456_v44 = vld [vmem:[%s4967_s10] sm:$0xff]  ;;  %2633 = vset.pattern.permute.xlu2 %v2786_v1  ;;  %v2427_v14 = vmax.f32 %v2395_v48, 0.0 }
 0x3ab   : > { %v1989_v55 = vsub.f32 1.5, %v1988_v51  ;;  %2634 = vset.pattern.permute.xlu0 %v2786_v1  ;;  %v2359_v50 = vmul.f32 %v4661_v16, %v2324_v12  ;;  %2459 = vperm.xlu2 %2633, %v2456_v44   ;;  %v2393_v28 = vadd.f32 %v4678_v43, %v2358_v52  ;;  %vm2161_vm13 = vweird.f32 %v4882_v58 }
 0x3ac   : > { %v2000_v22 = vmul.f32 %v2762_v54, %v1999_v60  ;;  %2767 = vrsqrt.f32 %v4907_v26  ;;  %v2766_v21 = vpop.eup %2765  ;;  %v2410_v33 = vmax.f32 %v2378_v37, 0.0  ;;  %v1938_v23 = vsub.f32 %v5077_v30, %v4833_v0 }
 0x3ad   : > { %v1990_v20 = vmul.f32 %v2764_v8, %v1989_v55  ;;  %v2156_v19 = vmul.f32 %v2766_v21, %v4882_v58  ;;  %vm2162_vm12 = vweird.f32 %v2766_v21  ;;  %v2394_v40 = vadd.f32 %v4678_v43, %v2359_v50  ;;  %v5078_v58 = vld [vmem:[#allocation10_spill] sm:$0xff] }
 0x3ae   : > { %v2004_v57 = vsel %vm2003_vm10, %v2762_v54, %v2000_v22  ;;  %v2441_v2 = vpack.c.bf16 %v2410_v33, %v2409_v45  ;;  %vm2163_vm15 = vmor %vm2161_vm13, %vm2162_vm12  ;;  %v2425_v56 = vmax.f32 %v2393_v28, 0.0  ;;  %vm2151_vm1 = vweird.f32 %v4907_v26 }
 0x3af   : > { %v1994_v9 = vsel %vm1993_vm11, %v2764_v8, %v1990_v20  ;;  %v2306_v18 = vmul.f32 %v2004_v57, %v1922_v24  ;;  %v2157_v39 = vmul.f32 %v2766_v21, %v2156_v19  ;;  %v2450_v24 = vpack.c.bf16 %v2428_v32, %v2427_v14 }
 0x3b0   : > { %v2305_v7 = vmul.f32 %v1994_v9, %v1921_v46  ;;  %2468 = vmatpush.bf16.xpose.msrb.mxu2 %v2441_v2  ;;  %v2426_v62 = vmax.f32 %v2394_v40, 0.0  ;;  %v1937_v15 = vsub.f32 %v5078_v58, %v4819_v11 }
 0x3b1   : > { %v2341_v53 = vmul.f32 %v4661_v16, %v2306_v18  ;;  %v2158_v54 = vmul.f32 0.5, %v2157_v39 }
 0x3b2   : > { %v2768_v27 = vpop.eup %2767  ;;  %v2340_v38 = vmul.f32 %v4661_v16, %v2305_v7  ;;  %2480 = vmatpush.bf16.xpose.msrb.mxu3 %v2450_v24  ;;  %v2449_v6 = vpack.c.bf16 %v2426_v62, %v2425_v56 }
 0x3b3   : > { %v2146_v42 = vmul.f32 %v2768_v27, %v4907_v26  ;;  %v2376_v31 = vadd.f32 %v4678_v43, %v2341_v53  ;;  %v2159_v63 = vsub.f32 1.5, %v2158_v54  ;;  %vm2152_vm0 = vweird.f32 %v2768_v27 }
 0x3b4   : > { %v2375_v8 = vadd.f32 %v4678_v43, %v2340_v38  ;;  %vm2153_vm14 = vmor %vm2151_vm1, %vm2152_vm0 }
 0x3b5   : > { %v2147_v5 = vmul.f32 %v2768_v27, %v2146_v42  ;;  %v2160_v29 = vmul.f32 %v2766_v21, %v2159_v63  ;;  %v2408_v3 = vmax.f32 %v2376_v31, 0.0 }
 0x3b6   : > { %v2407_v17 = vmax.f32 %v2375_v8, 0.0 }
 0x3b7   : > { %v2148_v59 = vmul.f32 0.5, %v2147_v5  ;;  %v2164_v35 = vsel %vm2163_vm15, %v2766_v21, %v2160_v29 }
 0x3b8   : > { %v2440_v49 = vpack.c.bf16 %v2408_v3, %v2407_v17  ;;  %v2322_v10 = vmul.f32 %v2164_v35, %v1938_v23 }
 0x3b9   : > { %v2149_v36 = vsub.f32 1.5, %v2148_v59 }
 0x3ba   : > { %2469 = vmatpush.bf16.xpose.msrb.mxu2 %v2440_v49  ;;  %v2357_v0 = vmul.f32 %v4661_v16, %v2322_v10  ;;  %2481 = vmatpush.bf16.xpose.msrb.mxu3 %v2449_v6 }
 0x3bb   : > { %v2150_v47 = vmul.f32 %v2768_v27, %v2149_v36 }
 0x3bc   : > { %v2392_v34 = vadd.f32 %v4678_v43, %v2357_v0 }
 0x3bd   : > { %v2154_v13 = vsel %vm2153_vm14, %v2768_v27, %v2150_v47 }
 0x3be   : > { %v2321_v48 = vmul.f32 %v2154_v13, %v1937_v15  ;;  %v2424_v11 = vmax.f32 %v2392_v34, 0.0 }
 0x3c0   : > { %v2356_v51 = vmul.f32 %v4661_v16, %v2321_v48 }
 0x3c1   : > { %2470 = vmatmul.bf16.vlgmr.msrb.gmra.mxu2 %v2439_v61 }
 0x3c2   : > { %v2391_v4 = vadd.f32 %v4678_v43, %v2356_v51 }
 0x3c4   : > { %v2423_v60 = vmax.f32 %v2391_v4, 0.0 }
 0x3c6   : > { %v2448_v26 = vpack.c.bf16 %v2424_v11, %v2423_v60 }
 0x3c8   : > { %2482 = vmatpush.bf16.xpose.msrb.mxu3 %v2448_v26 }
 0x3cf   : > { %2483 = vmatmul.bf16.vlgmr.msrb.gmra.mxu3 %v2439_v61 }
 0x405   : > { %v2460_v25 = vpop.permute.xlu2 %2459 }
 0x444   : > { %v2471_v41 = vpop.f32.mrf.mxu2 }
 0x445   : > { %v2472_v46 = vadd.f32 %v2471_v41, %v2460_v25 }
 0x447   : > { %2769 = vtanh.f32 %v2472_v46 }
 0x44c   : > { %v2473_v16 = vpop.f32.mrf.mxu2 }
 0x44d   : > { %v2770_v43 = vpop.eup %2769 }
 0x44e   : > { %2490 = vst [vmem:[%s388_s21] sm:$0xff] %v2770_v43 }
 0x452   : > { %v2484_v55 = vpop.f32.mrf.mxu3 }
 0x453   : > { %v2485_v37 = vadd.f32 %v2484_v55, %v2460_v25 }
 0x455   : > { %2771 = vtanh.f32 %v2485_v37 }
 0x45a   : > { %v2486_v22 = vpop.f32.mrf.mxu3 }
 0x45b   : > { %v2772_v21 = vpop.eup %2771 }
 0x45c   : > { %2491 = vst [vmem:[%s388_s21 + $0x8] sm:$0xff] %v2772_v21 }
 0x45d PF: > { %s21_s17 = sadd.s32 1, %s2784_s17  }
 0x45e   : > { %p18_p5 = scmp.ge.s32.totalorder %s21_s17, 4  }
 0x460   :  { %20 = sbr.rel (!%p18_p5) target bundleno = 1 (0x1), region = 94 }

</bundles_post_ra>
